<compile_context>
chip_gen: v7x
topology: tpu7x:2x2x1
jax: 0.10.0
libtpu: 0.0.40
codegen_flags: <defaults>
</compile_context>

<pallas_src>
import math
from functools import partial

import numpy as np
import jax
import jax.numpy as jnp
from jax import lax
from jax.experimental import pallas as pl
from jax.experimental.pallas import tpu as pltpu


# ------------------------------ shared math helpers ------------------------------
def _layer_norm(x, w, b, eps=1e-5):
    mean = jnp.mean(x, axis=-1, keepdims=True)
    d = x - mean
    var = jnp.mean(d * d, axis=-1, keepdims=True)
    return d * lax.rsqrt(var + eps) * w + b


def _gelu_tanh(x):
    # TODO(synk): nn.GELU() defaults to the exact erf formulation; the tanh approximation
    # is used in both kernel and reference for robust Mosaic (EUP) lowering.
    c = math.sqrt(2.0 / math.pi)
    return 0.5 * x * (1.0 + jnp.tanh(c * (x + 0.044715 * x * x * x)))


# ---------------------------------- fused Pallas kernel ----------------------------------
def transformer_kernel(idx_ref,                       # scalar-prefetch: (B, L) int32 in SMEM
                       tok_ref, pos_ref,              # (V, D) f32, (L, D) f32
                       ln1w_ref, ln1b_ref, wqkv_ref, bqkv_ref, wproj_ref, bproj_ref, g1_ref,
                       ln2w_ref, ln2b_ref, wfc1_ref, bfc1_ref, wfc2_ref, bfc2_ref, g2_ref,
                       lnfw_ref, lnfb_ref, whead_ref,
                       out_ref,                       # (BT, L, C)
                       x_scr,                         # VMEM scratch (BT*L, D) f32
                       *, num_heads, n_layers, batch_tile, seq_len):
    b = pl.program_id(0)
    BT, L = batch_tile, seq_len
    M = BT * L
    D = tok_ref.shape[1]
    H = num_heads
    dh = D // H
    scale = 1.0 / math.sqrt(dh)
    bf16 = jnp.bfloat16

    # ---- token embedding: SMEM-prefetched idx -> gather of tok_emb rows (no one-hot matmul) ----
    for t in range(M):                                # static unrolled; only the row id is dynamic
        bi, li = divmod(t, L)
        row = idx_ref[b * BT + bi, li]
        x_scr[t:t + 1, :] = tok_ref[pl.ds(row, 1), :]
    x = x_scr[...]                                                          # (M, D) f32
    x = (x.reshape(BT, L, D) + pos_ref[...][None, :, :]).reshape(M, D)

    def split_heads(a):                               # (M, D) -> (BT*H, L, dh)
        return a.reshape(BT, L, H, dh).transpose(0, 2, 1, 3).reshape(BT * H, L, dh)

    for layer in range(n_layers):                     # static loop; all layer weights VMEM-resident
        # ---- attention branch: x + gamma1 * proj(SDPA(LN1(x))) ----
        h1 = _layer_norm(x, ln1w_ref[layer], ln1b_ref[layer])
        qkv = jnp.dot(h1.astype(bf16), wqkv_ref[layer],
                      preferred_element_type=jnp.float32) + bqkv_ref[layer]      # (M, 3D) f32
        q = split_heads(qkv[:, 0 * D:1 * D]).astype(bf16)
        k = split_heads(qkv[:, 1 * D:2 * D]).astype(bf16)
        v = split_heads(qkv[:, 2 * D:3 * D]).astype(bf16)
        s = jnp.einsum("gqd,gkd->gqk", q, k,
                       preferred_element_type=jnp.float32) * scale               # (BT*H, L, L)
        s = s - jnp.max(s, axis=-1, keepdims=True)
        p = jnp.exp(s)
        p = p * pl.reciprocal(jnp.sum(p, axis=-1, keepdims=True), approx=True)
        o = jnp.einsum("gqk,gkd->gqd", p.astype(bf16), v,
                       preferred_element_type=jnp.float32)                       # (BT*H, L, dh)
        o = o.reshape(BT, H, L, dh).transpose(0, 2, 1, 3).reshape(M, D)          # merge heads
        attn = jnp.dot(o.astype(bf16), wproj_ref[layer],
                       preferred_element_type=jnp.float32) + bproj_ref[layer]
        x = x + g1_ref[layer] * attn

        # ---- MLP branch: x + gamma2 * W2(GELU(W1(LN2(x)))) ----
        h2 = _layer_norm(x, ln2w_ref[layer], ln2b_ref[layer])
        u = jnp.dot(h2.astype(bf16), wfc1_ref[layer],
                    preferred_element_type=jnp.float32) + bfc1_ref[layer]
        u = _gelu_tanh(u)
        m = jnp.dot(u.astype(bf16), wfc2_ref[layer],
                    preferred_element_type=jnp.float32) + bfc2_ref[layer]
        x = x + g2_ref[layer] * m

    # ---- final LayerNorm + bias-free head ----
    hf = _layer_norm(x, lnfw_ref[...], lnfb_ref[...])
    logits = jnp.dot(hf.astype(bf16), whead_ref[...],
                     preferred_element_type=jnp.float32)                         # (M, C)
    out_ref[...] = logits.reshape(BT, L, out_ref.shape[2]).astype(out_ref.dtype)


# --------------------------------- pallas_call wrapper ---------------------------------
_BLOCK_KEYS = ("ln1_w", "ln1_b", "w_qkv", "b_qkv", "w_proj", "b_proj", "gamma1",
               "ln2_w", "ln2_b", "w_fc1", "b_fc1", "w_fc2", "b_fc2", "gamma2")


def transformer_forward(idx, params, *, num_heads, batch_tile=None):
    B, L = idx.shape
    tok = params["tok_emb"]
    V, D = tok.shape
    pos = params["pos_emb"][0, :L, :]
    blocks = params["blocks"]
    n_layers = len(blocks)
    C = params["w_head"].shape[1]

    if batch_tile is None:
        # Fold as much batch as possible into the matmul M dim while keeping >= 2 "parallel"
        # grid steps (v7x dual-TensorCore).
        batch_tile = max(1, B // 2)
    assert B % batch_tile == 0
    BT = batch_tile
    M = BT * L

    # Stack per-layer weights on a leading (n_layers, ...) axis -> one fused kernel.
    stacked = [jnp.stack([blk[k] for blk in blocks], axis=0) for k in _BLOCK_KEYS]
    weights = [tok, pos] + stacked + [params["ln_f_w"], params["ln_f_b"], params["w_head"]]

    def const_spec(arr):
        nd = arr.ndim
        # Batch-invariant operand: constant block index -> DMA'd once, VMEM-resident.
        return pl.BlockSpec(arr.shape, lambda b, idx_ref, _nd=nd: (0,) * _nd)

    grid_spec = pltpu.PrefetchScalarGridSpec(
        num_scalar_prefetch=1,                       # idx -> SMEM, gathered inside the kernel
        grid=(B // BT,),
        in_specs=[const_spec(w) for w in weights],
        out_specs=pl.BlockSpec((BT, L, C), lambda b, idx_ref: (b, 0, 0)),
        scratch_shapes=[pltpu.VMEM((M, D), jnp.float32)],
    )
    kernel = partial(transformer_kernel, num_heads=num_heads, n_layers=n_layers,
                     batch_tile=BT, seq_len=L)
    return pl.pallas_call(
        kernel,
        out_shape=jax.ShapeDtypeStruct((B, L, C), jnp.float32),
        grid_spec=grid_spec,
        compiler_params=pltpu.CompilerParams(dimension_semantics=("parallel",)),
    )(idx.astype(jnp.int32), *weights)


# ------------------------------- pure-JAX reference -------------------------------
def transformer_ref(idx, params, *, num_heads):
    bf16 = jnp.bfloat16
    tok = params["tok_emb"]
    B, L = idx.shape
    D = tok.shape[1]
    H = num_heads
    dh = D // H
    x = tok[idx] + params["pos_emb"][:, :L, :]
    for p in params["blocks"]:
        h = _layer_norm(x, p["ln1_w"], p["ln1_b"])
        qkv = jnp.dot(h.astype(bf16), p["w_qkv"], preferred_element_type=jnp.float32) + p["b_qkv"]
        qkv = qkv.reshape(B, L, 3, H, dh).transpose(2, 0, 3, 1, 4)              # K B H L dh
        q, k, v = qkv[0].astype(bf16), qkv[1].astype(bf16), qkv[2].astype(bf16)
        s = jnp.einsum("bhqd,bhkd->bhqk", q, k,
                       preferred_element_type=jnp.float32) * (dh ** -0.5)
        a = jax.nn.softmax(s, axis=-1)
        o = jnp.einsum("bhqk,bhkd->bhqd", a.astype(bf16), v,
                       preferred_element_type=jnp.float32)
        o = o.transpose(0, 2, 1, 3).reshape(B, L, D)
        o = jnp.dot(o.astype(bf16), p["w_proj"], preferred_element_type=jnp.float32) + p["b_proj"]
        x = x + p["gamma1"] * o
        h2 = _layer_norm(x, p["ln2_w"], p["ln2_b"])
        u = _gelu_tanh(jnp.dot(h2.astype(bf16), p["w_fc1"],
                               preferred_element_type=jnp.float32) + p["b_fc1"])
        m = jnp.dot(u.astype(bf16), p["w_fc2"], preferred_element_type=jnp.float32) + p["b_fc2"]
        x = x + p["gamma2"] * m
    x = _layer_norm(x, params["ln_f_w"], params["ln_f_b"])
    return jnp.dot(x.astype(bf16), params["w_head"], preferred_element_type=jnp.float32)


# ------------------------------- parameter construction -------------------------------
def make_params(key, *, vocab, D, L, n_layers, codebook):
    ks = jax.random.split(key, 4 + n_layers)

    def linear(k, din, dout, zero_bias=False):
        kw, kb = jax.random.split(k)
        w = 0.02 * jax.random.normal(kw, (dout, din), jnp.float32)               # torch (out, in)
        b = (jnp.zeros((dout,), jnp.float32) if zero_bias
             else 0.02 * jax.random.normal(kb, (dout,), jnp.float32))
        # pre-transposed; MXU weights stored in bf16 (feedback), biases kept f32
        return w.T.astype(jnp.bfloat16), b.reshape(1, dout)

    def ln_params(k, dim):
        kw, kb = jax.random.split(k)
        return (1.0 + 0.05 * jax.random.normal(kw, (1, dim), jnp.float32),
                0.02 * jax.random.normal(kb, (1, dim), jnp.float32))

    def block_params(k, dim):
        kk = jax.random.split(k, 8)
        ln1_w, ln1_b = ln_params(kk[0], dim)
        ln2_w, ln2_b = ln_params(kk[1], dim)
        w_qkv, b_qkv = linear(kk[2], dim, 3 * dim, zero_bias=True)               # module zeroes qkv bias
        w_proj, b_proj = linear(kk[3], dim, dim)
        w_fc1, b_fc1 = linear(kk[4], dim, 4 * dim)
        w_fc2, b_fc2 = linear(kk[5], 4 * dim, dim)
        gamma1 = 1.0 + 0.05 * jax.random.normal(kk[6], (1, dim), jnp.float32)
        gamma2 = 1.0 + 0.05 * jax.random.normal(kk[7], (1, dim), jnp.float32)
        return dict(ln1_w=ln1_w, ln1_b=ln1_b, ln2_w=ln2_w, ln2_b=ln2_b,
                    w_qkv=w_qkv, b_qkv=b_qkv, w_proj=w_proj, b_proj=b_proj,
                    w_fc1=w_fc1, b_fc1=b_fc1, w_fc2=w_fc2, b_fc2=b_fc2,
                    gamma1=gamma1, gamma2=gamma2)

    tok_emb = 0.02 * jax.random.normal(ks[0], (vocab, D), jnp.float32)
    pos_emb = 0.02 * jax.random.normal(ks[1], (1, L, D), jnp.float32)            # block_size == L here
    ln_f_w, ln_f_b = ln_params(ks[2], D)
    w_head = (0.02 * jax.random.normal(ks[3], (codebook, D), jnp.float32)).T.astype(jnp.bfloat16)
    blocks = [block_params(ks[4 + i], D) for i in range(n_layers)]
    return dict(tok_emb=tok_emb, pos_emb=pos_emb, ln_f_w=ln_f_w, ln_f_b=ln_f_b,
                w_head=w_head, blocks=blocks)


# --------------------------------------- main ---------------------------------------
if __name__ == "__main__":
    B, L = 2, 16           # batch, sequence (block_size)
    D = 128                # bert_n_emb (lane-dense)
    n_heads = 4            # bert_n_head -> head_dim = 32
    n_layers = 2           # bert_n_layers
    codebook = 128         # codebook_size (lane-dense logits)
    vocab = codebook + 1   # non-causal path: vocab_size = codebook_size + 1

    key = jax.random.PRNGKey(0)
    k_params, k_idx = jax.random.split(key)
    params = make_params(k_params, vocab=vocab, D=D, L=L, n_layers=n_layers, codebook=codebook)
    idx = jax.random.randint(k_idx, (B, L), 0, vocab, dtype=jnp.int32)

    logits = transformer_forward(idx, params, num_heads=n_heads)
    logits = jax.block_until_ready(logits)

    ref = transformer_ref(idx, params, num_heads=n_heads)
    ref = jax.block_until_ready(ref)

    # Residual slack covers the deliberate approx-reciprocal softmax (EUP) and bf16 MXU casts,
    # which the reference mirrors except for the reciprocal.
    np.testing.assert_allclose(np.asarray(logits), np.asarray(ref), rtol=5e-3, atol=5e-3)
    print("KERNEL_OK")
</pallas_src>

<mosaic_0001>
module attributes {stable_mosaic.version = 11 : i64} {
  func.func @transformer_kernel(%arg0: i32, %arg1: memref<2x16xi32, #tpu.memory_space<smem>>, %arg2: memref<129x128xf32, #tpu.memory_space<vmem>>, %arg3: memref<16x128xf32, #tpu.memory_space<vmem>>, %arg4: memref<2x1x128xf32, #tpu.memory_space<vmem>>, %arg5: memref<2x1x128xf32, #tpu.memory_space<vmem>>, %arg6: memref<2x128x384xbf16, #tpu.memory_space<vmem>>, %arg7: memref<2x1x384xf32, #tpu.memory_space<vmem>>, %arg8: memref<2x128x128xbf16, #tpu.memory_space<vmem>>, %arg9: memref<2x1x128xf32, #tpu.memory_space<vmem>>, %arg10: memref<2x1x128xf32, #tpu.memory_space<vmem>>, %arg11: memref<2x1x128xf32, #tpu.memory_space<vmem>>, %arg12: memref<2x1x128xf32, #tpu.memory_space<vmem>>, %arg13: memref<2x128x512xbf16, #tpu.memory_space<vmem>>, %arg14: memref<2x1x512xf32, #tpu.memory_space<vmem>>, %arg15: memref<2x512x128xbf16, #tpu.memory_space<vmem>>, %arg16: memref<2x1x128xf32, #tpu.memory_space<vmem>>, %arg17: memref<2x1x128xf32, #tpu.memory_space<vmem>>, %arg18: memref<1x128xf32, #tpu.memory_space<vmem>>, %arg19: memref<1x128xf32, #tpu.memory_space<vmem>>, %arg20: memref<128x128xbf16, #tpu.memory_space<vmem>>, %arg21: memref<1x16x128xf32, #tpu.memory_space<vmem>>, %arg22: memref<16x128xf32, #tpu.memory_space<vmem>>) attributes {dimension_semantics = [#tpu.dimension_semantics<parallel>], iteration_bounds = array<i64: 2>, scalar_prefetch = 1 : i64, scratch_operands = 1 : i64, tpu.core_type = #tpu.core_type<tc>, window_params = [{pipeline_mode = #tpu.pipeline_mode<synchronous>, transform_indices = @transform_0, window_bounds = array<i64: 129, 128>}, {pipeline_mode = #tpu.pipeline_mode<synchronous>, transform_indices = @transform_1, window_bounds = array<i64: 16, 128>}, {pipeline_mode = #tpu.pipeline_mode<synchronous>, transform_indices = @transform_2, window_bounds = array<i64: 2, 1, 128>}, {pipeline_mode = #tpu.pipeline_mode<synchronous>, transform_indices = @transform_3, window_bounds = array<i64: 2, 1, 128>}, {pipeline_mode = #tpu.pipeline_mode<synchronous>, transform_indices = @transform_4, window_bounds = array<i64: 2, 128, 384>}, {pipeline_mode = #tpu.pipeline_mode<synchronous>, transform_indices = @transform_5, window_bounds = array<i64: 2, 1, 384>}, {pipeline_mode = #tpu.pipeline_mode<synchronous>, transform_indices = @transform_6, window_bounds = array<i64: 2, 128, 128>}, {pipeline_mode = #tpu.pipeline_mode<synchronous>, transform_indices = @transform_7, window_bounds = array<i64: 2, 1, 128>}, {pipeline_mode = #tpu.pipeline_mode<synchronous>, transform_indices = @transform_8, window_bounds = array<i64: 2, 1, 128>}, {pipeline_mode = #tpu.pipeline_mode<synchronous>, transform_indices = @transform_9, window_bounds = array<i64: 2, 1, 128>}, {pipeline_mode = #tpu.pipeline_mode<synchronous>, transform_indices = @transform_10, window_bounds = array<i64: 2, 1, 128>}, {pipeline_mode = #tpu.pipeline_mode<synchronous>, transform_indices = @transform_11, window_bounds = array<i64: 2, 128, 512>}, {pipeline_mode = #tpu.pipeline_mode<synchronous>, transform_indices = @transform_12, window_bounds = array<i64: 2, 1, 512>}, {pipeline_mode = #tpu.pipeline_mode<synchronous>, transform_indices = @transform_13, window_bounds = array<i64: 2, 512, 128>}, {pipeline_mode = #tpu.pipeline_mode<synchronous>, transform_indices = @transform_14, window_bounds = array<i64: 2, 1, 128>}, {pipeline_mode = #tpu.pipeline_mode<synchronous>, transform_indices = @transform_15, window_bounds = array<i64: 2, 1, 128>}, {pipeline_mode = #tpu.pipeline_mode<synchronous>, transform_indices = @transform_16, window_bounds = array<i64: 1, 128>}, {pipeline_mode = #tpu.pipeline_mode<synchronous>, transform_indices = @transform_17, window_bounds = array<i64: 1, 128>}, {pipeline_mode = #tpu.pipeline_mode<synchronous>, transform_indices = @transform_18, window_bounds = array<i64: 128, 128>}, {transform_indices = @transform_19, window_bounds = array<i64: 1, 16, 128>}]} {
    %c1_i32 = arith.constant 1 : i32
    %0 = arith.muli %arg0, %c1_i32 : i32
    %c0_i32 = arith.constant 0 : i32
    %1 = arith.addi %0, %c0_i32 : i32
    %2 = arith.index_cast %1 : i32 to index
    %c0 = arith.constant 0 : index
    %3 = memref.load %arg1[%2, %c0] : memref<2x16xi32, #tpu.memory_space<smem>>
    %4 = arith.index_cast %3 : i32 to index
    %c0_0 = arith.constant 0 : index
    %5 = vector.load %arg2[%4, %c0_0] : memref<129x128xf32, #tpu.memory_space<vmem>>, vector<1x128xf32>
    %c0_1 = arith.constant 0 : index
    %c0_2 = arith.constant 0 : index
    %6 = vector.load %arg22[%c0_1, %c0_2] : memref<16x128xf32, #tpu.memory_space<vmem>>, vector<1x128xf32>
    tpu.vector_store %arg22[%c0_1, %c0_2], %5 {strides = array<i32>} : memref<16x128xf32, #tpu.memory_space<vmem>>, vector<1x128xf32>,
    %c1_i32_3 = arith.constant 1 : i32
    %7 = arith.muli %arg0, %c1_i32_3 : i32
    %c0_i32_4 = arith.constant 0 : i32
    %8 = arith.addi %7, %c0_i32_4 : i32
    %9 = arith.index_cast %8 : i32 to index
    %c1 = arith.constant 1 : index
    %10 = memref.load %arg1[%9, %c1] : memref<2x16xi32, #tpu.memory_space<smem>>
    %11 = arith.index_cast %10 : i32 to index
    %c0_5 = arith.constant 0 : index
    %12 = vector.load %arg2[%11, %c0_5] : memref<129x128xf32, #tpu.memory_space<vmem>>, vector<1x128xf32>
    %c1_6 = arith.constant 1 : index
    %c0_7 = arith.constant 0 : index
    %13 = vector.load %arg22[%c1_6, %c0_7] : memref<16x128xf32, #tpu.memory_space<vmem>>, vector<1x128xf32>
    tpu.vector_store %arg22[%c1_6, %c0_7], %12 {strides = array<i32>} : memref<16x128xf32, #tpu.memory_space<vmem>>, vector<1x128xf32>,
    %c1_i32_8 = arith.constant 1 : i32
    %14 = arith.muli %arg0, %c1_i32_8 : i32
    %c0_i32_9 = arith.constant 0 : i32
    %15 = arith.addi %14, %c0_i32_9 : i32
    %16 = arith.index_cast %15 : i32 to index
    %c2 = arith.constant 2 : index
    %17 = memref.load %arg1[%16, %c2] : memref<2x16xi32, #tpu.memory_space<smem>>
    %18 = arith.index_cast %17 : i32 to index
    %c0_10 = arith.constant 0 : index
    %19 = vector.load %arg2[%18, %c0_10] : memref<129x128xf32, #tpu.memory_space<vmem>>, vector<1x128xf32>
    %c2_11 = arith.constant 2 : index
    %c0_12 = arith.constant 0 : index
    %20 = vector.load %arg22[%c2_11, %c0_12] : memref<16x128xf32, #tpu.memory_space<vmem>>, vector<1x128xf32>
    tpu.vector_store %arg22[%c2_11, %c0_12], %19 {strides = array<i32>} : memref<16x128xf32, #tpu.memory_space<vmem>>, vector<1x128xf32>,
    %c1_i32_13 = arith.constant 1 : i32
    %21 = arith.muli %arg0, %c1_i32_13 : i32
    %c0_i32_14 = arith.constant 0 : i32
    %22 = arith.addi %21, %c0_i32_14 : i32
    %23 = arith.index_cast %22 : i32 to index
    %c3 = arith.constant 3 : index
    %24 = memref.load %arg1[%23, %c3] : memref<2x16xi32, #tpu.memory_space<smem>>
    %25 = arith.index_cast %24 : i32 to index
    %c0_15 = arith.constant 0 : index
    %26 = vector.load %arg2[%25, %c0_15] : memref<129x128xf32, #tpu.memory_space<vmem>>, vector<1x128xf32>
    %c3_16 = arith.constant 3 : index
    %c0_17 = arith.constant 0 : index
    %27 = vector.load %arg22[%c3_16, %c0_17] : memref<16x128xf32, #tpu.memory_space<vmem>>, vector<1x128xf32>
    tpu.vector_store %arg22[%c3_16, %c0_17], %26 {strides = array<i32>} : memref<16x128xf32, #tpu.memory_space<vmem>>, vector<1x128xf32>,
    %c1_i32_18 = arith.constant 1 : i32
    %28 = arith.muli %arg0, %c1_i32_18 : i32
    %c0_i32_19 = arith.constant 0 : i32
    %29 = arith.addi %28, %c0_i32_19 : i32
    %30 = arith.index_cast %29 : i32 to index
    %c4 = arith.constant 4 : index
    %31 = memref.load %arg1[%30, %c4] : memref<2x16xi32, #tpu.memory_space<smem>>
    %32 = arith.index_cast %31 : i32 to index
    %c0_20 = arith.constant 0 : index
    %33 = vector.load %arg2[%32, %c0_20] : memref<129x128xf32, #tpu.memory_space<vmem>>, vector<1x128xf32>
    %c4_21 = arith.constant 4 : index
    %c0_22 = arith.constant 0 : index
    %34 = vector.load %arg22[%c4_21, %c0_22] : memref<16x128xf32, #tpu.memory_space<vmem>>, vector<1x128xf32>
    tpu.vector_store %arg22[%c4_21, %c0_22], %33 {strides = array<i32>} : memref<16x128xf32, #tpu.memory_space<vmem>>, vector<1x128xf32>,
    %c1_i32_23 = arith.constant 1 : i32
    %35 = arith.muli %arg0, %c1_i32_23 : i32
    %c0_i32_24 = arith.constant 0 : i32
    %36 = arith.addi %35, %c0_i32_24 : i32
    %37 = arith.index_cast %36 : i32 to index
    %c5 = arith.constant 5 : index
    %38 = memref.load %arg1[%37, %c5] : memref<2x16xi32, #tpu.memory_space<smem>>
    %39 = arith.index_cast %38 : i32 to index
    %c0_25 = arith.constant 0 : index
    %40 = vector.load %arg2[%39, %c0_25] : memref<129x128xf32, #tpu.memory_space<vmem>>, vector<1x128xf32>
    %c5_26 = arith.constant 5 : index
    %c0_27 = arith.constant 0 : index
    %41 = vector.load %arg22[%c5_26, %c0_27] : memref<16x128xf32, #tpu.memory_space<vmem>>, vector<1x128xf32>
    tpu.vector_store %arg22[%c5_26, %c0_27], %40 {strides = array<i32>} : memref<16x128xf32, #tpu.memory_space<vmem>>, vector<1x128xf32>,
    %c1_i32_28 = arith.constant 1 : i32
    %42 = arith.muli %arg0, %c1_i32_28 : i32
    %c0_i32_29 = arith.constant 0 : i32
    %43 = arith.addi %42, %c0_i32_29 : i32
    %44 = arith.index_cast %43 : i32 to index
    %c6 = arith.constant 6 : index
    %45 = memref.load %arg1[%44, %c6] : memref<2x16xi32, #tpu.memory_space<smem>>
    %46 = arith.index_cast %45 : i32 to index
    %c0_30 = arith.constant 0 : index
    %47 = vector.load %arg2[%46, %c0_30] : memref<129x128xf32, #tpu.memory_space<vmem>>, vector<1x128xf32>
    %c6_31 = arith.constant 6 : index
    %c0_32 = arith.constant 0 : index
    %48 = vector.load %arg22[%c6_31, %c0_32] : memref<16x128xf32, #tpu.memory_space<vmem>>, vector<1x128xf32>
    tpu.vector_store %arg22[%c6_31, %c0_32], %47 {strides = array<i32>} : memref<16x128xf32, #tpu.memory_space<vmem>>, vector<1x128xf32>,
    %c1_i32_33 = arith.constant 1 : i32
    %49 = arith.muli %arg0, %c1_i32_33 : i32
    %c0_i32_34 = arith.constant 0 : i32
    %50 = arith.addi %49, %c0_i32_34 : i32
    %51 = arith.index_cast %50 : i32 to index
    %c7 = arith.constant 7 : index
    %52 = memref.load %arg1[%51, %c7] : memref<2x16xi32, #tpu.memory_space<smem>>
    %53 = arith.index_cast %52 : i32 to index
    %c0_35 = arith.constant 0 : index
    %54 = vector.load %arg2[%53, %c0_35] : memref<129x128xf32, #tpu.memory_space<vmem>>, vector<1x128xf32>
    %c7_36 = arith.constant 7 : index
    %c0_37 = arith.constant 0 : index
    %55 = vector.load %arg22[%c7_36, %c0_37] : memref<16x128xf32, #tpu.memory_space<vmem>>, vector<1x128xf32>
    tpu.vector_store %arg22[%c7_36, %c0_37], %54 {strides = array<i32>} : memref<16x128xf32, #tpu.memory_space<vmem>>, vector<1x128xf32>,
    %c1_i32_38 = arith.constant 1 : i32
    %56 = arith.muli %arg0, %c1_i32_38 : i32
    %c0_i32_39 = arith.constant 0 : i32
    %57 = arith.addi %56, %c0_i32_39 : i32
    %58 = arith.index_cast %57 : i32 to index
    %c8 = arith.constant 8 : index
    %59 = memref.load %arg1[%58, %c8] : memref<2x16xi32, #tpu.memory_space<smem>>
    %60 = arith.index_cast %59 : i32 to index
    %c0_40 = arith.constant 0 : index
    %61 = vector.load %arg2[%60, %c0_40] : memref<129x128xf32, #tpu.memory_space<vmem>>, vector<1x128xf32>
    %c8_41 = arith.constant 8 : index
    %c0_42 = arith.constant 0 : index
    %62 = vector.load %arg22[%c8_41, %c0_42] : memref<16x128xf32, #tpu.memory_space<vmem>>, vector<1x128xf32>
    tpu.vector_store %arg22[%c8_41, %c0_42], %61 {strides = array<i32>} : memref<16x128xf32, #tpu.memory_space<vmem>>, vector<1x128xf32>,
    %c1_i32_43 = arith.constant 1 : i32
    %63 = arith.muli %arg0, %c1_i32_43 : i32
    %c0_i32_44 = arith.constant 0 : i32
    %64 = arith.addi %63, %c0_i32_44 : i32
    %65 = arith.index_cast %64 : i32 to index
    %c9 = arith.constant 9 : index
    %66 = memref.load %arg1[%65, %c9] : memref<2x16xi32, #tpu.memory_space<smem>>
    %67 = arith.index_cast %66 : i32 to index
    %c0_45 = arith.constant 0 : index
    %68 = vector.load %arg2[%67, %c0_45] : memref<129x128xf32, #tpu.memory_space<vmem>>, vector<1x128xf32>
    %c9_46 = arith.constant 9 : index
    %c0_47 = arith.constant 0 : index
    %69 = vector.load %arg22[%c9_46, %c0_47] : memref<16x128xf32, #tpu.memory_space<vmem>>, vector<1x128xf32>
    tpu.vector_store %arg22[%c9_46, %c0_47], %68 {strides = array<i32>} : memref<16x128xf32, #tpu.memory_space<vmem>>, vector<1x128xf32>,
    %c1_i32_48 = arith.constant 1 : i32
    %70 = arith.muli %arg0, %c1_i32_48 : i32
    %c0_i32_49 = arith.constant 0 : i32
    %71 = arith.addi %70, %c0_i32_49 : i32
    %72 = arith.index_cast %71 : i32 to index
    %c10 = arith.constant 10 : index
    %73 = memref.load %arg1[%72, %c10] : memref<2x16xi32, #tpu.memory_space<smem>>
    %74 = arith.index_cast %73 : i32 to index
    %c0_50 = arith.constant 0 : index
    %75 = vector.load %arg2[%74, %c0_50] : memref<129x128xf32, #tpu.memory_space<vmem>>, vector<1x128xf32>
    %c10_51 = arith.constant 10 : index
    %c0_52 = arith.constant 0 : index
    %76 = vector.load %arg22[%c10_51, %c0_52] : memref<16x128xf32, #tpu.memory_space<vmem>>, vector<1x128xf32>
    tpu.vector_store %arg22[%c10_51, %c0_52], %75 {strides = array<i32>} : memref<16x128xf32, #tpu.memory_space<vmem>>, vector<1x128xf32>,
    %c1_i32_53 = arith.constant 1 : i32
    %77 = arith.muli %arg0, %c1_i32_53 : i32
    %c0_i32_54 = arith.constant 0 : i32
    %78 = arith.addi %77, %c0_i32_54 : i32
    %79 = arith.index_cast %78 : i32 to index
    %c11 = arith.constant 11 : index
    %80 = memref.load %arg1[%79, %c11] : memref<2x16xi32, #tpu.memory_space<smem>>
    %81 = arith.index_cast %80 : i32 to index
    %c0_55 = arith.constant 0 : index
    %82 = vector.load %arg2[%81, %c0_55] : memref<129x128xf32, #tpu.memory_space<vmem>>, vector<1x128xf32>
    %c11_56 = arith.constant 11 : index
    %c0_57 = arith.constant 0 : index
    %83 = vector.load %arg22[%c11_56, %c0_57] : memref<16x128xf32, #tpu.memory_space<vmem>>, vector<1x128xf32>
    tpu.vector_store %arg22[%c11_56, %c0_57], %82 {strides = array<i32>} : memref<16x128xf32, #tpu.memory_space<vmem>>, vector<1x128xf32>,
    %c1_i32_58 = arith.constant 1 : i32
    %84 = arith.muli %arg0, %c1_i32_58 : i32
    %c0_i32_59 = arith.constant 0 : i32
    %85 = arith.addi %84, %c0_i32_59 : i32
    %86 = arith.index_cast %85 : i32 to index
    %c12 = arith.constant 12 : index
    %87 = memref.load %arg1[%86, %c12] : memref<2x16xi32, #tpu.memory_space<smem>>
    %88 = arith.index_cast %87 : i32 to index
    %c0_60 = arith.constant 0 : index
    %89 = vector.load %arg2[%88, %c0_60] : memref<129x128xf32, #tpu.memory_space<vmem>>, vector<1x128xf32>
    %c12_61 = arith.constant 12 : index
    %c0_62 = arith.constant 0 : index
    %90 = vector.load %arg22[%c12_61, %c0_62] : memref<16x128xf32, #tpu.memory_space<vmem>>, vector<1x128xf32>
    tpu.vector_store %arg22[%c12_61, %c0_62], %89 {strides = array<i32>} : memref<16x128xf32, #tpu.memory_space<vmem>>, vector<1x128xf32>,
    %c1_i32_63 = arith.constant 1 : i32
    %91 = arith.muli %arg0, %c1_i32_63 : i32
    %c0_i32_64 = arith.constant 0 : i32
    %92 = arith.addi %91, %c0_i32_64 : i32
    %93 = arith.index_cast %92 : i32 to index
    %c13 = arith.constant 13 : index
    %94 = memref.load %arg1[%93, %c13] : memref<2x16xi32, #tpu.memory_space<smem>>
    %95 = arith.index_cast %94 : i32 to index
    %c0_65 = arith.constant 0 : index
    %96 = vector.load %arg2[%95, %c0_65] : memref<129x128xf32, #tpu.memory_space<vmem>>, vector<1x128xf32>
    %c13_66 = arith.constant 13 : index
    %c0_67 = arith.constant 0 : index
    %97 = vector.load %arg22[%c13_66, %c0_67] : memref<16x128xf32, #tpu.memory_space<vmem>>, vector<1x128xf32>
    tpu.vector_store %arg22[%c13_66, %c0_67], %96 {strides = array<i32>} : memref<16x128xf32, #tpu.memory_space<vmem>>, vector<1x128xf32>,
    %c1_i32_68 = arith.constant 1 : i32
    %98 = arith.muli %arg0, %c1_i32_68 : i32
    %c0_i32_69 = arith.constant 0 : i32
    %99 = arith.addi %98, %c0_i32_69 : i32
    %100 = arith.index_cast %99 : i32 to index
    %c14 = arith.constant 14 : index
    %101 = memref.load %arg1[%100, %c14] : memref<2x16xi32, #tpu.memory_space<smem>>
    %102 = arith.index_cast %101 : i32 to index
    %c0_70 = arith.constant 0 : index
    %103 = vector.load %arg2[%102, %c0_70] : memref<129x128xf32, #tpu.memory_space<vmem>>, vector<1x128xf32>
    %c14_71 = arith.constant 14 : index
    %c0_72 = arith.constant 0 : index
    %104 = vector.load %arg22[%c14_71, %c0_72] : memref<16x128xf32, #tpu.memory_space<vmem>>, vector<1x128xf32>
    tpu.vector_store %arg22[%c14_71, %c0_72], %103 {strides = array<i32>} : memref<16x128xf32, #tpu.memory_space<vmem>>, vector<1x128xf32>,
    %c1_i32_73 = arith.constant 1 : i32
    %105 = arith.muli %arg0, %c1_i32_73 : i32
    %c0_i32_74 = arith.constant 0 : i32
    %106 = arith.addi %105, %c0_i32_74 : i32
    %107 = arith.index_cast %106 : i32 to index
    %c15 = arith.constant 15 : index
    %108 = memref.load %arg1[%107, %c15] : memref<2x16xi32, #tpu.memory_space<smem>>
    %109 = arith.index_cast %108 : i32 to index
    %c0_75 = arith.constant 0 : index
    %110 = vector.load %arg2[%109, %c0_75] : memref<129x128xf32, #tpu.memory_space<vmem>>, vector<1x128xf32>
    %c15_76 = arith.constant 15 : index
    %c0_77 = arith.constant 0 : index
    %111 = vector.load %arg22[%c15_76, %c0_77] : memref<16x128xf32, #tpu.memory_space<vmem>>, vector<1x128xf32>
    tpu.vector_store %arg22[%c15_76, %c0_77], %110 {strides = array<i32>} : memref<16x128xf32, #tpu.memory_space<vmem>>, vector<1x128xf32>,
    %c0_78 = arith.constant 0 : index
    %c0_79 = arith.constant 0 : index
    %112 = vector.load %arg22[%c0_78, %c0_79] : memref<16x128xf32, #tpu.memory_space<vmem>>, vector<16x128xf32>
    %113 = vector.shape_cast %112 : vector<16x128xf32> to vector<1x16x128xf32>
    %c0_80 = arith.constant 0 : index
    %c0_81 = arith.constant 0 : index
    %114 = vector.load %arg3[%c0_80, %c0_81] : memref<16x128xf32, #tpu.memory_space<vmem>>, vector<16x128xf32>
    %115 = vector.shape_cast %114 : vector<16x128xf32> to vector<1x16x128xf32>
    %116 = arith.addf %113, %115 : vector<1x16x128xf32>
    %117 = vector.shape_cast %116 : vector<1x16x128xf32> to vector<16x128xf32>
    %c0_82 = arith.constant 0 : index
    %c0_83 = arith.constant 0 : index
    %c0_84 = arith.constant 0 : index
    %118 = vector.load %arg4[%c0_82, %c0_83, %c0_84] : memref<2x1x128xf32, #tpu.memory_space<vmem>>, vector<1x1x128xf32>
    %119 = vector.shape_cast %118 : vector<1x1x128xf32> to vector<1x128xf32>
    %c0_85 = arith.constant 0 : index
    %c0_86 = arith.constant 0 : index
    %c0_87 = arith.constant 0 : index
    %120 = vector.load %arg5[%c0_85, %c0_86, %c0_87] : memref<2x1x128xf32, #tpu.memory_space<vmem>>, vector<1x1x128xf32>
    %121 = vector.shape_cast %120 : vector<1x1x128xf32> to vector<1x128xf32>
    %cst = arith.constant dense<0.000000e+00> : vector<16xf32>
    %122 = vector.multi_reduction <add>, %117, %cst [1] : vector<16x128xf32> to vector<16xf32>
    %123 = vector.shape_cast %122 : vector<16xf32> to vector<16x1xf32>
    %cst_88 = arith.constant 1.280000e+02 : f32
    %124 = vector.broadcast %cst_88 : f32 to vector<16x1xf32>
    %125 = arith.divf %123, %124 : vector<16x1xf32>
    %126 = vector.broadcast %125 : vector<16x1xf32> to vector<16x128xf32>
    %127 = arith.subf %117, %126 : vector<16x128xf32>
    %128 = arith.mulf %127, %127 : vector<16x128xf32>
    %cst_89 = arith.constant dense<0.000000e+00> : vector<16xf32>
    %129 = vector.multi_reduction <add>, %128, %cst_89 [1] : vector<16x128xf32> to vector<16xf32>
    %130 = vector.shape_cast %129 : vector<16xf32> to vector<16x1xf32>
    %cst_90 = arith.constant 1.280000e+02 : f32
    %131 = vector.broadcast %cst_90 : f32 to vector<16x1xf32>
    %132 = arith.divf %130, %131 : vector<16x1xf32>
    %cst_91 = arith.constant 9.99999974E-6 : f32
    %133 = vector.broadcast %cst_91 : f32 to vector<16x1xf32>
    %134 = arith.addf %132, %133 : vector<16x1xf32>
    %135 = math.rsqrt %134 : vector<16x1xf32>
    %136 = vector.broadcast %135 : vector<16x1xf32> to vector<16x128xf32>
    %137 = arith.mulf %127, %136 : vector<16x128xf32>
    %138 = vector.broadcast %119 : vector<1x128xf32> to vector<16x128xf32>
    %139 = arith.mulf %137, %138 : vector<16x128xf32>
    %140 = vector.broadcast %121 : vector<1x128xf32> to vector<16x128xf32>
    %141 = arith.addf %139, %140 : vector<16x128xf32>
    %142 = arith.truncf %141 : vector<16x128xf32> to vector<16x128xbf16>
    %c0_92 = arith.constant 0 : index
    %c0_93 = arith.constant 0 : index
    %c0_94 = arith.constant 0 : index
    %143 = vector.load %arg6[%c0_92, %c0_93, %c0_94] : memref<2x128x384xbf16, #tpu.memory_space<vmem>>, vector<1x128x384xbf16>
    %144 = vector.shape_cast %143 : vector<1x128x384xbf16> to vector<128x384xbf16>
    %cst_95 = arith.constant dense<0.000000e+00> : vector<16x384xf32>
    %145 = tpu.matmul %142, %144, %cst_95 {dimension_numbers = #tpu.dot_dimension_numbers<[1], [0], [0], [1], [0, 0, 1, 1], [], []>} : vector<16x128xbf16>, vector<128x384xbf16>, vector<16x384xf32> -> vector<16x384xf32>
    %c0_96 = arith.constant 0 : index
    %c0_97 = arith.constant 0 : index
    %c0_98 = arith.constant 0 : index
    %146 = vector.load %arg7[%c0_96, %c0_97, %c0_98] : memref<2x1x384xf32, #tpu.memory_space<vmem>>, vector<1x1x384xf32>
    %147 = vector.shape_cast %146 : vector<1x1x384xf32> to vector<1x384xf32>
    %148 = vector.broadcast %147 : vector<1x384xf32> to vector<16x384xf32>
    %149 = arith.addf %145, %148 : vector<16x384xf32>
    %150 = vector.extract_strided_slice %149 {offsets = [0, 0], sizes = [16, 128], strides = [1, 1]} : vector<16x384xf32> to vector<16x128xf32>
    %151 = vector.shape_cast %150 : vector<16x128xf32> to vector<1x16x4x32xf32>
    %152 = tpu.transpose %151, [0, 2, 1, 3] : vector<1x16x4x32xf32> -> vector<1x4x16x32xf32>
    %153 = vector.shape_cast %152 : vector<1x4x16x32xf32> to vector<4x16x32xf32>
    %154 = arith.truncf %153 : vector<4x16x32xf32> to vector<4x16x32xbf16>
    %155 = vector.extract_strided_slice %149 {offsets = [0, 128], sizes = [16, 128], strides = [1, 1]} : vector<16x384xf32> to vector<16x128xf32>
    %156 = vector.shape_cast %155 : vector<16x128xf32> to vector<1x16x4x32xf32>
    %157 = tpu.transpose %156, [0, 2, 1, 3] : vector<1x16x4x32xf32> -> vector<1x4x16x32xf32>
    %158 = vector.shape_cast %157 : vector<1x4x16x32xf32> to vector<4x16x32xf32>
    %159 = arith.truncf %158 : vector<4x16x32xf32> to vector<4x16x32xbf16>
    %160 = vector.extract_strided_slice %149 {offsets = [0, 256], sizes = [16, 128], strides = [1, 1]} : vector<16x384xf32> to vector<16x128xf32>
    %161 = vector.shape_cast %160 : vector<16x128xf32> to vector<1x16x4x32xf32>
    %162 = tpu.transpose %161, [0, 2, 1, 3] : vector<1x16x4x32xf32> -> vector<1x4x16x32xf32>
    %163 = vector.shape_cast %162 : vector<1x4x16x32xf32> to vector<4x16x32xf32>
    %164 = arith.truncf %163 : vector<4x16x32xf32> to vector<4x16x32xbf16>
    "tpu.trace_start"() <{level = 10 : i32, message = "gqd,gkd->gqk"}> : () -> ()
    %cst_99 = arith.constant dense<0.000000e+00> : vector<4x16x16xf32>
    %165 = tpu.matmul %154, %159, %cst_99 {dimension_numbers = #tpu.dot_dimension_numbers<[2], [2], [1], [1], [0, 0, 0, 1, 1, 1], [0], [0]>} : vector<4x16x32xbf16>, vector<4x16x32xbf16>, vector<4x16x16xf32> -> vector<4x16x16xf32>
    "tpu.trace_stop"() : () -> ()
    %cst_100 = arith.constant 0.176776692 : f32
    %166 = vector.broadcast %cst_100 : f32 to vector<4x16x16xf32>
    %167 = arith.mulf %165, %166 : vector<4x16x16xf32>
    %cst_101 = arith.constant dense<0xFF800000> : vector<4x16xf32>
    %168 = vector.multi_reduction <maximumf>, %167, %cst_101 [2] : vector<4x16x16xf32> to vector<4x16xf32>
    %169 = vector.shape_cast %168 : vector<4x16xf32> to vector<4x16x1xf32>
    %170 = vector.broadcast %169 : vector<4x16x1xf32> to vector<4x16x16xf32>
    %171 = arith.subf %167, %170 : vector<4x16x16xf32>
    %172 = math.exp %171 : vector<4x16x16xf32>
    %cst_102 = arith.constant dense<0.000000e+00> : vector<4x16xf32>
    %173 = vector.multi_reduction <add>, %172, %cst_102 [2] : vector<4x16x16xf32> to vector<4x16xf32>
    %174 = vector.shape_cast %173 : vector<4x16xf32> to vector<4x16x1xf32>
    %175 = tpu.reciprocal %174 {approx = true} : vector<4x16x1xf32> -> vector<4x16x1xf32>
    %176 = vector.broadcast %175 : vector<4x16x1xf32> to vector<4x16x16xf32>
    %177 = arith.mulf %172, %176 : vector<4x16x16xf32>
    %178 = arith.truncf %177 : vector<4x16x16xf32> to vector<4x16x16xbf16>
    "tpu.trace_start"() <{level = 10 : i32, message = "gqk,gkd->gqd"}> : () -> ()
    %cst_103 = arith.constant dense<0.000000e+00> : vector<4x16x32xf32>
    %179 = tpu.matmul %178, %164, %cst_103 {dimension_numbers = #tpu.dot_dimension_numbers<[2], [1], [1], [2], [0, 0, 0, 1, 1, 2], [0], [0]>} : vector<4x16x16xbf16>, vector<4x16x32xbf16>, vector<4x16x32xf32> -> vector<4x16x32xf32>
    "tpu.trace_stop"() : () -> ()
    %180 = vector.shape_cast %179 : vector<4x16x32xf32> to vector<1x4x16x32xf32>
    %181 = tpu.transpose %180, [0, 2, 1, 3] : vector<1x4x16x32xf32> -> vector<1x16x4x32xf32>
    %182 = vector.shape_cast %181 : vector<1x16x4x32xf32> to vector<16x128xf32>
    %183 = arith.truncf %182 : vector<16x128xf32> to vector<16x128xbf16>
    %c0_104 = arith.constant 0 : index
    %c0_105 = arith.constant 0 : index
    %c0_106 = arith.constant 0 : index
    %184 = vector.load %arg8[%c0_104, %c0_105, %c0_106] : memref<2x128x128xbf16, #tpu.memory_space<vmem>>, vector<1x128x128xbf16>
    %185 = vector.shape_cast %184 : vector<1x128x128xbf16> to vector<128x128xbf16>
    %cst_107 = arith.constant dense<0.000000e+00> : vector<16x128xf32>
    %186 = tpu.matmul %183, %185, %cst_107 {dimension_numbers = #tpu.dot_dimension_numbers<[1], [0], [0], [1], [0, 0, 1, 1], [], []>} : vector<16x128xbf16>, vector<128x128xbf16>, vector<16x128xf32> -> vector<16x128xf32>
    %c0_108 = arith.constant 0 : index
    %c0_109 = arith.constant 0 : index
    %c0_110 = arith.constant 0 : index
    %187 = vector.load %arg9[%c0_108, %c0_109, %c0_110] : memref<2x1x128xf32, #tpu.memory_space<vmem>>, vector<1x1x128xf32>
    %188 = vector.shape_cast %187 : vector<1x1x128xf32> to vector<1x128xf32>
    %189 = vector.broadcast %188 : vector<1x128xf32> to vector<16x128xf32>
    %190 = arith.addf %186, %189 : vector<16x128xf32>
    %c0_111 = arith.constant 0 : index
    %c0_112 = arith.constant 0 : index
    %c0_113 = arith.constant 0 : index
    %191 = vector.load %arg10[%c0_111, %c0_112, %c0_113] : memref<2x1x128xf32, #tpu.memory_space<vmem>>, vector<1x1x128xf32>
    %192 = vector.shape_cast %191 : vector<1x1x128xf32> to vector<1x128xf32>
    %193 = vector.broadcast %192 : vector<1x128xf32> to vector<16x128xf32>
    %194 = arith.mulf %193, %190 : vector<16x128xf32>
    %195 = arith.addf %117, %194 : vector<16x128xf32>
    %c0_114 = arith.constant 0 : index
    %c0_115 = arith.constant 0 : index
    %c0_116 = arith.constant 0 : index
    %196 = vector.load %arg11[%c0_114, %c0_115, %c0_116] : memref<2x1x128xf32, #tpu.memory_space<vmem>>, vector<1x1x128xf32>
    %197 = vector.shape_cast %196 : vector<1x1x128xf32> to vector<1x128xf32>
    %c0_117 = arith.constant 0 : index
    %c0_118 = arith.constant 0 : index
    %c0_119 = arith.constant 0 : index
    %198 = vector.load %arg12[%c0_117, %c0_118, %c0_119] : memref<2x1x128xf32, #tpu.memory_space<vmem>>, vector<1x1x128xf32>
    %199 = vector.shape_cast %198 : vector<1x1x128xf32> to vector<1x128xf32>
    %cst_120 = arith.constant dense<0.000000e+00> : vector<16xf32>
    %200 = vector.multi_reduction <add>, %195, %cst_120 [1] : vector<16x128xf32> to vector<16xf32>
    %201 = vector.shape_cast %200 : vector<16xf32> to vector<16x1xf32>
    %cst_121 = arith.constant 1.280000e+02 : f32
    %202 = vector.broadcast %cst_121 : f32 to vector<16x1xf32>
    %203 = arith.divf %201, %202 : vector<16x1xf32>
    %204 = vector.broadcast %203 : vector<16x1xf32> to vector<16x128xf32>
    %205 = arith.subf %195, %204 : vector<16x128xf32>
    %206 = arith.mulf %205, %205 : vector<16x128xf32>
    %cst_122 = arith.constant dense<0.000000e+00> : vector<16xf32>
    %207 = vector.multi_reduction <add>, %206, %cst_122 [1] : vector<16x128xf32> to vector<16xf32>
    %208 = vector.shape_cast %207 : vector<16xf32> to vector<16x1xf32>
    %cst_123 = arith.constant 1.280000e+02 : f32
    %209 = vector.broadcast %cst_123 : f32 to vector<16x1xf32>
    %210 = arith.divf %208, %209 : vector<16x1xf32>
    %cst_124 = arith.constant 9.99999974E-6 : f32
    %211 = vector.broadcast %cst_124 : f32 to vector<16x1xf32>
    %212 = arith.addf %210, %211 : vector<16x1xf32>
    %213 = math.rsqrt %212 : vector<16x1xf32>
    %214 = vector.broadcast %213 : vector<16x1xf32> to vector<16x128xf32>
    %215 = arith.mulf %205, %214 : vector<16x128xf32>
    %216 = vector.broadcast %197 : vector<1x128xf32> to vector<16x128xf32>
    %217 = arith.mulf %215, %216 : vector<16x128xf32>
    %218 = vector.broadcast %199 : vector<1x128xf32> to vector<16x128xf32>
    %219 = arith.addf %217, %218 : vector<16x128xf32>
    %220 = arith.truncf %219 : vector<16x128xf32> to vector<16x128xbf16>
    %c0_125 = arith.constant 0 : index
    %c0_126 = arith.constant 0 : index
    %c0_127 = arith.constant 0 : index
    %221 = vector.load %arg13[%c0_125, %c0_126, %c0_127] : memref<2x128x512xbf16, #tpu.memory_space<vmem>>, vector<1x128x512xbf16>
    %222 = vector.shape_cast %221 : vector<1x128x512xbf16> to vector<128x512xbf16>
    %cst_128 = arith.constant dense<0.000000e+00> : vector<16x512xf32>
    %223 = tpu.matmul %220, %222, %cst_128 {dimension_numbers = #tpu.dot_dimension_numbers<[1], [0], [0], [1], [0, 0, 1, 1], [], []>} : vector<16x128xbf16>, vector<128x512xbf16>, vector<16x512xf32> -> vector<16x512xf32>
    %c0_129 = arith.constant 0 : index
    %c0_130 = arith.constant 0 : index
    %c0_131 = arith.constant 0 : index
    %224 = vector.load %arg14[%c0_129, %c0_130, %c0_131] : memref<2x1x512xf32, #tpu.memory_space<vmem>>, vector<1x1x512xf32>
    %225 = vector.shape_cast %224 : vector<1x1x512xf32> to vector<1x512xf32>
    %226 = vector.broadcast %225 : vector<1x512xf32> to vector<16x512xf32>
    %227 = arith.addf %223, %226 : vector<16x512xf32>
    %cst_132 = arith.constant 5.000000e-01 : f32
    %228 = vector.broadcast %cst_132 : f32 to vector<16x512xf32>
    %229 = arith.mulf %228, %227 : vector<16x512xf32>
    %cst_133 = arith.constant 4.471500e-02 : f32
    %230 = vector.broadcast %cst_133 : f32 to vector<16x512xf32>
    %231 = arith.mulf %230, %227 : vector<16x512xf32>
    %232 = arith.mulf %231, %227 : vector<16x512xf32>
    %233 = arith.mulf %232, %227 : vector<16x512xf32>
    %234 = arith.addf %227, %233 : vector<16x512xf32>
    %cst_134 = arith.constant 0.797884583 : f32
    %235 = vector.broadcast %cst_134 : f32 to vector<16x512xf32>
    %236 = arith.mulf %235, %234 : vector<16x512xf32>
    %237 = math.tanh %236 : vector<16x512xf32>
    %cst_135 = arith.constant 1.000000e+00 : f32
    %238 = vector.broadcast %cst_135 : f32 to vector<16x512xf32>
    %239 = arith.addf %238, %237 : vector<16x512xf32>
    %240 = arith.mulf %229, %239 : vector<16x512xf32>
    %241 = arith.truncf %240 : vector<16x512xf32> to vector<16x512xbf16>
    %c0_136 = arith.constant 0 : index
    %c0_137 = arith.constant 0 : index
    %c0_138 = arith.constant 0 : index
    %242 = vector.load %arg15[%c0_136, %c0_137, %c0_138] : memref<2x512x128xbf16, #tpu.memory_space<vmem>>, vector<1x512x128xbf16>
    %243 = vector.shape_cast %242 : vector<1x512x128xbf16> to vector<512x128xbf16>
    %cst_139 = arith.constant dense<0.000000e+00> : vector<16x128xf32>
    %244 = tpu.matmul %241, %243, %cst_139 {dimension_numbers = #tpu.dot_dimension_numbers<[1], [0], [0], [1], [0, 0, 1, 1], [], []>} : vector<16x512xbf16>, vector<512x128xbf16>, vector<16x128xf32> -> vector<16x128xf32>
    %c0_140 = arith.constant 0 : index
    %c0_141 = arith.constant 0 : index
    %c0_142 = arith.constant 0 : index
    %245 = vector.load %arg16[%c0_140, %c0_141, %c0_142] : memref<2x1x128xf32, #tpu.memory_space<vmem>>, vector<1x1x128xf32>
    %246 = vector.shape_cast %245 : vector<1x1x128xf32> to vector<1x128xf32>
    %247 = vector.broadcast %246 : vector<1x128xf32> to vector<16x128xf32>
    %248 = arith.addf %244, %247 : vector<16x128xf32>
    %c0_143 = arith.constant 0 : index
    %c0_144 = arith.constant 0 : index
    %c0_145 = arith.constant 0 : index
    %249 = vector.load %arg17[%c0_143, %c0_144, %c0_145] : memref<2x1x128xf32, #tpu.memory_space<vmem>>, vector<1x1x128xf32>
    %250 = vector.shape_cast %249 : vector<1x1x128xf32> to vector<1x128xf32>
    %251 = vector.broadcast %250 : vector<1x128xf32> to vector<16x128xf32>
    %252 = arith.mulf %251, %248 : vector<16x128xf32>
    %253 = arith.addf %195, %252 : vector<16x128xf32>
    %c1_146 = arith.constant 1 : index
    %c0_147 = arith.constant 0 : index
    %c0_148 = arith.constant 0 : index
    %254 = vector.load %arg4[%c1_146, %c0_147, %c0_148] : memref<2x1x128xf32, #tpu.memory_space<vmem>>, vector<1x1x128xf32>
    %255 = vector.shape_cast %254 : vector<1x1x128xf32> to vector<1x128xf32>
    %c1_149 = arith.constant 1 : index
    %c0_150 = arith.constant 0 : index
    %c0_151 = arith.constant 0 : index
    %256 = vector.load %arg5[%c1_149, %c0_150, %c0_151] : memref<2x1x128xf32, #tpu.memory_space<vmem>>, vector<1x1x128xf32>
    %257 = vector.shape_cast %256 : vector<1x1x128xf32> to vector<1x128xf32>
    %cst_152 = arith.constant dense<0.000000e+00> : vector<16xf32>
    %258 = vector.multi_reduction <add>, %253, %cst_152 [1] : vector<16x128xf32> to vector<16xf32>
    %259 = vector.shape_cast %258 : vector<16xf32> to vector<16x1xf32>
    %cst_153 = arith.constant 1.280000e+02 : f32
    %260 = vector.broadcast %cst_153 : f32 to vector<16x1xf32>
    %261 = arith.divf %259, %260 : vector<16x1xf32>
    %262 = vector.broadcast %261 : vector<16x1xf32> to vector<16x128xf32>
    %263 = arith.subf %253, %262 : vector<16x128xf32>
    %264 = arith.mulf %263, %263 : vector<16x128xf32>
    %cst_154 = arith.constant dense<0.000000e+00> : vector<16xf32>
    %265 = vector.multi_reduction <add>, %264, %cst_154 [1] : vector<16x128xf32> to vector<16xf32>
    %266 = vector.shape_cast %265 : vector<16xf32> to vector<16x1xf32>
    %cst_155 = arith.constant 1.280000e+02 : f32
    %267 = vector.broadcast %cst_155 : f32 to vector<16x1xf32>
    %268 = arith.divf %266, %267 : vector<16x1xf32>
    %cst_156 = arith.constant 9.99999974E-6 : f32
    %269 = vector.broadcast %cst_156 : f32 to vector<16x1xf32>
    %270 = arith.addf %268, %269 : vector<16x1xf32>
    %271 = math.rsqrt %270 : vector<16x1xf32>
    %272 = vector.broadcast %271 : vector<16x1xf32> to vector<16x128xf32>
    %273 = arith.mulf %263, %272 : vector<16x128xf32>
    %274 = vector.broadcast %255 : vector<1x128xf32> to vector<16x128xf32>
    %275 = arith.mulf %273, %274 : vector<16x128xf32>
    %276 = vector.broadcast %257 : vector<1x128xf32> to vector<16x128xf32>
    %277 = arith.addf %275, %276 : vector<16x128xf32>
    %278 = arith.truncf %277 : vector<16x128xf32> to vector<16x128xbf16>
    %c1_157 = arith.constant 1 : index
    %c0_158 = arith.constant 0 : index
    %c0_159 = arith.constant 0 : index
    %279 = vector.load %arg6[%c1_157, %c0_158, %c0_159] : memref<2x128x384xbf16, #tpu.memory_space<vmem>>, vector<1x128x384xbf16>
    %280 = vector.shape_cast %279 : vector<1x128x384xbf16> to vector<128x384xbf16>
    %cst_160 = arith.constant dense<0.000000e+00> : vector<16x384xf32>
    %281 = tpu.matmul %278, %280, %cst_160 {dimension_numbers = #tpu.dot_dimension_numbers<[1], [0], [0], [1], [0, 0, 1, 1], [], []>} : vector<16x128xbf16>, vector<128x384xbf16>, vector<16x384xf32> -> vector<16x384xf32>
    %c1_161 = arith.constant 1 : index
    %c0_162 = arith.constant 0 : index
    %c0_163 = arith.constant 0 : index
    %282 = vector.load %arg7[%c1_161, %c0_162, %c0_163] : memref<2x1x384xf32, #tpu.memory_space<vmem>>, vector<1x1x384xf32>
    %283 = vector.shape_cast %282 : vector<1x1x384xf32> to vector<1x384xf32>
    %284 = vector.broadcast %283 : vector<1x384xf32> to vector<16x384xf32>
    %285 = arith.addf %281, %284 : vector<16x384xf32>
    %286 = vector.extract_strided_slice %285 {offsets = [0, 0], sizes = [16, 128], strides = [1, 1]} : vector<16x384xf32> to vector<16x128xf32>
    %287 = vector.shape_cast %286 : vector<16x128xf32> to vector<1x16x4x32xf32>
    %288 = tpu.transpose %287, [0, 2, 1, 3] : vector<1x16x4x32xf32> -> vector<1x4x16x32xf32>
    %289 = vector.shape_cast %288 : vector<1x4x16x32xf32> to vector<4x16x32xf32>
    %290 = arith.truncf %289 : vector<4x16x32xf32> to vector<4x16x32xbf16>
    %291 = vector.extract_strided_slice %285 {offsets = [0, 128], sizes = [16, 128], strides = [1, 1]} : vector<16x384xf32> to vector<16x128xf32>
    %292 = vector.shape_cast %291 : vector<16x128xf32> to vector<1x16x4x32xf32>
    %293 = tpu.transpose %292, [0, 2, 1, 3] : vector<1x16x4x32xf32> -> vector<1x4x16x32xf32>
    %294 = vector.shape_cast %293 : vector<1x4x16x32xf32> to vector<4x16x32xf32>
    %295 = arith.truncf %294 : vector<4x16x32xf32> to vector<4x16x32xbf16>
    %296 = vector.extract_strided_slice %285 {offsets = [0, 256], sizes = [16, 128], strides = [1, 1]} : vector<16x384xf32> to vector<16x128xf32>
    %297 = vector.shape_cast %296 : vector<16x128xf32> to vector<1x16x4x32xf32>
    %298 = tpu.transpose %297, [0, 2, 1, 3] : vector<1x16x4x32xf32> -> vector<1x4x16x32xf32>
    %299 = vector.shape_cast %298 : vector<1x4x16x32xf32> to vector<4x16x32xf32>
    %300 = arith.truncf %299 : vector<4x16x32xf32> to vector<4x16x32xbf16>
    "tpu.trace_start"() <{level = 10 : i32, message = "gqd,gkd->gqk"}> : () -> ()
    %cst_164 = arith.constant dense<0.000000e+00> : vector<4x16x16xf32>
    %301 = tpu.matmul %290, %295, %cst_164 {dimension_numbers = #tpu.dot_dimension_numbers<[2], [2], [1], [1], [0, 0, 0, 1, 1, 1], [0], [0]>} : vector<4x16x32xbf16>, vector<4x16x32xbf16>, vector<4x16x16xf32> -> vector<4x16x16xf32>
    "tpu.trace_stop"() : () -> ()
    %cst_165 = arith.constant 0.176776692 : f32
    %302 = vector.broadcast %cst_165 : f32 to vector<4x16x16xf32>
    %303 = arith.mulf %301, %302 : vector<4x16x16xf32>
    %cst_166 = arith.constant dense<0xFF800000> : vector<4x16xf32>
    %304 = vector.multi_reduction <maximumf>, %303, %cst_166 [2] : vector<4x16x16xf32> to vector<4x16xf32>
    %305 = vector.shape_cast %304 : vector<4x16xf32> to vector<4x16x1xf32>
    %306 = vector.broadcast %305 : vector<4x16x1xf32> to vector<4x16x16xf32>
    %307 = arith.subf %303, %306 : vector<4x16x16xf32>
    %308 = math.exp %307 : vector<4x16x16xf32>
    %cst_167 = arith.constant dense<0.000000e+00> : vector<4x16xf32>
    %309 = vector.multi_reduction <add>, %308, %cst_167 [2] : vector<4x16x16xf32> to vector<4x16xf32>
    %310 = vector.shape_cast %309 : vector<4x16xf32> to vector<4x16x1xf32>
    %311 = tpu.reciprocal %310 {approx = true} : vector<4x16x1xf32> -> vector<4x16x1xf32>
    %312 = vector.broadcast %311 : vector<4x16x1xf32> to vector<4x16x16xf32>
    %313 = arith.mulf %308, %312 : vector<4x16x16xf32>
    %314 = arith.truncf %313 : vector<4x16x16xf32> to vector<4x16x16xbf16>
    "tpu.trace_start"() <{level = 10 : i32, message = "gqk,gkd->gqd"}> : () -> ()
    %cst_168 = arith.constant dense<0.000000e+00> : vector<4x16x32xf32>
    %315 = tpu.matmul %314, %300, %cst_168 {dimension_numbers = #tpu.dot_dimension_numbers<[2], [1], [1], [2], [0, 0, 0, 1, 1, 2], [0], [0]>} : vector<4x16x16xbf16>, vector<4x16x32xbf16>, vector<4x16x32xf32> -> vector<4x16x32xf32>
    "tpu.trace_stop"() : () -> ()
    %316 = vector.shape_cast %315 : vector<4x16x32xf32> to vector<1x4x16x32xf32>
    %317 = tpu.transpose %316, [0, 2, 1, 3] : vector<1x4x16x32xf32> -> vector<1x16x4x32xf32>
    %318 = vector.shape_cast %317 : vector<1x16x4x32xf32> to vector<16x128xf32>
    %319 = arith.truncf %318 : vector<16x128xf32> to vector<16x128xbf16>
    %c1_169 = arith.constant 1 : index
    %c0_170 = arith.constant 0 : index
    %c0_171 = arith.constant 0 : index
    %320 = vector.load %arg8[%c1_169, %c0_170, %c0_171] : memref<2x128x128xbf16, #tpu.memory_space<vmem>>, vector<1x128x128xbf16>
    %321 = vector.shape_cast %320 : vector<1x128x128xbf16> to vector<128x128xbf16>
    %cst_172 = arith.constant dense<0.000000e+00> : vector<16x128xf32>
    %322 = tpu.matmul %319, %321, %cst_172 {dimension_numbers = #tpu.dot_dimension_numbers<[1], [0], [0], [1], [0, 0, 1, 1], [], []>} : vector<16x128xbf16>, vector<128x128xbf16>, vector<16x128xf32> -> vector<16x128xf32>
    %c1_173 = arith.constant 1 : index
    %c0_174 = arith.constant 0 : index
    %c0_175 = arith.constant 0 : index
    %323 = vector.load %arg9[%c1_173, %c0_174, %c0_175] : memref<2x1x128xf32, #tpu.memory_space<vmem>>, vector<1x1x128xf32>
    %324 = vector.shape_cast %323 : vector<1x1x128xf32> to vector<1x128xf32>
    %325 = vector.broadcast %324 : vector<1x128xf32> to vector<16x128xf32>
    %326 = arith.addf %322, %325 : vector<16x128xf32>
    %c1_176 = arith.constant 1 : index
    %c0_177 = arith.constant 0 : index
    %c0_178 = arith.constant 0 : index
    %327 = vector.load %arg10[%c1_176, %c0_177, %c0_178] : memref<2x1x128xf32, #tpu.memory_space<vmem>>, vector<1x1x128xf32>
    %328 = vector.shape_cast %327 : vector<1x1x128xf32> to vector<1x128xf32>
    %329 = vector.broadcast %328 : vector<1x128xf32> to vector<16x128xf32>
    %330 = arith.mulf %329, %326 : vector<16x128xf32>
    %331 = arith.addf %253, %330 : vector<16x128xf32>
    %c1_179 = arith.constant 1 : index
    %c0_180 = arith.constant 0 : index
    %c0_181 = arith.constant 0 : index
    %332 = vector.load %arg11[%c1_179, %c0_180, %c0_181] : memref<2x1x128xf32, #tpu.memory_space<vmem>>, vector<1x1x128xf32>
    %333 = vector.shape_cast %332 : vector<1x1x128xf32> to vector<1x128xf32>
    %c1_182 = arith.constant 1 : index
    %c0_183 = arith.constant 0 : index
    %c0_184 = arith.constant 0 : index
    %334 = vector.load %arg12[%c1_182, %c0_183, %c0_184] : memref<2x1x128xf32, #tpu.memory_space<vmem>>, vector<1x1x128xf32>
    %335 = vector.shape_cast %334 : vector<1x1x128xf32> to vector<1x128xf32>
    %cst_185 = arith.constant dense<0.000000e+00> : vector<16xf32>
    %336 = vector.multi_reduction <add>, %331, %cst_185 [1] : vector<16x128xf32> to vector<16xf32>
    %337 = vector.shape_cast %336 : vector<16xf32> to vector<16x1xf32>
    %cst_186 = arith.constant 1.280000e+02 : f32
    %338 = vector.broadcast %cst_186 : f32 to vector<16x1xf32>
    %339 = arith.divf %337, %338 : vector<16x1xf32>
    %340 = vector.broadcast %339 : vector<16x1xf32> to vector<16x128xf32>
    %341 = arith.subf %331, %340 : vector<16x128xf32>
    %342 = arith.mulf %341, %341 : vector<16x128xf32>
    %cst_187 = arith.constant dense<0.000000e+00> : vector<16xf32>
    %343 = vector.multi_reduction <add>, %342, %cst_187 [1] : vector<16x128xf32> to vector<16xf32>
    %344 = vector.shape_cast %343 : vector<16xf32> to vector<16x1xf32>
    %cst_188 = arith.constant 1.280000e+02 : f32
    %345 = vector.broadcast %cst_188 : f32 to vector<16x1xf32>
    %346 = arith.divf %344, %345 : vector<16x1xf32>
    %cst_189 = arith.constant 9.99999974E-6 : f32
    %347 = vector.broadcast %cst_189 : f32 to vector<16x1xf32>
    %348 = arith.addf %346, %347 : vector<16x1xf32>
    %349 = math.rsqrt %348 : vector<16x1xf32>
    %350 = vector.broadcast %349 : vector<16x1xf32> to vector<16x128xf32>
    %351 = arith.mulf %341, %350 : vector<16x128xf32>
    %352 = vector.broadcast %333 : vector<1x128xf32> to vector<16x128xf32>
    %353 = arith.mulf %351, %352 : vector<16x128xf32>
    %354 = vector.broadcast %335 : vector<1x128xf32> to vector<16x128xf32>
    %355 = arith.addf %353, %354 : vector<16x128xf32>
    %356 = arith.truncf %355 : vector<16x128xf32> to vector<16x128xbf16>
    %c1_190 = arith.constant 1 : index
    %c0_191 = arith.constant 0 : index
    %c0_192 = arith.constant 0 : index
    %357 = vector.load %arg13[%c1_190, %c0_191, %c0_192] : memref<2x128x512xbf16, #tpu.memory_space<vmem>>, vector<1x128x512xbf16>
    %358 = vector.shape_cast %357 : vector<1x128x512xbf16> to vector<128x512xbf16>
    %cst_193 = arith.constant dense<0.000000e+00> : vector<16x512xf32>
    %359 = tpu.matmul %356, %358, %cst_193 {dimension_numbers = #tpu.dot_dimension_numbers<[1], [0], [0], [1], [0, 0, 1, 1], [], []>} : vector<16x128xbf16>, vector<128x512xbf16>, vector<16x512xf32> -> vector<16x512xf32>
    %c1_194 = arith.constant 1 : index
    %c0_195 = arith.constant 0 : index
    %c0_196 = arith.constant 0 : index
    %360 = vector.load %arg14[%c1_194, %c0_195, %c0_196] : memref<2x1x512xf32, #tpu.memory_space<vmem>>, vector<1x1x512xf32>
    %361 = vector.shape_cast %360 : vector<1x1x512xf32> to vector<1x512xf32>
    %362 = vector.broadcast %361 : vector<1x512xf32> to vector<16x512xf32>
    %363 = arith.addf %359, %362 : vector<16x512xf32>
    %cst_197 = arith.constant 5.000000e-01 : f32
    %364 = vector.broadcast %cst_197 : f32 to vector<16x512xf32>
    %365 = arith.mulf %364, %363 : vector<16x512xf32>
    %cst_198 = arith.constant 4.471500e-02 : f32
    %366 = vector.broadcast %cst_198 : f32 to vector<16x512xf32>
    %367 = arith.mulf %366, %363 : vector<16x512xf32>
    %368 = arith.mulf %367, %363 : vector<16x512xf32>
    %369 = arith.mulf %368, %363 : vector<16x512xf32>
    %370 = arith.addf %363, %369 : vector<16x512xf32>
    %cst_199 = arith.constant 0.797884583 : f32
    %371 = vector.broadcast %cst_199 : f32 to vector<16x512xf32>
    %372 = arith.mulf %371, %370 : vector<16x512xf32>
    %373 = math.tanh %372 : vector<16x512xf32>
    %cst_200 = arith.constant 1.000000e+00 : f32
    %374 = vector.broadcast %cst_200 : f32 to vector<16x512xf32>
    %375 = arith.addf %374, %373 : vector<16x512xf32>
    %376 = arith.mulf %365, %375 : vector<16x512xf32>
    %377 = arith.truncf %376 : vector<16x512xf32> to vector<16x512xbf16>
    %c1_201 = arith.constant 1 : index
    %c0_202 = arith.constant 0 : index
    %c0_203 = arith.constant 0 : index
    %378 = vector.load %arg15[%c1_201, %c0_202, %c0_203] : memref<2x512x128xbf16, #tpu.memory_space<vmem>>, vector<1x512x128xbf16>
    %379 = vector.shape_cast %378 : vector<1x512x128xbf16> to vector<512x128xbf16>
    %cst_204 = arith.constant dense<0.000000e+00> : vector<16x128xf32>
    %380 = tpu.matmul %377, %379, %cst_204 {dimension_numbers = #tpu.dot_dimension_numbers<[1], [0], [0], [1], [0, 0, 1, 1], [], []>} : vector<16x512xbf16>, vector<512x128xbf16>, vector<16x128xf32> -> vector<16x128xf32>
    %c1_205 = arith.constant 1 : index
    %c0_206 = arith.constant 0 : index
    %c0_207 = arith.constant 0 : index
    %381 = vector.load %arg16[%c1_205, %c0_206, %c0_207] : memref<2x1x128xf32, #tpu.memory_space<vmem>>, vector<1x1x128xf32>
    %382 = vector.shape_cast %381 : vector<1x1x128xf32> to vector<1x128xf32>
    %383 = vector.broadcast %382 : vector<1x128xf32> to vector<16x128xf32>
    %384 = arith.addf %380, %383 : vector<16x128xf32>
    %c1_208 = arith.constant 1 : index
    %c0_209 = arith.constant 0 : index
    %c0_210 = arith.constant 0 : index
    %385 = vector.load %arg17[%c1_208, %c0_209, %c0_210] : memref<2x1x128xf32, #tpu.memory_space<vmem>>, vector<1x1x128xf32>
    %386 = vector.shape_cast %385 : vector<1x1x128xf32> to vector<1x128xf32>
    %387 = vector.broadcast %386 : vector<1x128xf32> to vector<16x128xf32>
    %388 = arith.mulf %387, %384 : vector<16x128xf32>
    %389 = arith.addf %331, %388 : vector<16x128xf32>
    %c0_211 = arith.constant 0 : index
    %c0_212 = arith.constant 0 : index
    %390 = vector.load %arg18[%c0_211, %c0_212] : memref<1x128xf32, #tpu.memory_space<vmem>>, vector<1x128xf32>
    %c0_213 = arith.constant 0 : index
    %c0_214 = arith.constant 0 : index
    %391 = vector.load %arg19[%c0_213, %c0_214] : memref<1x128xf32, #tpu.memory_space<vmem>>, vector<1x128xf32>
    %cst_215 = arith.constant dense<0.000000e+00> : vector<16xf32>
    %392 = vector.multi_reduction <add>, %389, %cst_215 [1] : vector<16x128xf32> to vector<16xf32>
    %393 = vector.shape_cast %392 : vector<16xf32> to vector<16x1xf32>
    %cst_216 = arith.constant 1.280000e+02 : f32
    %394 = vector.broadcast %cst_216 : f32 to vector<16x1xf32>
    %395 = arith.divf %393, %394 : vector<16x1xf32>
    %396 = vector.broadcast %395 : vector<16x1xf32> to vector<16x128xf32>
    %397 = arith.subf %389, %396 : vector<16x128xf32>
    %398 = arith.mulf %397, %397 : vector<16x128xf32>
    %cst_217 = arith.constant dense<0.000000e+00> : vector<16xf32>
    %399 = vector.multi_reduction <add>, %398, %cst_217 [1] : vector<16x128xf32> to vector<16xf32>
    %400 = vector.shape_cast %399 : vector<16xf32> to vector<16x1xf32>
    %cst_218 = arith.constant 1.280000e+02 : f32
    %401 = vector.broadcast %cst_218 : f32 to vector<16x1xf32>
    %402 = arith.divf %400, %401 : vector<16x1xf32>
    %cst_219 = arith.constant 9.99999974E-6 : f32
    %403 = vector.broadcast %cst_219 : f32 to vector<16x1xf32>
    %404 = arith.addf %402, %403 : vector<16x1xf32>
    %405 = math.rsqrt %404 : vector<16x1xf32>
    %406 = vector.broadcast %405 : vector<16x1xf32> to vector<16x128xf32>
    %407 = arith.mulf %397, %406 : vector<16x128xf32>
    %408 = vector.broadcast %390 : vector<1x128xf32> to vector<16x128xf32>
    %409 = arith.mulf %407, %408 : vector<16x128xf32>
    %410 = vector.broadcast %391 : vector<1x128xf32> to vector<16x128xf32>
    %411 = arith.addf %409, %410 : vector<16x128xf32>
    %412 = arith.truncf %411 : vector<16x128xf32> to vector<16x128xbf16>
    %c0_220 = arith.constant 0 : index
    %c0_221 = arith.constant 0 : index
    %413 = vector.load %arg20[%c0_220, %c0_221] : memref<128x128xbf16, #tpu.memory_space<vmem>>, vector<128x128xbf16>
    %cst_222 = arith.constant dense<0.000000e+00> : vector<16x128xf32>
    %414 = tpu.matmul %412, %413, %cst_222 {dimension_numbers = #tpu.dot_dimension_numbers<[1], [0], [0], [1], [0, 0, 1, 1], [], []>} : vector<16x128xbf16>, vector<128x128xbf16>, vector<16x128xf32> -> vector<16x128xf32>
    %415 = vector.shape_cast %414 : vector<16x128xf32> to vector<1x16x128xf32>
    %c0_223 = arith.constant 0 : index
    %c0_224 = arith.constant 0 : index
    %c0_225 = arith.constant 0 : index
    %416 = vector.load %arg21[%c0_223, %c0_224, %c0_225] : memref<1x16x128xf32, #tpu.memory_space<vmem>>, vector<1x16x128xf32>
    tpu.vector_store %arg21[%c0_223, %c0_224, %c0_225], %415 {strides = array<i32>} : memref<1x16x128xf32, #tpu.memory_space<vmem>>, vector<1x16x128xf32>,
    return
  }
  func.func @transform_0(%arg0: i32, %arg1: memref<2x16xi32, #tpu.memory_space<smem>>) -> (i32, i32) {
    %c0_i32 = arith.constant 0 : i32
    %c0_i32_0 = arith.constant 0 : i32
    %c0_i32_1 = arith.constant 0 : i32
    return %c0_i32, %c0_i32_0 : i32, i32
  }
  func.func @transform_1(%arg0: i32, %arg1: memref<2x16xi32, #tpu.memory_space<smem>>) -> (i32, i32) {
    %c0_i32 = arith.constant 0 : i32
    %c0_i32_0 = arith.constant 0 : i32
    %c0_i32_1 = arith.constant 0 : i32
    return %c0_i32, %c0_i32_0 : i32, i32
  }
  func.func @transform_2(%arg0: i32, %arg1: memref<2x16xi32, #tpu.memory_space<smem>>) -> (i32, i32, i32) {
    %c0_i32 = arith.constant 0 : i32
    %c0_i32_0 = arith.constant 0 : i32
    %c0_i32_1 = arith.constant 0 : i32
    %c0_i32_2 = arith.constant 0 : i32
    return %c0_i32, %c0_i32_0, %c0_i32_1 : i32, i32, i32
  }
  func.func @transform_3(%arg0: i32, %arg1: memref<2x16xi32, #tpu.memory_space<smem>>) -> (i32, i32, i32) {
    %c0_i32 = arith.constant 0 : i32
    %c0_i32_0 = arith.constant 0 : i32
    %c0_i32_1 = arith.constant 0 : i32
    %c0_i32_2 = arith.constant 0 : i32
    return %c0_i32, %c0_i32_0, %c0_i32_1 : i32, i32, i32
  }
  func.func @transform_4(%arg0: i32, %arg1: memref<2x16xi32, #tpu.memory_space<smem>>) -> (i32, i32, i32) {
    %c0_i32 = arith.constant 0 : i32
    %c0_i32_0 = arith.constant 0 : i32
    %c0_i32_1 = arith.constant 0 : i32
    %c0_i32_2 = arith.constant 0 : i32
    return %c0_i32, %c0_i32_0, %c0_i32_1 : i32, i32, i32
  }
  func.func @transform_5(%arg0: i32, %arg1: memref<2x16xi32, #tpu.memory_space<smem>>) -> (i32, i32, i32) {
    %c0_i32 = arith.constant 0 : i32
    %c0_i32_0 = arith.constant 0 : i32
    %c0_i32_1 = arith.constant 0 : i32
    %c0_i32_2 = arith.constant 0 : i32
    return %c0_i32, %c0_i32_0, %c0_i32_1 : i32, i32, i32
  }
  func.func @transform_6(%arg0: i32, %arg1: memref<2x16xi32, #tpu.memory_space<smem>>) -> (i32, i32, i32) {
    %c0_i32 = arith.constant 0 : i32
    %c0_i32_0 = arith.constant 0 : i32
    %c0_i32_1 = arith.constant 0 : i32
    %c0_i32_2 = arith.constant 0 : i32
    return %c0_i32, %c0_i32_0, %c0_i32_1 : i32, i32, i32
  }
  func.func @transform_7(%arg0: i32, %arg1: memref<2x16xi32, #tpu.memory_space<smem>>) -> (i32, i32, i32) {
    %c0_i32 = arith.constant 0 : i32
    %c0_i32_0 = arith.constant 0 : i32
    %c0_i32_1 = arith.constant 0 : i32
    %c0_i32_2 = arith.constant 0 : i32
    return %c0_i32, %c0_i32_0, %c0_i32_1 : i32, i32, i32
  }
  func.func @transform_8(%arg0: i32, %arg1: memref<2x16xi32, #tpu.memory_space<smem>>) -> (i32, i32, i32) {
    %c0_i32 = arith.constant 0 : i32
    %c0_i32_0 = arith.constant 0 : i32
    %c0_i32_1 = arith.constant 0 : i32
    %c0_i32_2 = arith.constant 0 : i32
    return %c0_i32, %c0_i32_0, %c0_i32_1 : i32, i32, i32
  }
  func.func @transform_9(%arg0: i32, %arg1: memref<2x16xi32, #tpu.memory_space<smem>>) -> (i32, i32, i32) {
    %c0_i32 = arith.constant 0 : i32
    %c0_i32_0 = arith.constant 0 : i32
    %c0_i32_1 = arith.constant 0 : i32
    %c0_i32_2 = arith.constant 0 : i32
    return %c0_i32, %c0_i32_0, %c0_i32_1 : i32, i32, i32
  }
  func.func @transform_10(%arg0: i32, %arg1: memref<2x16xi32, #tpu.memory_space<smem>>) -> (i32, i32, i32) {
    %c0_i32 = arith.constant 0 : i32
    %c0_i32_0 = arith.constant 0 : i32
    %c0_i32_1 = arith.constant 0 : i32
    %c0_i32_2 = arith.constant 0 : i32
    return %c0_i32, %c0_i32_0, %c0_i32_1 : i32, i32, i32
  }
  func.func @transform_11(%arg0: i32, %arg1: memref<2x16xi32, #tpu.memory_space<smem>>) -> (i32, i32, i32) {
    %c0_i32 = arith.constant 0 : i32
    %c0_i32_0 = arith.constant 0 : i32
    %c0_i32_1 = arith.constant 0 : i32
    %c0_i32_2 = arith.constant 0 : i32
    return %c0_i32, %c0_i32_0, %c0_i32_1 : i32, i32, i32
  }
  func.func @transform_12(%arg0: i32, %arg1: memref<2x16xi32, #tpu.memory_space<smem>>) -> (i32, i32, i32) {
    %c0_i32 = arith.constant 0 : i32
    %c0_i32_0 = arith.constant 0 : i32
    %c0_i32_1 = arith.constant 0 : i32
    %c0_i32_2 = arith.constant 0 : i32
    return %c0_i32, %c0_i32_0, %c0_i32_1 : i32, i32, i32
  }
  func.func @transform_13(%arg0: i32, %arg1: memref<2x16xi32, #tpu.memory_space<smem>>) -> (i32, i32, i32) {
    %c0_i32 = arith.constant 0 : i32
    %c0_i32_0 = arith.constant 0 : i32
    %c0_i32_1 = arith.constant 0 : i32
    %c0_i32_2 = arith.constant 0 : i32
    return %c0_i32, %c0_i32_0, %c0_i32_1 : i32, i32, i32
  }
  func.func @transform_14(%arg0: i32, %arg1: memref<2x16xi32, #tpu.memory_space<smem>>) -> (i32, i32, i32) {
    %c0_i32 = arith.constant 0 : i32
    %c0_i32_0 = arith.constant 0 : i32
    %c0_i32_1 = arith.constant 0 : i32
    %c0_i32_2 = arith.constant 0 : i32
    return %c0_i32, %c0_i32_0, %c0_i32_1 : i32, i32, i32
  }
  func.func @transform_15(%arg0: i32, %arg1: memref<2x16xi32, #tpu.memory_space<smem>>) -> (i32, i32, i32) {
    %c0_i32 = arith.constant 0 : i32
    %c0_i32_0 = arith.constant 0 : i32
    %c0_i32_1 = arith.constant 0 : i32
    %c0_i32_2 = arith.constant 0 : i32
    return %c0_i32, %c0_i32_0, %c0_i32_1 : i32, i32, i32
  }
  func.func @transform_16(%arg0: i32, %arg1: memref<2x16xi32, #tpu.memory_space<smem>>) -> (i32, i32) {
    %c0_i32 = arith.constant 0 : i32
    %c0_i32_0 = arith.constant 0 : i32
    %c0_i32_1 = arith.constant 0 : i32
    return %c0_i32, %c0_i32_0 : i32, i32
  }
  func.func @transform_17(%arg0: i32, %arg1: memref<2x16xi32, #tpu.memory_space<smem>>) -> (i32, i32) {
    %c0_i32 = arith.constant 0 : i32
    %c0_i32_0 = arith.constant 0 : i32
    %c0_i32_1 = arith.constant 0 : i32
    return %c0_i32, %c0_i32_0 : i32, i32
  }
  func.func @transform_18(%arg0: i32, %arg1: memref<2x16xi32, #tpu.memory_space<smem>>) -> (i32, i32) {
    %c0_i32 = arith.constant 0 : i32
    %c0_i32_0 = arith.constant 0 : i32
    %c0_i32_1 = arith.constant 0 : i32
    return %c0_i32, %c0_i32_0 : i32, i32
  }
  func.func @transform_19(%arg0: i32, %arg1: memref<2x16xi32, #tpu.memory_space<smem>>) -> (i32, i32, i32) {
    %c0_i32 = arith.constant 0 : i32
    %c0_i32_0 = arith.constant 0 : i32
    %c0_i32_1 = arith.constant 0 : i32
    return %arg0, %c0_i32, %c0_i32_0 : i32, i32, i32
  }
}

</mosaic_0001>

<bundles_post_ra>
// kernel: tpu_custom_call.1
= control target key start
LH: loop header
LB: loop body
LE: loop exit
PB: predicated region body
PF: predicated region fallthrough
CT: control target
= control target key end

     0   :  { %s10433_s0 = inlined_call_operand.hbm [shape: s32[2,16], index: 0, kind: input, shape index: {}]   ;;  %s10434_s1 = inlined_call_operand.hbm [shape: f32[129,128], index: 1, kind: input, shape index: {}]   ;;  %s10435_s2 = inlined_call_operand.hbm [shape: f32[16,128], index: 2, kind: input, shape index: {}]   ;;  %s10436_s3 = inlined_call_operand.hbm [shape: f32[2,1,128], index: 3, kind: input, shape index: {}]   ;;  %s10437_s4 = inlined_call_operand.hbm [shape: f32[2,1,128], index: 4, kind: input, shape index: {}]   ;;  %s10438_s5 = inlined_call_operand.hbm [shape: bf16[2,128,384], index: 5, kind: input, shape index: {}]   ;;  %s10439_s6 = inlined_call_operand.vmem [shape: f32[2,1,384], index: 6, kind: input, shape index: {}]   ;;  %s10440_s7 = inlined_call_operand.hbm [shape: bf16[2,128,128], index: 7, kind: input, shape index: {}]   ;;  %s10441_s8 = inlined_call_operand.hbm [shape: f32[2,1,128], index: 8, kind: input, shape index: {}]   ;;  %s10442_s9 = inlined_call_operand.hbm [shape: f32[2,1,128], index: 9, kind: input, shape index: {}]   ;;  %s10443_s10 = inlined_call_operand.hbm [shape: f32[2,1,128], index: 10, kind: input, shape index: {}]   ;;  %s10444_s11 = inlined_call_operand.hbm [shape: f32[2,1,128], index: 11, kind: input, shape index: {}]   ;;  %s10445_s12 = inlined_call_operand.hbm [shape: bf16[2,128,512], index: 12, kind: input, shape index: {}]   ;;  %s10446_s13 = inlined_call_operand.hbm [shape: f32[2,1,512], index: 13, kind: input, shape index: {}]   ;;  %s10447_s14 = inlined_call_operand.hbm [shape: bf16[2,512,128], index: 14, kind: input, shape index: {}]   ;;  %s10448_s15 = inlined_call_operand.hbm [shape: f32[2,1,128], index: 15, kind: input, shape index: {}]   ;;  %s10449_s16 = inlined_call_operand.hbm [shape: f32[2,1,128], index: 16, kind: input, shape index: {}]   ;;  %s10450_s17 = inlined_call_operand.vmem [shape: f32[1,128], index: 17, kind: input, shape index: {}]   ;;  %s10451_s18 = inlined_call_operand.hbm [shape: f32[1,128], index: 18, kind: input, shape index: {}]   ;;  %s10452_s19 = inlined_call_operand.vmem [shape: bf16[128,128], index: 19, kind: input, shape index: {}]   ;;  %s10453_s20 = inlined_call_operand.hbm [shape: f32[2,16,128], index: 20, kind: output, shape index: {}]  }
   0x1   :  { %10488 = sst [smem:[#allocation53_spill]] %s10433_s0 }
   0x2   :  { %10489 = sst [smem:[#allocation54_spill]] %s10434_s1  ;;  %s10501_s23 = sld [smem:[#allocation53_spill]] }
   0x3   :  { %10490 = sst [smem:[#allocation55_spill]] %s10435_s2 }
   0x4   :  { %10491 = sst [smem:[#allocation56_spill]] %s10436_s3 }
   0x5   :  { %10492 = sst [smem:[#allocation57_spill]] %s10437_s4 }
   0x6   :  { %10493 = sst [smem:[#allocation58_spill]] %s10438_s5 }
   0x7   :  { %10494 = sst [smem:[#allocation59_spill]] %s10439_s6 }
   0x8   :  { %10495 = sst [smem:[#allocation60_spill]] %s10440_s7  ;;  %s8297_s6 = scalar_lea.hbm %s10501_s23, 32 }
   0x9   :  { %10496 = sst [smem:[#allocation61_spill]] %s10442_s9  ;;  %p8298_p0 = scmp.ne.s32.totalorder %s10501_s23, %s8297_s6 }
   0xa   :  { %10497 = sst [smem:[#allocation62_spill]] %s10450_s17  ;;  %p8301_p1 = scmp.lt.u32.totalorder %s8297_s6, %s10501_s23 }
   0xb   :  { %10498 = sst [smem:[#allocation63_spill]] %s10451_s18 }
   0xc   :  { %10499 = sst [smem:[#allocation64_spill]] %s10452_s19  ;;  %p8303_p2 = pnand %p8301_p1, %p8298_p0 }
   0xd   :  { %10500 = sst [smem:[#allocation65_spill]] %s10453_s20 }
   0xe   :  { %8306 = shalt.err (!%p8303_p2)  }
   0xf   :  { %s8857_s26 = smov [#allocation4]  }
  0x10   :  { %26 = dma.hbm_to_smem %s10501_s23, 32, %s8857_s26, [#allocation3] }
  0x11   :  { %8799 = dma.done.wait [#allocation3], 32 }
  0x12   :  { %8800 = vsyncadd [#allocation3], 4294967264 }
  0x13   :  { %28 = sfence }
  0x14   :  { %29 = vsyncpa [#allocation6], 0 }
  0x15   :  { %30 = vsyncpa [#allocation9], 0 }
  0x16   :  { %31 = vsyncpa [#allocation12], 0 }
  0x17   :  { %32 = vsyncpa [#allocation15], 0 }
  0x18   :  { %33 = vsyncpa [#allocation18], 0 }
  0x19   :  { %34 = vsyncpa [#allocation21], 0 }
  0x1a   :  { %35 = vsyncpa [#allocation24], 0 }
  0x1b   :  { %36 = vsyncpa [#allocation27], 0 }
  0x1c   :  { %37 = vsyncpa [#allocation30], 0 }
  0x1d   :  { %38 = vsyncpa [#allocation7], 0 }
  0x1e   :  { %40 = vsyncpa [#allocation7 + $0x1], 0  ;;  %s9011_s6 = smov 0   ;;  %s9013_s4 = smov 0  }
  0x1f   :  { %s9015_s29 = smov 0   ;;  %s9017_s30 = smov 0  }
  0x20 LB: > { %10502 = sst [smem:[#allocation43_spill]] %s8843_s6  ;;  %s9032_s0 = sadd.s32 4294967295, %s8855_s30   ;;  %s8855_s30 = sphi %s9017_s30, %s10565_s30   ;;  %s8851_s29 = sphi %s9015_s29, %s10568_s29   ;;  %s8847_s4 = sphi %s9013_s4, %s10567_s4   ;;  %s8843_s6 = sphi %s9011_s6, %s10566_s6  }
  0x21   : > { %10503 = sst [smem:[#allocation44_spill]] %s8847_s4  ;;  %s7012_s21 = sadd.s32 4294967294, %s8855_s30  }
  0x22   : > { %10504 = sst [smem:[#allocation45_spill]] %s8851_s29  ;;  %s9036_s1 = sadd.s32 1, %s8855_s30  }
  0x23   : > { %10505 = sst [smem:[#allocation46_spill]] %s8855_s30  ;;  %s452_s22 = sadd.s32 1, %s8851_s29 }
  0x24   : > { %10506 = sst [smem:[#allocation47_spill]] %s9032_s0  ;;  %s449_s23 = ssub.s32 %s8855_s30, %s9036_s1 }
  0x25   : > { %10507 = sst [smem:[#allocation48_spill]] %s9036_s1  ;;  %p462_p3 = scmp.ne.s32.totalorder %s8851_s29, %s8847_s4 }
  0x26   : > { %p450_p4 = scmp.eq.s32.totalorder %s449_s23, 0  ;;  %p463_p5 = scmp.eq.s32.totalorder %s9032_s0, 1 }
  0x27   : > { %p468_p6 = scmp.ne.s32.totalorder %s8847_s4, %s8843_s6  ;;  %p469_p7 = scmp.eq.s32.totalorder %s7012_s21, 1 }
  0x28   : > { %s9047_s24 = scalar_select %p450_p4, %s8851_s29, %s452_s22  }
  0x29   : > { %p9049_p8 = por %p463_p5, %p462_p3  ;;  %p9053_p9 = por %p469_p7, %p468_p6 }
  0x2a   : > { %10508 = sst [smem:[#allocation49_spill]] %s9047_s24  ;;  %p7013_p10 = scmp.ge.s32.totalorder %s8855_s30, 1 }
  0x2b   : > { %s10509_s2 = scalar_select %p9049_p8, 1, 0 }
  0x2c   : > { %s10511_s25 = scalar_select %p9053_p9, 1, 0 }
  0x2d   : > { %10510 = sst [smem:[#allocation50_spill]] %s10509_s2  ;;  %p476_p11 = scmp.lt.s32.totalorder %s8855_s30, 3 }
  0x2e   : > { %10512 = sst [smem:[#allocation51_spill]] %s10511_s25  ;;  %p10469_p12 = scmp.eq.s32.totalorder %s9032_s0, 0 }
  0x2f   : > { %p9060_p13 = pnand %p7013_p10, %p476_p11  ;;  %s8858_s26 = smov [#allocation8]  }
  0x30   : > { %s501_s27 = sshll.u32 %s8858_s26, 4  ;;  %s8859_s21 = smov [#allocation11]   ;;  %s502_s27 = int_to_ptr.vmem [resolvable:$true] %s501_s27 }
  0x31   : > { %s10513_s3 = scalar_select %p9060_p13, 1, 0 }
  0x32   : > { %p7749_p0 = pneg %p9060_p13  ;;  %s527_s22 = sshll.u32 %s8859_s21, 4  ;;  %s528_s22 = int_to_ptr.vmem [resolvable:$true] %s527_s22 }
  0x33   : > { %10514 = sst [smem:[#allocation52_spill]] %s10513_s3  ;;  %s10516_s29 = sld [smem:[#allocation55_spill]] }
  0x34   : > { %p9068_p1 = pnand %p10469_p12, %p7749_p0 }
  0x36   : > { %p9080_p3 = pneg %p9068_p1 }
  0x39   : > { %s10517_s1 = smov %s10516_s29  ;;  %s8307_s25 = scalar_lea.hbm %s10516_s29, 256 }
  0x3a   : > { %p8308_p2 = scmp.ne.s32.totalorder %s10517_s1, %s8307_s25  ;;  %p8314_p6 = scmp.lt.u32.totalorder %s8307_s25, %s10517_s1 }
  0x3c   : > { %p8310_p4 = pnand %p9080_p3, %p8308_p2 }
  0x3e   : > { %p8311_p5 = pneg %p8310_p4 }
  0x40   : > { %p8316_p7 = pnand %p8314_p6, %p8311_p5 }
  0x42   : > { %8319 = shalt.err (!%p8316_p7)
}
  0x43   : > { %s8320_s29 = scalar_lea.vmem %s502_s27, 256  ;;  %p8328_p12 = scmp.lt.s32.totalorder %s502_s27, %s502_s27 }
  0x44   : > { %p8321_p10 = scmp.ne.s32.totalorder %s502_s27, %s8320_s29  ;;  %p8329_p9 = scmp.lt.s32.totalorder %s8320_s29, %s8320_s29 }
  0x46   : > { %p8323_p11 = pnand %p8321_p10, %p9080_p3  ;;  %p8330_p8 = por %p8329_p9, %p8328_p12 }
  0x48   : > { %p8324_p0 = pneg %p8323_p11 }
  0x4a   : > { %p8331_p13 = pnand %p8330_p8, %p8324_p0 }
  0x4c   : > { %8334 = shalt.err (!%p8331_p13)
}
  0x4d   : > { %s10478_s6 = smov 128   ;;  %s10479_s30 = smov 8  }
  0x4e   : > { %7755 = dma.hbm_to_vmem [thread:$0]  (!%p9068_p1), %s10517_s1, 256, %s502_s27, [#allocation9], %s10478_s6, %s10478_s6, %s10479_s30  }
  0x4f   : > { %s8862_s2 = smov [#allocation14]   ;;  %s10519_s29 = sld [smem:[#allocation57_spill]] }
  0x50   : > { %s556_s25 = sshll.u32 %s8862_s2, 4  ;;  %s557_s25 = int_to_ptr.vmem [resolvable:$true] %s556_s25 }
  0x55   : > { %s10520_s17 = smov %s10519_s29  ;;  %s8335_s4 = scalar_lea.hbm %s10519_s29, 32 }
  0x56   : > { %p8336_p8 = scmp.ne.s32.totalorder %s10520_s17, %s8335_s4  ;;  %p8342_p13 = scmp.lt.u32.totalorder %s8335_s4, %s10520_s17 }
  0x58   : > { %p8338_p9 = pnand %p8336_p8, %p9080_p3 }
  0x5a   : > { %p8339_p12 = pneg %p8338_p9 }
  0x5c   : > { %p8344_p2 = pnand %p8342_p13, %p8339_p12 }
  0x5e   : > { %8347 = shalt.err (!%p8344_p2)
}
  0x5f   : > { %s8348_s27 = scalar_lea.vmem %s528_s22, 32  ;;  %p8356_p7 = scmp.lt.s32.totalorder %s528_s22, %s528_s22 }
  0x60   : > { %p8349_p4 = scmp.ne.s32.totalorder %s528_s22, %s8348_s27  ;;  %p8357_p10 = scmp.lt.s32.totalorder %s8348_s27, %s8348_s27 }
  0x62   : > { %p8351_p5 = pnand %p8349_p4, %p9080_p3  ;;  %p8358_p11 = por %p8357_p10, %p8356_p7 }
  0x64   : > { %p8352_p6 = pneg %p8351_p5 }
  0x66   : > { %p8359_p0 = pnand %p8358_p11, %p8352_p6 }
  0x68   : > { %8362 = shalt.err (!%p8359_p0)
}
  0x69   : > { %s10480_s19 = smov 16   ;;  %s10482_s0 = smov 1  }
  0x6a   : > { %7761 = dma.hbm_to_vmem [thread:$0]  (!%p9068_p1), %s10520_s17, 32, %s528_s22, [#allocation12], %s10480_s19, %s10480_s19, %s10482_s0  }
  0x6b   : > { %s10521_s7 = sld [smem:[#allocation60_spill]] }
  0x71   : > { %s8363_s24 = scalar_lea.hbm %s10521_s7, 2048 }
  0x72   : > { %p8364_p8 = scmp.ne.s32.totalorder %s10521_s7, %s8363_s24  ;;  %p8370_p13 = scmp.lt.u32.totalorder %s8363_s24, %s10521_s7 }
  0x74   : > { %p8366_p9 = pnand %p8364_p8, %p9080_p3 }
  0x76   : > { %p8367_p12 = pneg %p8366_p9 }
  0x78   : > { %p8372_p2 = pnand %p8370_p13, %p8367_p12 }
  0x7a   : > { %8375 = shalt.err (!%p8372_p2)
}
  0x7b   : > { %s8376_s27 = scalar_lea.vmem %s557_s25, 2048  ;;  %p8384_p7 = scmp.lt.s32.totalorder %s557_s25, %s557_s25 }
  0x7c   : > { %p8377_p4 = scmp.ne.s32.totalorder %s557_s25, %s8376_s27  ;;  %p8385_p10 = scmp.lt.s32.totalorder %s8376_s27, %s8376_s27 }
  0x7e   : > { %p8379_p5 = pnand %p8377_p4, %p9080_p3  ;;  %p8386_p11 = por %p8385_p10, %p8384_p7 }
  0x80   : > { %p8380_p6 = pneg %p8379_p5 }
  0x82   : > { %p8387_p0 = pnand %p8386_p11, %p8380_p6 }
  0x84   : > { %8390 = shalt.err (!%p8387_p0)
}
  0x85   : > { %s10484_s22 = smov 64   ;;  %s10486_s18 = smov 4  }
  0x86   : > { %7767 = dma.hbm_to_vmem [thread:$0]  (!%p9068_p1), %s10521_s7, 2048, %s557_s25, [#allocation15], %s10484_s22, %s10484_s22, %s10486_s18  }
  0x87   : > { %s8867_s20 = smov [#allocation17]   ;;  %s8868_s2 = smov [#allocation20]  }
  0x88   : > { %s582_s24 = sshll.u32 %s8867_s20, 4  ;;  %s608_s21 = sshll.u32 %s8868_s2, 4  ;;  %s583_s24 = int_to_ptr.vmem [resolvable:$true] %s582_s24  ;;  %s609_s21 = int_to_ptr.vmem [resolvable:$true] %s608_s21 }
  0x89   : > { %s10522_s9 = sld [smem:[#allocation61_spill]] }
  0x8f   : > { %s8391_s27 = scalar_lea.hbm %s10522_s9, 32 }
  0x90   : > { %p8392_p8 = scmp.ne.s32.totalorder %s10522_s9, %s8391_s27  ;;  %p8398_p13 = scmp.lt.u32.totalorder %s8391_s27, %s10522_s9 }
  0x92   : > { %p8394_p9 = pnand %p8392_p8, %p9080_p3 }
  0x94   : > { %p8395_p12 = pneg %p8394_p9 }
  0x96   : > { %p8400_p2 = pnand %p8398_p13, %p8395_p12 }
  0x98   : > { %8403 = shalt.err (!%p8400_p2)
}
  0x99   : > { %s8404_s25 = scalar_lea.vmem %s583_s24, 32  ;;  %p8412_p7 = scmp.lt.s32.totalorder %s583_s24, %s583_s24 }
  0x9a   : > { %p8405_p4 = scmp.ne.s32.totalorder %s583_s24, %s8404_s25  ;;  %p8413_p10 = scmp.lt.s32.totalorder %s8404_s25, %s8404_s25 }
  0x9c   : > { %p8407_p5 = pnand %p8405_p4, %p9080_p3  ;;  %p8414_p11 = por %p8413_p10, %p8412_p7 }
  0x9e   : > { %p8408_p6 = pneg %p8407_p5 }
  0xa0   : > { %p8415_p0 = pnand %p8414_p11, %p8408_p6 }
  0xa2   : > { %8418 = shalt.err (!%p8415_p0)
}
  0xa3   : > { %s10523_s6 = smov 1   ;;  %s10524_s30 = smov 16  }
  0xa4   : > { %7773 = dma.hbm_to_vmem [thread:$0]  (!%p9068_p1), %s10522_s9, 32, %s583_s24, [#allocation18], %s10524_s30, %s10524_s30, %s10523_s6  }
  0xa5   : > { %s8419_s20 = scalar_lea.hbm %s10444_s11, 32 }
  0xa6   : > { %p8420_p8 = scmp.ne.s32.totalorder %s10444_s11, %s8419_s20  ;;  %p8426_p13 = scmp.lt.u32.totalorder %s8419_s20, %s10444_s11 }
  0xa8   : > { %p8422_p9 = pnand %p8420_p8, %p9080_p3 }
  0xaa   : > { %p8423_p12 = pneg %p8422_p9 }
  0xac   : > { %p8428_p2 = pnand %p8426_p13, %p8423_p12 }
  0xae   : > { %8431 = shalt.err (!%p8428_p2)
}
  0xaf   : > { %s8432_s25 = scalar_lea.vmem %s609_s21, 32  ;;  %p8440_p7 = scmp.lt.s32.totalorder %s609_s21, %s609_s21 }
  0xb0   : > { %p8433_p4 = scmp.ne.s32.totalorder %s609_s21, %s8432_s25  ;;  %p8441_p10 = scmp.lt.s32.totalorder %s8432_s25, %s8432_s25 }
  0xb2   : > { %p8435_p5 = pnand %p8433_p4, %p9080_p3  ;;  %p8442_p11 = por %p8441_p10, %p8440_p7 }
  0xb4   : > { %p8436_p6 = pneg %p8435_p5 }
  0xb6   : > { %p8443_p0 = pnand %p8442_p11, %p8436_p6 }
  0xb8   : > { %8446 = shalt.err (!%p8443_p0)
}
  0xb9   : > { %7779 = dma.hbm_to_vmem [thread:$0]  (!%p9068_p1), %s10444_s11, 32, %s609_s21, [#allocation21], %s10524_s30, %s10524_s30, %s10523_s6  }
  0xba   : > { %s8869_s0 = smov [#allocation23]   ;;  %s8870_s3 = smov [#allocation26]  }
  0xbb   : > { %s634_s4 = sshll.u32 %s8869_s0, 4  ;;  %s660_s20 = sshll.u32 %s8870_s3, 4  ;;  %s635_s4 = int_to_ptr.vmem [resolvable:$true] %s634_s4  ;;  %s661_s20 = int_to_ptr.vmem [resolvable:$true] %s660_s20 }
  0xbc   : > { %s8447_s29 = scalar_lea.hbm %s10446_s13, 128 }
  0xbd   : > { %p8448_p8 = scmp.ne.s32.totalorder %s10446_s13, %s8447_s29  ;;  %p8454_p13 = scmp.lt.u32.totalorder %s8447_s29, %s10446_s13 }
  0xbf   : > { %p8450_p9 = pnand %p8448_p8, %p9080_p3 }
  0xc1   : > { %p8451_p12 = pneg %p8450_p9 }
  0xc3   : > { %p8456_p2 = pnand %p8454_p13, %p8451_p12 }
  0xc5   : > { %8459 = shalt.err (!%p8456_p2)
}
  0xc6   : > { %s8460_s21 = scalar_lea.vmem %s635_s4, 128  ;;  %p8468_p7 = scmp.lt.s32.totalorder %s635_s4, %s635_s4 }
  0xc7   : > { %p8461_p4 = scmp.ne.s32.totalorder %s635_s4, %s8460_s21  ;;  %p8469_p10 = scmp.lt.s32.totalorder %s8460_s21, %s8460_s21 }
  0xc9   : > { %p8463_p5 = pnand %p8461_p4, %p9080_p3  ;;  %p8470_p11 = por %p8469_p10, %p8468_p7 }
  0xcb   : > { %p8464_p6 = pneg %p8463_p5 }
  0xcd   : > { %p8471_p0 = pnand %p8470_p11, %p8464_p6 }
  0xcf   : > { %8474 = shalt.err (!%p8471_p0)
}
  0xd0   : > { %s10525_s19 = smov 64   ;;  %s8475_s23 = scalar_lea.hbm %s10448_s15, 32 }
  0xd1   : > { %7785 = dma.hbm_to_vmem [thread:$0]  (!%p9068_p1), %s10446_s13, 128, %s635_s4, [#allocation24], %s10525_s19, %s10525_s19, %s10486_s18  }
  0xd2   : > { %p8476_p8 = scmp.ne.s32.totalorder %s10448_s15, %s8475_s23  ;;  %p8482_p13 = scmp.lt.u32.totalorder %s8475_s23, %s10448_s15 }
  0xd4   : > { %p8478_p9 = pnand %p8476_p8, %p9080_p3 }
  0xd6   : > { %p8479_p12 = pneg %p8478_p9 }
  0xd8   : > { %p8484_p2 = pnand %p8482_p13, %p8479_p12 }
  0xda   : > { %8487 = shalt.err (!%p8484_p2)
}
  0xdb   : > { %s8488_s21 = scalar_lea.vmem %s661_s20, 32  ;;  %p8496_p7 = scmp.lt.s32.totalorder %s661_s20, %s661_s20 }
  0xdc   : > { %p8489_p4 = scmp.ne.s32.totalorder %s661_s20, %s8488_s21  ;;  %p8497_p10 = scmp.lt.s32.totalorder %s8488_s21, %s8488_s21 }
  0xde   : > { %p8491_p5 = pnand %p8489_p4, %p9080_p3  ;;  %p8498_p11 = por %p8497_p10, %p8496_p7 }
  0xe0   : > { %p8492_p6 = pneg %p8491_p5 }
  0xe2   : > { %p8499_p0 = pnand %p8498_p11, %p8492_p6 }
  0xe4   : > { %8502 = shalt.err (!%p8499_p0)
}
  0xe5   : > { %7791 = dma.hbm_to_vmem [thread:$0]  (!%p9068_p1), %s10448_s15, 32, %s661_s20, [#allocation27], %s10524_s30, %s10524_s30, %s10523_s6  }
  0xe6   : > { %s8871_s0 = smov [#allocation5]   ;;  %s8872_s2 = smov [#allocation10]  }
  0xe7   : > { %s488_s3 = sshll.u32 %s8871_s0, 4  ;;  %s514_s23 = sshll.u32 %s8872_s2, 4  ;;  %s489_s3 = int_to_ptr.vmem [resolvable:$true] %s488_s3  ;;  %s515_s23 = int_to_ptr.vmem [resolvable:$true] %s514_s23 }
  0xe8   : > { %s10526_s25 = sld [smem:[#allocation54_spill]] }
  0xee   : > { %s8503_s24 = scalar_lea.hbm %s10526_s25, 2176 }
  0xef   : > { %p8504_p8 = scmp.ne.s32.totalorder %s10526_s25, %s8503_s24  ;;  %p8510_p13 = scmp.lt.u32.totalorder %s8503_s24, %s10526_s25 }
  0xf1   : > { %p8506_p9 = pnand %p8504_p8, %p9080_p3 }
  0xf3   : > { %p8507_p12 = pneg %p8506_p9 }
  0xf5   : > { %p8512_p2 = pnand %p8510_p13, %p8507_p12 }
  0xf7   : > { %8515 = shalt.err (!%p8512_p2)
}
  0xf8   : > { %s8516_s20 = scalar_lea.vmem %s489_s3, 2176  ;;  %p8524_p7 = scmp.lt.s32.totalorder %s489_s3, %s489_s3 }
  0xf9   : > { %p8517_p4 = scmp.ne.s32.totalorder %s489_s3, %s8516_s20  ;;  %p8525_p10 = scmp.lt.s32.totalorder %s8516_s20, %s8516_s20 }
  0xfb   : > { %p8519_p5 = pnand %p8517_p4, %p9080_p3  ;;  %p8526_p11 = por %p8525_p10, %p8524_p7 }
  0xfd   : > { %p8520_p6 = pneg %p8519_p5 }
  0xff   : > { %p8527_p0 = pnand %p8526_p11, %p8520_p6 }
 0x101   : > { %8530 = shalt.err (!%p8527_p0)
}
 0x102   : > { %s10527_s18 = smov 8   ;;  %s10528_s22 = smov 128  }
 0x103   : > { %7752 = dma.hbm_to_vmem [thread:$0]  (!%p9068_p1), %s10526_s25, 2176, %s489_s3, [#allocation6], %s10528_s22, %s10528_s22, %s10527_s18  }
 0x104   : > { %s10529_s27 = sld [smem:[#allocation56_spill]] }
 0x10a   : > { %s8531_s24 = scalar_lea.hbm %s10529_s27, 32 }
 0x10b   : > { %p8532_p8 = scmp.ne.s32.totalorder %s10529_s27, %s8531_s24  ;;  %p8538_p13 = scmp.lt.u32.totalorder %s8531_s24, %s10529_s27 }
 0x10d   : > { %p8534_p9 = pnand %p8532_p8, %p9080_p3 }
 0x10f   : > { %p8535_p12 = pneg %p8534_p9 }
 0x111   : > { %p8540_p2 = pnand %p8538_p13, %p8535_p12 }
 0x113   : > { %8543 = shalt.err (!%p8540_p2)
}
 0x114   : > { %s8544_s1 = scalar_lea.vmem %s515_s23, 32  ;;  %p8552_p7 = scmp.lt.s32.totalorder %s515_s23, %s515_s23 }
 0x115   : > { %p8545_p4 = scmp.ne.s32.totalorder %s515_s23, %s8544_s1  ;;  %p8553_p10 = scmp.lt.s32.totalorder %s8544_s1, %s8544_s1 }
 0x117   : > { %p8547_p5 = pnand %p8545_p4, %p9080_p3  ;;  %p8554_p11 = por %p8553_p10, %p8552_p7 }
 0x119   : > { %p8548_p6 = pneg %p8547_p5 }
 0x11b   : > { %p8555_p0 = pnand %p8554_p11, %p8548_p6 }
 0x11d   : > { %8558 = shalt.err (!%p8555_p0)
}
 0x11e   : > { %7758 = dma.hbm_to_vmem [thread:$0]  (!%p9068_p1), %s10529_s27, 32, %s515_s23, [#allocation9], %s10524_s30, %s10524_s30, %s10523_s6  }
 0x11f   : > { %s8873_s18 = smov [#allocation13]   ;;  %s10530_s5 = sld [smem:[#allocation58_spill]] }
 0x120   : > { %s540_s22 = sshll.u32 %s8873_s18, 4  ;;  %s541_s22 = int_to_ptr.vmem [resolvable:$true] %s540_s22 }
 0x125   : > { %s8559_s29 = scalar_lea.hbm %s10530_s5, 6144 }
 0x126   : > { %p8560_p8 = scmp.ne.s32.totalorder %s10530_s5, %s8559_s29  ;;  %p8566_p13 = scmp.lt.u32.totalorder %s8559_s29, %s10530_s5 }
 0x128   : > { %p8562_p9 = pnand %p8560_p8, %p9080_p3 }
 0x12a   : > { %p8563_p12 = pneg %p8562_p9 }
 0x12c   : > { %p8568_p2 = pnand %p8566_p13, %p8563_p12 }
 0x12e   : > { %8571 = shalt.err (!%p8568_p2)
}
 0x12f   : > { %s8572_s23 = scalar_lea.vmem %s541_s22, 6144  ;;  %p8580_p7 = scmp.lt.s32.totalorder %s541_s22, %s541_s22 }
 0x130   : > { %p8573_p4 = scmp.ne.s32.totalorder %s541_s22, %s8572_s23  ;;  %p8581_p10 = scmp.lt.s32.totalorder %s8572_s23, %s8572_s23 }
 0x132   : > { %p8575_p5 = pnand %p8573_p4, %p9080_p3  ;;  %p8582_p11 = por %p8581_p10, %p8580_p7 }
 0x134   : > { %p8576_p6 = pneg %p8575_p5 }
 0x136   : > { %p8583_p0 = pnand %p8582_p11, %p8576_p6 }
 0x138   : > { %8586 = shalt.err (!%p8583_p0)
}
 0x139   : > { %s8874_s1 = smov 192   ;;  %s8875_s7 = smov 12  }
 0x13a   : > { %7764 = dma.hbm_to_vmem [thread:$0]  (!%p9068_p1), %s10530_s5, 6144, %s541_s22, [#allocation12], %s8874_s1, %s8874_s1, %s8875_s7  }
 0x13b   : > { %s8876_s0 = smov [#allocation16]   ;;  %s8877_s29 = smov [#allocation19]  }
 0x13c   : > { %s569_s2 = sshll.u32 %s8876_s0, 4  ;;  %s595_s24 = sshll.u32 %s8877_s29, 4  ;;  %s570_s2 = int_to_ptr.vmem [resolvable:$true] %s569_s2  ;;  %s9285_s24 = int_to_ptr.vmem [resolvable:$true] %s595_s24 }
 0x13d   : > { %s8587_s20 = scalar_lea.hbm %s10441_s8, 32 }
 0x13e   : > { %p8588_p8 = scmp.ne.s32.totalorder %s10441_s8, %s8587_s20  ;;  %p8594_p13 = scmp.lt.u32.totalorder %s8587_s20, %s10441_s8 }
 0x140   : > { %p8590_p9 = pnand %p8588_p8, %p9080_p3 }
 0x142   : > { %p8591_p12 = pneg %p8590_p9 }
 0x144   : > { %p8596_p2 = pnand %p8594_p13, %p8591_p12 }
 0x146   : > { %8599 = shalt.err (!%p8596_p2)
}
 0x147   : > { %s8600_s1 = scalar_lea.vmem %s570_s2, 32  ;;  %p8608_p7 = scmp.lt.s32.totalorder %s570_s2, %s570_s2 }
 0x148   : > { %p8601_p4 = scmp.ne.s32.totalorder %s570_s2, %s8600_s1  ;;  %p8609_p10 = scmp.lt.s32.totalorder %s8600_s1, %s8600_s1 }
 0x14a   : > { %p8603_p5 = pnand %p8601_p4, %p9080_p3  ;;  %p8610_p11 = por %p8609_p10, %p8608_p7 }
 0x14c   : > { %p8604_p6 = pneg %p8603_p5 }
 0x14e   : > { %p8611_p0 = pnand %p8610_p11, %p8604_p6 }
 0x150   : > { %8614 = shalt.err (!%p8611_p0)
}
 0x151   : > { %7770 = dma.hbm_to_vmem [thread:$0]  (!%p9068_p1), %s10441_s8, 32, %s570_s2, [#allocation15], %s10524_s30, %s10524_s30, %s10523_s6  }
 0x152   : > { %s8615_s29 = scalar_lea.hbm %s10443_s10, 32 }
 0x153   : > { %p8616_p8 = scmp.ne.s32.totalorder %s10443_s10, %s8615_s29  ;;  %p8622_p13 = scmp.lt.u32.totalorder %s8615_s29, %s10443_s10 }
 0x155   : > { %p8618_p9 = pnand %p8616_p8, %p9080_p3 }
 0x157   : > { %p8619_p12 = pneg %p8618_p9 }
 0x159   : > { %p8624_p2 = pnand %p8622_p13, %p8619_p12 }
 0x15b   : > { %8627 = shalt.err (!%p8624_p2)
}
 0x15c   : > { %s8628_s2 = scalar_lea.vmem %s9285_s24, 32  ;;  %p8636_p7 = scmp.lt.s32.totalorder %s9285_s24, %s9285_s24 }
 0x15d   : > { %p8629_p4 = scmp.ne.s32.totalorder %s9285_s24, %s8628_s2  ;;  %p8637_p10 = scmp.lt.s32.totalorder %s8628_s2, %s8628_s2 }
 0x15f   : > { %p8631_p5 = pnand %p8629_p4, %p9080_p3  ;;  %p8638_p11 = por %p8637_p10, %p8636_p7 }
 0x161   : > { %p8632_p6 = pneg %p8631_p5 }
 0x163   : > { %p8639_p0 = pnand %p8638_p11, %p8632_p6 }
 0x165   : > { %8642 = shalt.err (!%p8639_p0)
}
 0x166   : > { %7776 = dma.hbm_to_vmem [thread:$0]  (!%p9068_p1), %s10443_s10, 32, %s9285_s24, [#allocation18], %s10524_s30, %s10524_s30, %s10523_s6  }
 0x167   : > { %s8878_s1 = smov [#allocation22]   ;;  %s8879_s7 = smov [#allocation25]  }
 0x168   : > { %s621_s9 = sshll.u32 %s8878_s1, 4  ;;  %s647_s18 = sshll.u32 %s8879_s7, 4  ;;  %s622_s9 = int_to_ptr.vmem [resolvable:$true] %s621_s9  ;;  %s648_s18 = int_to_ptr.vmem [resolvable:$true] %s647_s18 }
 0x169   : > { %s8643_s21 = scalar_lea.hbm %s10445_s12, 8192 }
 0x16a   : > { %p8644_p8 = scmp.ne.s32.totalorder %s10445_s12, %s8643_s21  ;;  %p8650_p13 = scmp.lt.u32.totalorder %s8643_s21, %s10445_s12 }
 0x16c   : > { %p8646_p9 = pnand %p8644_p8, %p9080_p3 }
 0x16e   : > { %p8647_p12 = pneg %p8646_p9 }
 0x170   : > { %p8652_p2 = pnand %p8650_p13, %p8647_p12 }
 0x172   : > { %8655 = shalt.err (!%p8652_p2)
}
 0x173   : > { %s8656_s24 = scalar_lea.vmem %s622_s9, 8192  ;;  %p8664_p7 = scmp.lt.s32.totalorder %s622_s9, %s622_s9 }
 0x174   : > { %p8657_p4 = scmp.ne.s32.totalorder %s622_s9, %s8656_s24  ;;  %p8665_p10 = scmp.lt.s32.totalorder %s8656_s24, %s8656_s24 }
 0x176   : > { %p8659_p5 = pnand %p8657_p4, %p9080_p3  ;;  %p8666_p11 = por %p8665_p10, %p8664_p7 }
 0x178   : > { %p8660_p6 = pneg %p8659_p5 }
 0x17a   : > { %p8667_p0 = pnand %p8666_p11, %p8660_p6 }
 0x17c   : > { %8670 = shalt.err (!%p8667_p0)
}
 0x17d   : > { %s8880_s3 = smov 256   ;;  %s8671_s29 = scalar_lea.hbm %s10447_s14, 8192 }
 0x17e   : > { %7782 = dma.hbm_to_vmem [thread:$0]  (!%p9068_p1), %s10445_s12, 8192, %s622_s9, [#allocation21], %s8880_s3, %s8880_s3, %s10524_s30  }
 0x17f   : > { %p8672_p8 = scmp.ne.s32.totalorder %s10447_s14, %s8671_s29  ;;  %p8678_p13 = scmp.lt.u32.totalorder %s8671_s29, %s10447_s14 }
 0x181   : > { %p8674_p9 = pnand %p8672_p8, %p9080_p3 }
 0x183   : > { %p8675_p12 = pneg %p8674_p9 }
 0x185   : > { %p8680_p2 = pnand %p8678_p13, %p8675_p12 }
 0x187   : > { %8683 = shalt.err (!%p8680_p2)
}
 0x188   : > { %s8684_s2 = scalar_lea.vmem %s648_s18, 8192  ;;  %p8692_p7 = scmp.lt.s32.totalorder %s648_s18, %s648_s18 }
 0x189   : > { %p8685_p4 = scmp.ne.s32.totalorder %s648_s18, %s8684_s2  ;;  %p8693_p10 = scmp.lt.s32.totalorder %s8684_s2, %s8684_s2 }
 0x18b   : > { %p8687_p5 = pnand %p8685_p4, %p9080_p3  ;;  %p8694_p11 = por %p8693_p10, %p8692_p7 }
 0x18d   : > { %p8688_p6 = pneg %p8687_p5 }
 0x18f   : > { %p8695_p0 = pnand %p8694_p11, %p8688_p6 }
 0x191   : > { %8698 = shalt.err (!%p8695_p0)
}
 0x192   : > { %s10531_s9 = smov 4   ;;  %s8881_s22 = smov [#allocation28]  }
 0x193   : > { %7788 = dma.hbm_to_vmem [thread:$0]  (!%p9068_p1), %s10447_s14, 8192, %s648_s18, [#allocation24], %s10525_s19, %s10525_s19, %s10531_s9  }
 0x194   : > { %s673_s1 = sshll.u32 %s8881_s22, 4  ;;  %s8882_s7 = smov [#allocation29]   ;;  %s674_s1 = int_to_ptr.vmem [resolvable:$true] %s673_s1 }
 0x195   : > { %s690_s0 = sshll.u32 %s8882_s7, 4  ;;  %s8699_s4 = scalar_lea.hbm %s10449_s16, 32  ;;  %s691_s0 = int_to_ptr.vmem [resolvable:$true] %s690_s0 }
 0x196   : > { %p8700_p8 = scmp.ne.s32.totalorder %s10449_s16, %s8699_s4  ;;  %p8706_p13 = scmp.lt.u32.totalorder %s8699_s4, %s10449_s16 }
 0x198   : > { %p8702_p9 = pnand %p8700_p8, %p9080_p3 }
 0x19a   : > { %p8703_p12 = pneg %p8702_p9 }
 0x19c   : > { %p8708_p2 = pnand %p8706_p13, %p8703_p12 }
 0x19e   : > { %8711 = shalt.err (!%p8708_p2)
}
 0x19f   : > { %s8712_s19 = scalar_lea.vmem %s674_s1, 32  ;;  %p8720_p7 = scmp.lt.s32.totalorder %s674_s1, %s674_s1 }
 0x1a0   : > { %p8713_p4 = scmp.ne.s32.totalorder %s674_s1, %s8712_s19  ;;  %p8721_p10 = scmp.lt.s32.totalorder %s8712_s19, %s8712_s19 }
 0x1a2   : > { %p8715_p5 = pnand %p8713_p4, %p9080_p3  ;;  %p8722_p11 = por %p8721_p10, %p8720_p7 }
 0x1a4   : > { %p8716_p6 = pneg %p8715_p5 }
 0x1a6   : > { %p8723_p0 = pnand %p8722_p11, %p8716_p6 }
 0x1a8   : > { %8726 = shalt.err (!%p8723_p0)
}
 0x1a9   : > { %7794 = dma.hbm_to_vmem [thread:$0]  (!%p9068_p1), %s10449_s16, 32, %s674_s1, [#allocation27], %s10524_s30, %s10524_s30, %s10523_s6  }
 0x1aa   : > { %s10532_s7 = sld [smem:[#allocation63_spill]] }
 0x1b0   : > { %s8727_s29 = scalar_lea.hbm %s10532_s7, 16 }
 0x1b1   : > { %p8728_p8 = scmp.ne.s32.totalorder %s10532_s7, %s8727_s29  ;;  %p8734_p13 = scmp.lt.u32.totalorder %s8727_s29, %s10532_s7 }
 0x1b3   : > { %p8730_p9 = pnand %p8728_p8, %p9080_p3 }
 0x1b5   : > { %p8731_p12 = pneg %p8730_p9 }
 0x1b7   : > { %p8736_p2 = pnand %p8734_p13, %p8731_p12 }
 0x1b9   : > { %8739 = shalt.err (!%p8736_p2)
}
 0x1ba   : > { %s8740_s2 = scalar_lea.vmem %s691_s0, 16  ;;  %s8747_s6 = scalar_lea.vmem %s691_s0, 32 }
 0x1bb   : > { %p8741_p4 = scmp.ne.s32.totalorder %s691_s0, %s8740_s2  ;;  %p8748_p7 = scmp.lt.s32.totalorder %s691_s0, %s691_s0 }
 0x1bc   : > { %p8749_p10 = scmp.lt.s32.totalorder %s8747_s6, %s8740_s2 }
 0x1bd   : > { %p8743_p5 = pnand %p8741_p4, %p9080_p3 }
 0x1be   : > { %p8750_p11 = por %p8749_p10, %p8748_p7 }
 0x1bf   : > { %p8744_p6 = pneg %p8743_p5 }
 0x1c1   : > { %p8751_p0 = pnand %p8750_p11, %p8744_p6 }
 0x1c3   : > { %8754 = shalt.err (!%p8751_p0)
}
 0x1c4   : > { %7797 = dma.hbm_to_vmem [thread:$0]  (!%p9068_p1), %s10532_s7, 16, %s691_s0, [#allocation30]  }
 0x1c5   : > { %s10533_s24 = sld [smem:[#allocation52_spill]] }
 0x1cb   : > { %p10534_p8 = scmp.ne.s32.totalorder %s10533_s24, 0 }
 0x1cc   : > { %s10535_s19 = sld [smem:[#allocation47_spill]] (!%p10534_p8) }
 0x1cd   : > { %706 = sbr.rel (%p10534_p8) target bundleno = 6380 (0x18ec), region = 96 }
 0x1d2   : > { %p10536_p9 = scmp.eq.s32.totalorder (!%p10534_p8), %s10535_s19, 0 }
 0x1d4   : > { %8802 = dma.done.wait (%p10536_p9), [#allocation6], 2176   ;;  %p10537_p3 = pmov %p10536_p9 }
 0x1d6   : > { %8804 = vsyncadd (%p10537_p3), [#allocation6], 4294965120  ;;  %p10538_p12 = pmov %p10537_p3 }
 0x1d7   : > { %p10539_p13 = pmov %p10537_p3 }
 0x1d8   : > { %8806 = dma.done.wait (%p10538_p12), [#allocation9], 288  }
 0x1d9   : > { %8808 = vsyncadd (%p10539_p13), [#allocation9], 4294967008  ;;  %p10540_p2 = pmov %p10537_p3 }
 0x1db   : > { %8810 = dma.done.wait (%p10540_p2), [#allocation12], 6176   ;;  %p10541_p1 = pmov %p10540_p2 }
 0x1dd   : > { %8812 = vsyncadd (%p10541_p1), [#allocation12], 4294961120  ;;  %p10542_p4 = pmov %p10541_p1 }
 0x1de   : > { %p10543_p5 = pmov %p10541_p1 }
 0x1df   : > { %8814 = dma.done.wait (%p10542_p4), [#allocation15], 2080  }
 0x1e0   : > { %8816 = vsyncadd (%p10543_p5), [#allocation15], 4294965216  ;;  %p10544_p6 = pmov %p10541_p1 }
 0x1e1   : > { %p10545_p7 = pmov %p10541_p1 }
 0x1e2   : > { %8818 = dma.done.wait (%p10544_p6), [#allocation18], 64  }
 0x1e3   : > { %8820 = vsyncadd (%p10545_p7), [#allocation18], 4294967232  ;;  %p10546_p10 = pmov %p10541_p1 }
 0x1e4   : > { %p10547_p11 = pmov %p10541_p1 }
 0x1e5   : > { %8822 = dma.done.wait (%p10546_p10), [#allocation21], 8224  }
 0x1e6   : > { %8824 = vsyncadd (%p10547_p11), [#allocation21], 4294959072  ;;  %p10548_p0 = pmov %p10541_p1 }
 0x1e8   : > { %8826 = dma.done.wait (%p10548_p0), [#allocation24], 8320   ;;  %p10549_p8 = pmov %p10548_p0 }
 0x1e9   : > { %p10550_p9 = pmov %p10548_p0 }
 0x1ea   : > { %8828 = vsyncadd (%p10549_p8), [#allocation24], 4294958976 }
 0x1eb   : > { %8830 = dma.done.wait (%p10550_p9), [#allocation27], 64   ;;  %p10551_p3 = pmov %p10548_p0 }
 0x1ec   : > { %p10552_p12 = pmov %p10548_p0 }
 0x1ed   : > { %8832 = vsyncadd (%p10551_p3), [#allocation27], 4294967232 }
 0x1ee   : > { %8834 = dma.done.wait (%p10552_p12), [#allocation30], 16   ;;  %p10553_p13 = pmov %p10548_p0 }
 0x1ef   : > { %s9452_s28 = sshll.u32 %s10535_s19, 7  ;;  %v900_v9 = vld [vmem:[#allocation8] sm:$0xff]  ;;  %v901_v19 = vld [vmem:[#allocation8 + $0x8] sm:$0xff]  ;;  %v8883_v24 = vmov 0.0   ;;  %v7937_v26 = vld [vmem:[#allocation13 + $0x1c] ss:$12 sps:$4 sm:$0xff]  }
 0x1f0   : > { %8836 = vsyncadd (%p10553_p13), [#allocation30], 4294967280  ;;  %s819_s26 = sld [smem:[#allocation4 + %s9452_s28]]  ;;  %s823_s0 = sadd.s32 1, %s9452_s28  ;;  %v7933_v22 = vld [vmem:[#allocation13 + $0x4] ss:$12 sps:$4 sm:$0xff]   ;;  %7487 = vmatprep.subr.bf16.mxu1 %v8883_v24 }
 0x1f1   : > { %s824_s18 = sld [smem:[#allocation4 + %s823_s0]]  ;;  %s828_s9 = sadd.s32 2, %s9452_s28  ;;  %v7935_v23 = vld [vmem:[#allocation13] ss:$12 sps:$4 sm:$0xff]   ;;  %v7936_v25 = vld [vmem:[#allocation13 + $0x8] ss:$12 sps:$4 sm:$0xff]   ;;  %1123 = vmatprep.subr.bf16.mxu0 %v7933_v22 }
 0x1f2   : > { %s829_s3 = sld [smem:[#allocation4 + %s828_s9]]  ;;  %s833_s22 = sadd.s32 3, %s9452_s28  ;;  %1124 = vmatpush1.bf16.msra.mxu0 %v7935_v23  ;;  %7488 = vmatpush3.bf16.msra.mxu1 %v7936_v25  ;;  %v7939_v35 = vld [vmem:[#allocation13 + $0x18] ss:$12 sps:$4 sm:$0xff]   ;;  %v7940_v36 = vld [vmem:[#allocation13 + $0x20] ss:$12 sps:$4 sm:$0xff]  }
 0x1f3   : > { %s834_s29 = sld [smem:[#allocation4 + %s833_s22]]  ;;  %s838_s21 = sadd.s32 4, %s9452_s28  ;;  %1125 = vmatprep.subr.bf16.mxu0 %v7937_v26  ;;  %7489 = vmatprep.subr.bf16.mxu1 %v8883_v24  ;;  %v7941_v37 = vld [vmem:[#allocation13 + $0x34] ss:$12 sps:$4 sm:$0xff]   ;;  %v7943_v38 = vld [vmem:[#allocation13 + $0x30] ss:$12 sps:$4 sm:$0xff]  }
 0x1f4   : > { %s839_s4 = sld [smem:[#allocation4 + %s838_s21]]  ;;  %s843_s20 = sadd.s32 5, %s9452_s28  ;;  %v7944_v39 = vld [vmem:[#allocation13 + $0x38] ss:$12 sps:$4 sm:$0xff]   ;;  %v7947_v41 = vld [vmem:[#allocation13 + $0x48] ss:$12 sps:$4 sm:$0xff]  }
 0x1f5   : > { %s844_s23 = sld [smem:[#allocation4 + %s843_s20]]  ;;  %s848_s2 = sadd.s32 6, %s9452_s28  ;;  %v7945_v40 = vld [vmem:[#allocation13 + $0x4c] ss:$12 sps:$4 sm:$0xff]   ;;  %v7948_v42 = vld [vmem:[#allocation13 + $0x50] ss:$12 sps:$4 sm:$0xff]  }
 0x1f6   : > { %s849_s6 = sld [smem:[#allocation4 + %s848_s2]]  ;;  %s820_s30 = scalar_lea.vmem [#allocation5], %s819_s26  ;;  %1126 = vmatpush1.bf16.msra.mxu0 %v7939_v35  ;;  %7490 = vmatpush3.bf16.msra.mxu1 %v7940_v36  ;;  %v7949_v43 = vld [vmem:[#allocation13 + $0x64] ss:$12 sps:$4 sm:$0xff]   ;;  %v7951_v44 = vld [vmem:[#allocation13 + $0x60] ss:$12 sps:$4 sm:$0xff]  }
 0x1f7   : > { %v821_v0 = vld [vmem:[%s820_s30] sm:$0x1]  ;;  %s853_s1 = sadd.s32 7, %s9452_s28  ;;  %s825_s24 = scalar_lea.vmem [#allocation5], %s824_s18  ;;  %1127 = vmatprep.subr.bf16.mxu0 %v7941_v37  ;;  %7491 = vmatprep.subr.bf16.mxu1 %v8883_v24  ;;  %v7952_v45 = vld [vmem:[#allocation13 + $0x68] ss:$12 sps:$4 sm:$0xff]  }
 0x1f8   : > { %822 = vst [vmem:[#allocation2] sm:$0x1] %v821_v0  ;;  %v826_v1 = vld [vmem:[%s825_s24] sm:$0x1]  ;;  %s854_s5 = sld [smem:[#allocation4 + %s853_s1]]  ;;  %s830_s0 = scalar_lea.vmem [#allocation5], %s829_s3 }
 0x1f9   : > { %827 = vst [vmem:[#allocation2 + $0x1] sm:$0x1] %v826_v1  ;;  %v831_v2 = vld [vmem:[%s830_s0] sm:$0x1]  ;;  %s858_s9 = sadd.s32 8, %s9452_s28  ;;  %s835_s22 = scalar_lea.vmem [#allocation5], %s834_s29 }
 0x1fa   : > { %832 = vst [vmem:[#allocation2 + $0x2] sm:$0x1] %v831_v2  ;;  %v836_v3 = vld [vmem:[%s835_s22] sm:$0x1]  ;;  %s859_s21 = sld [smem:[#allocation4 + %s858_s9]]  ;;  %s840_s20 = scalar_lea.vmem [#allocation5], %s839_s4  ;;  %1128 = vmatpush1.bf16.msra.mxu0 %v7943_v38  ;;  %7492 = vmatpush3.bf16.msra.mxu1 %v7944_v39 }
 0x1fb   : > { %837 = vst [vmem:[#allocation2 + $0x3] sm:$0x1] %v836_v3  ;;  %v841_v4 = vld [vmem:[%s840_s20] sm:$0x1]  ;;  %s863_s26 = sadd.s32 9, %s9452_s28  ;;  %s845_s2 = scalar_lea.vmem [#allocation5], %s844_s23  ;;  %7493 = vmatprep.subr.bf16.mxu1 %v8883_v24  ;;  %1129 = vmatprep.subr.bf16.mxu0 %v7945_v40 }
 0x1fc   : > { %842 = vst [vmem:[#allocation2 + $0x4] sm:$0x1] %v841_v4  ;;  %v846_v5 = vld [vmem:[%s845_s2] sm:$0x1]  ;;  %s864_s18 = sld [smem:[#allocation4 + %s863_s26]]  ;;  %s850_s3 = scalar_lea.vmem [#allocation5], %s849_s6 }
 0x1fd   : > { %847 = vst [vmem:[#allocation2 + $0x5] sm:$0x1] %v846_v5  ;;  %v851_v6 = vld [vmem:[%s850_s3] sm:$0x1]  ;;  %s868_s30 = sadd.s32 10, %s9452_s28  ;;  %s873_s1 = sadd.s32 11, %s9452_s28 }
 0x1fe   : > { %852 = vst [vmem:[#allocation2 + $0x6] sm:$0x1] %v851_v6  ;;  %s869_s29 = sld [smem:[#allocation4 + %s868_s30]]  ;;  %s855_s24 = scalar_lea.vmem [#allocation5], %s854_s5  ;;  %1130 = vmatpush1.bf16.msra.mxu0 %v7947_v41  ;;  %7494 = vmatpush3.bf16.msra.mxu1 %v7948_v42  ;;  %v7953_v46 = vld [vmem:[#allocation13 + $0x7c] ss:$12 sps:$4 sm:$0xff]  }
 0x1ff   : > { %v856_v7 = vld [vmem:[%s855_s24] sm:$0x1]  ;;  %s874_s4 = sld [smem:[#allocation4 + %s873_s1]]  ;;  %s878_s0 = sadd.s32 12, %s9452_s28  ;;  %7495 = vmatprep.subr.bf16.mxu1 %v8883_v24  ;;  %1131 = vmatprep.subr.bf16.mxu0 %v7949_v43  ;;  %v7955_v47 = vld [vmem:[#allocation13 + $0x78] ss:$12 sps:$4 sm:$0xff]  }
 0x200   : > { %857 = vst [vmem:[#allocation2 + $0x7] sm:$0x1] %v856_v7  ;;  %s879_s9 = sld [smem:[#allocation4 + %s878_s0]]  ;;  %s860_s22 = scalar_lea.vmem [#allocation5], %s859_s21  ;;  %v7956_v48 = vld [vmem:[#allocation13 + $0x80] ss:$12 sps:$4 sm:$0xff]  }
 0x201   : > { %v861_v8 = vld [vmem:[%s860_s22] sm:$0x1]  ;;  %s883_s23 = sadd.s32 13, %s9452_s28  ;;  %s888_s20 = sadd.s32 14, %s9452_s28  ;;  %v7957_v49 = vld [vmem:[#allocation13 + $0x94] ss:$12 sps:$4 sm:$0xff]  }
 0x202   : > { %862 = vst [vmem:[#allocation2 + $0x8] sm:$0x1] %v861_v8  ;;  %s884_s26 = sld [smem:[#allocation4 + %s883_s23]]  ;;  %s865_s6 = scalar_lea.vmem [#allocation5], %s864_s18  ;;  %1132 = vmatpush1.bf16.msra.mxu0 %v7951_v44  ;;  %7496 = vmatpush3.bf16.msra.mxu1 %v7952_v45  ;;  %v8884_v50 = vmov 0   ;;  %vm8885_vm0 = vmmov 0  }
 0x203   : > { %v866_v10 = vld [vmem:[%s865_s6] sm:$0x1]  ;;  %s889_s2 = sld [smem:[#allocation4 + %s888_s20]]  ;;  %s893_s3 = sadd.s32 15, %s9452_s28  ;;  %1133 = vmatprep.subr.bf16.mxu0 %v7953_v46  ;;  %7497 = vmatprep.subr.bf16.mxu1 %v8883_v24  ;;  %v7959_v51 = vld [vmem:[#allocation13 + $0x90] ss:$12 sps:$4 sm:$0xff]  }
 0x204   : > { %867 = vst [vmem:[#allocation2 + $0x9] sm:$0x1] %v866_v10  ;;  %s894_s30 = sld [smem:[#allocation4 + %s893_s3]]  ;;  %s870_s5 = scalar_lea.vmem [#allocation5], %s869_s29  ;;  %1155 = vmatprep.mubr.bf16.mxu0 %v8884_v50  ;;  %7503 = vmatprep.mubr.msk.bf16.mxu1 %vm8885_vm0, %v8883_v24  ;;  %v7960_v52 = vld [vmem:[#allocation13 + $0x98] ss:$12 sps:$4 sm:$0xff]  }
 0x205   : > { %v871_v11 = vld [vmem:[%s870_s5] sm:$0x1]  ;;  %s875_s1 = scalar_lea.vmem [#allocation5], %s874_s4  ;;  %v7963_v54 = vld [vmem:[#allocation13 + $0xa8] ss:$12 sps:$4 sm:$0xff]   ;;  %s10554_s0 = sld [smem:[#allocation59_spill]] }
 0x206   : > { %872 = vst [vmem:[#allocation2 + $0xa] sm:$0x1] %v871_v11  ;;  %v876_v12 = vld [vmem:[%s875_s1] sm:$0x1]  ;;  %s880_s21 = scalar_lea.vmem [#allocation5], %s879_s9  ;;  %1134 = vmatpush1.bf16.msra.mxu0 %v7955_v47  ;;  %7498 = vmatpush3.bf16.msra.mxu1 %v7956_v48  ;;  %s8886_s9 = smov 96  }
 0x207   : > { %v898_v13 = vld [vmem:[#allocation2] sm:$0xff]  ;;  %877 = vst [vmem:[#allocation2 + $0xb] sm:$0x1] %v876_v12  ;;  %v881_v14 = vld [vmem:[%s880_s21] sm:$0x1]  ;;  %1135 = vmatprep.subr.bf16.mxu0 %v7957_v49  ;;  %7499 = vmatprep.subr.bf16.mxu1 %v8883_v24  ;;  %s8887_s22 = smov 64  }
 0x208   : > { %v9470_v15 = vadd.f32 %v900_v9, %v898_v13  ;;  %882 = vst [vmem:[#allocation2 + $0xc] sm:$0x1] %v881_v14  ;;  %s885_s24 = scalar_lea.vmem [#allocation5], %s884_s26  ;;  %v7961_v53 = vld [vmem:[#allocation13 + $0xac] ss:$12 sps:$4 sm:$0xff]   ;;  %v980_v9 = vlaneseq  ;;  %s8888_s23 = smov 32  }
 0x209   : > { %v886_v16 = vld [vmem:[%s885_s24] sm:$0x1]  ;;  %s890_s28 = scalar_lea.vmem [#allocation5], %s889_s2  ;;  %v7964_v55 = vld [vmem:[#allocation13 + $0xb0] ss:$12 sps:$4 sm:$0xff]   ;;  %vm2095_vm1 = vcmask 261120  }
 0x20a   : > { %906 = vadd.xlane.f32.xlu0 %v9470_v15  ;;  %887 = vst [vmem:[#allocation2 + $0xd] sm:$0x1] %v886_v16  ;;  %v891_v17 = vld [vmem:[%s890_s28] sm:$0x1]  ;;  %s895_s18 = scalar_lea.vmem [#allocation5], %s894_s30  ;;  %1136 = vmatpush1.bf16.msra.mxu0 %v7959_v51  ;;  %v9505_v10 = vshrl.u32 %v980_v9, 7 }
 0x20b   : > { %892 = vst [vmem:[#allocation2 + $0xe] sm:$0x1] %v891_v17  ;;  %v896_v18 = vld [vmem:[%s895_s18] sm:$0x1]  ;;  %7500 = vmatpush3.bf16.msra.mxu1 %v7960_v52  ;;  %1137 = vmatprep.subr.bf16.mxu0 %v7961_v53  ;;  %v7049_v0 = vld [vmem:[#allocation10] ss:$0 sm:$0xff] }
 0x20c   : > { %897 = vst [vmem:[#allocation2 + $0xf] sm:$0x1] %v896_v18  ;;  %7501 = vmatprep.subr.bf16.mxu1 %v8883_v24  ;;  %v7050_v4 = vld [vmem:[#allocation11] ss:$0 sm:$0xff]  ;;  %v9508_v11 = vsub.s32 0, %v9505_v10  ;;  %v9516_v13 = vsub.s32 1, %v9505_v10 }
 0x20d   : > { %v9513_v12 = vld [vmem:[%s10554_s0] sm:$0x7]  ;;  %v8890_v35 = vmov 1934713408   ;;  %vm2292_vm2 = vcmask 130048   ;;  %vm2859_vm3 = vcmask 523264  }
 0x20e   : > { %1138 = vmatpush1.bf16.msra.mxu0 %v7963_v54  ;;  %v983_v14 = vrot.slane %v9513_v12, %v9508_v11  ;;  %v987_v16 = vrot.slane %v9513_v12, %v9516_v13  ;;  %v1262_v36 = vunpack.c.l.s4 %v8890_v35  ;;  %vm2862_vm4 = vcmask 785408   ;;  %s10555_s3 = sld [smem:[#allocation64_spill]]  ;;  %s10556_s6 = sld [smem:[#allocation44_spill]] }
 0x20f   : > { %7502 = vmatpush3.bf16.msra.mxu1 %v7964_v55  ;;  %7507 = vmatprep.subr.bf16.mxu0 %v8883_v24  ;;  %s10557_s5 = sld [smem:[#allocation62_spill]]  ;;  %s10558_s21 = sld [smem:[#allocation50_spill]] }
 0x210   : > { %7513 = vmatprep.subr.bf16.mxu1 %v8883_v24  ;;  %v1263_v40 = vunpack.c.0.s8 %v1262_v36  ;;  %s7321_s29 = sshll.u32 %s10535_s19, 8  ;;  %s8891_s19 = smov [#allocation31]  }
 0x212   : > { %v9554_v48 = vsub.s32 %v1263_v40, %v9505_v10 }
 0x213   : > { %v899_v20 = vld [vmem:[#allocation2 + $0x8] sm:$0xff] }
 0x214   : > { %v9473_v21 = vadd.f32 %v901_v19, %v899_v20  ;;  %s814_s1 = sand.u32 1, %s10556_s6   ;;  %s8759_s6 = sshll.u32 %s8891_s19, 4  ;;  %s8760_s6 = int_to_ptr.vmem [resolvable:$false] %s8759_s6 }
 0x215   : > { %s7047_s24 = sshll.u32 %s814_s1, 4  ;;  %s10392_s20 = scalar_lea.sflag [#allocation7], %s814_s1 }
 0x216   : > { %908 = vadd.xlane.f32.xlu0 %v9473_v21  ;;  %s816_s28 = scalar_lea.vmem [#allocation31], %s7047_s24  ;;  %p10560_p1 = scmp.ne.s32.totalorder %s10558_s21, 0 }
 0x217   : > { %s6791_s18 = sshll.u32 %s816_s28, 4  ;;  %s8761_s2 = scalar_lea.vmem %s8760_s6, 512  ;;  %s10385_s18 = int_to_ptr.vmem [resolvable:$true] %s6791_s18 }
 0x218   : > { %s8755_s26 = scalar_lea.vmem %s10385_s18, 256  ;;  %p8762_p6 = scmp.lt.s32.totalorder %s10385_s18, %s8760_s6 }
 0x219   : > { %p8756_p2 = scmp.ne.s32.totalorder %s10385_s18, %s8755_s26  ;;  %p8763_p7 = scmp.lt.s32.totalorder %s8761_s2, %s8755_s26 }
 0x21b   : > { %p8757_p4 = pnand %p8756_p2, %p10560_p1  ;;  %p8764_p10 = por %p8763_p7, %p8762_p6 }
 0x21d   : > { %p8758_p5 = pneg %p8757_p4 }
 0x21f   : > { %p8765_p11 = pnand %p8764_p10, %p8758_p5 }
 0x297   : > { %v907_v27 = vpop.xlane.xlu0 %906 }
 0x298   : > { %v911_v28 = vmul.f32 0.0078125, %v907_v27 }
 0x29a   : > { %v9479_v29 = vsub.f32 %v9470_v15, %v911_v28 }
 0x29c   : > { %v915_v30 = vmul.f32 %v9479_v29, %v9479_v29 }
 0x29e   : > { %917 = vadd.xlane.f32.xlu1 %v915_v30 }
 0x2a3   : > { %v909_v31 = vpop.xlane.xlu0 %908 }
 0x2a4   : > { %v912_v32 = vmul.f32 0.0078125, %v909_v31  ;;  %v8889_v31 = vmov 1983009808  }
 0x2a6   : > { %v9484_v33 = vsub.f32 %v9473_v21, %v912_v32  ;;  %v1230_v32 = vunpack.c.l.s4 %v8889_v31 }
 0x2a8   : > { %v916_v34 = vmul.f32 %v9484_v33, %v9484_v33  ;;  %v1231_v37 = vunpack.c.0.s8 %v1230_v32 }
 0x2aa   : > { %919 = vadd.xlane.f32.xlu1 %v916_v34  ;;  %v9551_v41 = vsub.s32 %v1231_v37, %v9505_v10 }
 0x32b   : > { %v918_v56 = vpop.xlane.xlu1 %917 }
 0x32c   : > { %v921_v57 = vmul.f32 0.0078125, %v918_v56 }
 0x32e   : > { %v923_v58 = vadd.f32 1e-05, %v921_v57 }
 0x330   : > { %8181 = vrsqrt.f32 %v923_v58 }
 0x337   : > { %v920_v59 = vpop.xlane.xlu1 %919 }
 0x338   : > { %v922_v60 = vmul.f32 0.0078125, %v920_v59 }
 0x33a   : > { %v924_v61 = vadd.f32 1e-05, %v922_v60  ;;  %v8182_v62 = vpop.eup %8181 }
 0x33b   : > { %v927_v63 = vmul.f32 %v8182_v62, %v9479_v29 }
 0x33c   : > { %8183 = vrsqrt.f32 %v924_v61 }
 0x33d   : > { %v935_v3 = vmul.f32 %v7049_v0, %v927_v63 }
 0x33f   : > { %v943_v6 = vadd.f32 %v7050_v4, %v935_v3 }
 0x346   : > { %v8184_v1 = vpop.eup %8183 }
 0x347   : > { %v928_v2 = vmul.f32 %v8184_v1, %v9484_v33 }
 0x349   : > { %v936_v5 = vmul.f32 %v7049_v0, %v928_v2 }
 0x34b   : > { %v944_v7 = vadd.f32 %v7050_v4, %v936_v5 }
 0x34d   : > { %v945_v8 = vpack.c.bf16 %v944_v7, %v943_v6 }
 0x34f   : > { %1156 = vmatmul.mubr.bf16.vlgmr.msra.gmra.mrb[0].mxu0 %v945_v8  ;;  %7504 = vmatmul.mubr.bf16.vlgmr.msra.gmra.mrb[0].mxu1 %v945_v8 }
 0x350   : > { %7509 = vmatprep.mubr.msk.bf16.mxu0 %vm8885_vm0, %v8883_v24  ;;  %7515 = vmatprep.mubr.msk.bf16.mxu1 %vm8885_vm0, %v8883_v24 }
 0x422   : > { %v1157_v17 = vpop.f32.mrb[0].mxu0  ;;  %v9522_v18 = vpop.f32.mrb[0].mxu1 }
 0x423   : > { %v9524_v19 = vadd.f32 %v1157_v17, %v983_v14  ;;  %v1159_v20 = vpop.f32.mrb[1].mxu0  ;;  %v7505_v22 = vpop.f32.mrb[1].mxu1 }
 0x424   : > { %v1160_v23 = vadd.f32 %v1159_v20, %v987_v16  ;;  %v1161_v25 = vpop.f32.mrb[2].mxu0  ;;  %v9526_v26 = vpop.f32.mrb[2].mxu1 }
 0x425   : > { %v1163_v27 = vpop.f32.mrb[3].mxu0  ;;  %v7506_v28 = vpop.f32.mrb[3].mxu1  ;;  %1209 = vrot.lane.b32.xlu0 %v9524_v19, %s8886_s9  ;;  %v9531_v29 = vadd.f32 %v1161_v25, %v983_v14 }
 0x426   : > { %1511 = vrot.lane.b32.xlu1 %v1160_v23, %s8887_s22  ;;  %v1164_v30 = vadd.f32 %v1163_v27, %v987_v16 }
 0x429   : > { %1505 = vrot.lane.b32.xlu0 %v1160_v23, %s8886_s9 }
 0x42a   : > { %1211 = vrot.lane.b32.xlu1 %v9531_v29, %s8886_s9 }
 0x42d   : > { %1517 = vrot.lane.b32.xlu0 %v1160_v23, %s8888_s23 }
 0x42e   : > { %1507 = vrot.lane.b32.xlu1 %v1164_v30, %s8886_s9 }
 0x431   : > { %1215 = vrot.lane.b32.xlu0 %v9524_v19, %s8887_s22 }
 0x432   : > { %1513 = vrot.lane.b32.xlu1 %v1164_v30, %s8887_s22 }
 0x435   : > { %1221 = vrot.lane.b32.xlu0 %v9524_v19, %s8888_s23 }
 0x436   : > { %1519 = vrot.lane.b32.xlu1 %v1164_v30, %s8888_s23 }
 0x43a   : > { %1217 = vrot.lane.b32.xlu1 %v9531_v29, %s8887_s22 }
 0x43e   : > { %1223 = vrot.lane.b32.xlu1 %v9531_v29, %s8888_s23 }
 0x497   : > { %v1210_v33 = vpop.permute.xlu0 %1209 }
 0x498   : > { %v1512_v34 = vpop.permute.xlu1 %1511 }
 0x499   : > { %v1523_v42 = vcombine.low %v1160_v23, %v1512_v34  ;;  %v1524_v43 = vcombine.high %v1160_v23, %v1512_v34 }
 0x49b   : > { %v1506_v38 = vpop.permute.xlu0 %1505  ;;  %v1531_v49 = vrot.slane %v1523_v42, %v9551_v41  ;;  %v1538_v51 = vrot.slane %v1524_v43, %v9551_v41 }
 0x49c   : > { %v9548_v39 = vpop.permute.xlu1 %1211 }
 0x49f   : > { %v1518_v44 = vpop.permute.xlu0 %1517 }
 0x4a0   : > { %v1539_v45 = vcombine.low %v1506_v38, %v1518_v44  ;;  %v1540_v46 = vcombine.high %v1506_v38, %v1518_v44  ;;  %v1508_v47 = vpop.permute.xlu1 %1507 }
 0x4a2   : > { %v1547_v52 = vrot.slane %v1539_v45, %v9551_v41  ;;  %v1554_v53 = vrot.slane %v1540_v46, %v9551_v41 }
 0x4a3   : > { %v1216_v54 = vpop.permute.xlu0 %1215 }
 0x4a4   : > { %v1555_v55 = vcombine.low %v1531_v49, %v1547_v52  ;;  %v1556_v56 = vcombine.high %v1531_v49, %v1547_v52  ;;  %v1571_v57 = vcombine.low %v1538_v51, %v1554_v53  ;;  %v1572_v58 = vcombine.high %v1538_v51, %v1554_v53  ;;  %v1514_v59 = vpop.permute.xlu1 %1513 }
 0x4a5   : > { %v1227_v60 = vcombine.low %v9524_v19, %v1216_v54  ;;  %v1228_v61 = vcombine.high %v9524_v19, %v1216_v54  ;;  %v1591_v62 = vcombine.low %v1164_v30, %v1514_v59  ;;  %v1592_v63 = vcombine.high %v1164_v30, %v1514_v59 }
 0x4a6   : > { %v1563_v0 = vrot.slane %v1555_v55, %v9554_v48  ;;  %v1570_v1 = vrot.slane %v1556_v56, %v9554_v48  ;;  %v1579_v2 = vrot.slane %v1571_v57, %v9554_v48  ;;  %v1586_v3 = vrot.slane %v1572_v58, %v9554_v48 }
 0x4a7   : > { %v1222_v4 = vpop.permute.xlu0 %1221  ;;  %v1235_v20 = vrot.slane %v1227_v60, %v9551_v41  ;;  %v1242_v22 = vrot.slane %v1228_v61, %v9551_v41  ;;  %v1599_v23 = vrot.slane %v1591_v62, %v9551_v41  ;;  %v1606_v25 = vrot.slane %v1592_v63, %v9551_v41 }
 0x4a8   : > { %v1659_v5 = vcombine.low %v1563_v0, %v1570_v1  ;;  %v7079_v6 = vcombine.high %v1563_v0, %v1570_v1  ;;  %v1675_v7 = vcombine.low %v1579_v2, %v1586_v3  ;;  %v7080_v8 = vcombine.high %v1579_v2, %v1586_v3  ;;  %v1520_v9 = vpop.permute.xlu1 %1519 }
 0x4a9   : > { %v1243_v14 = vcombine.low %v1210_v33, %v1222_v4  ;;  %v1244_v16 = vcombine.high %v1210_v33, %v1222_v4  ;;  %v1607_v17 = vcombine.low %v1508_v47, %v1520_v9  ;;  %v1608_v19 = vcombine.high %v1508_v47, %v1520_v9 }
 0x4aa   : > { %v9575_v32 = vrot.slane %v1659_v5, %v9551_v41  ;;  %v9578_v33 = vrot.slane %v7079_v6, %v9551_v41  ;;  %v9581_v34 = vrot.slane %v1675_v7, %v9551_v41  ;;  %v9584_v35 = vrot.slane %v7080_v8, %v9551_v41 }
 0x4ab   : > { %v1251_v27 = vrot.slane %v1243_v14, %v9551_v41  ;;  %v1258_v28 = vrot.slane %v1244_v16, %v9551_v41  ;;  %v1615_v30 = vrot.slane %v1607_v17, %v9551_v41  ;;  %v1622_v31 = vrot.slane %v1608_v19, %v9551_v41 }
 0x4ac   : > { %v1218_v42 = vpop.permute.xlu1 %1217  ;;  %v1691_v2 = vcombine.low %v9575_v32, %v9578_v33  ;;  %v1707_v3 = vcombine.low %v9581_v34, %v9584_v35  ;;  %v1692_v4 = vcombine.high %v9575_v32, %v9578_v33 }
 0x4ad   : > { %v1259_v36 = vcombine.low %v1235_v20, %v1251_v27  ;;  %v1260_v37 = vcombine.high %v1235_v20, %v1251_v27  ;;  %v1275_v38 = vcombine.low %v1242_v22, %v1258_v28  ;;  %v1276_v40 = vcombine.high %v1242_v22, %v1258_v28 }
 0x4ae   : > { %v1623_v43 = vcombine.low %v1599_v23, %v1615_v30  ;;  %v1624_v44 = vcombine.high %v1599_v23, %v1615_v30  ;;  %v1639_v45 = vcombine.low %v1606_v25, %v1622_v31  ;;  %v1640_v46 = vcombine.high %v1606_v25, %v1622_v31 }
 0x4af   : > { %v1267_v47 = vrot.slane %v1259_v36, %v9554_v48  ;;  %v1274_v49 = vrot.slane %v1260_v37, %v9554_v48  ;;  %v1283_v51 = vrot.slane %v1275_v38, %v9554_v48  ;;  %v1290_v52 = vrot.slane %v1276_v40, %v9554_v48 }
 0x4b0   : > { %v1631_v53 = vrot.slane %v1623_v43, %v9554_v48  ;;  %v1638_v54 = vrot.slane %v1624_v44, %v9554_v48  ;;  %v1647_v55 = vrot.slane %v1639_v45, %v9554_v48  ;;  %v1654_v56 = vrot.slane %v1640_v46, %v9554_v48  ;;  %v1224_v1 = vpop.permute.xlu1 %1223 }
 0x4b1   : > { %v1363_v61 = vcombine.low %v1267_v47, %v1274_v49  ;;  %v7075_v62 = vcombine.high %v1267_v47, %v1274_v49  ;;  %v1379_v63 = vcombine.low %v1283_v51, %v1290_v52  ;;  %v7076_v0 = vcombine.high %v1283_v51, %v1290_v52 }
 0x4b2   : > { %v1727_v57 = vcombine.low %v1631_v53, %v1638_v54  ;;  %v7081_v58 = vcombine.high %v1631_v53, %v1638_v54  ;;  %v1743_v59 = vcombine.low %v1647_v55, %v1654_v56  ;;  %v7082_v60 = vcombine.high %v1647_v55, %v1654_v56 }
 0x4b3   : > { %v1295_v9 = vcombine.low %v9531_v29, %v1218_v42  ;;  %v1296_v14 = vcombine.high %v9531_v29, %v1218_v42  ;;  %v1311_v16 = vcombine.low %v9548_v39, %v1224_v1  ;;  %v1312_v17 = vcombine.high %v9548_v39, %v1224_v1 }
 0x4b4   : > { %v1734_v5 = vrot.slane %v1727_v57, %v9551_v41  ;;  %v1742_v6 = vrot.slane %v7081_v58, %v9551_v41  ;;  %v9603_v7 = vrot.slane %v1743_v59, %v9551_v41  ;;  %v9606_v8 = vrot.slane %v7082_v60, %v9551_v41 }
 0x4b5   : > { %v9613_v19 = vrot.slane %v1363_v61, %v9551_v41  ;;  %v9616_v20 = vrot.slane %v7075_v62, %v9551_v41  ;;  %v9619_v22 = vrot.slane %v1379_v63, %v9551_v41  ;;  %v9622_v23 = vrot.slane %v7076_v0, %v9551_v41 }
 0x4b6   : > { %v1303_v25 = vrot.slane %v1295_v9, %v9551_v41  ;;  %v1310_v29 = vrot.slane %v1296_v14, %v9551_v41  ;;  %v1319_v27 = vrot.slane %v1311_v16, %v9551_v41  ;;  %v1326_v39 = vrot.slane %v1312_v17, %v9551_v41 }
 0x4b7   : > { %v1699_v28 = vrot.slane %v1691_v2, %v9554_v48  ;;  %v1715_v30 = vrot.slane %v1707_v3, %v9554_v48  ;;  %v1759_v31 = vcombine.low %v1734_v5, %v1742_v6  ;;  %v1775_v32 = vcombine.low %v9603_v7, %v9606_v8 }
 0x4b8   : > { %v1327_v33 = vcombine.low %v1303_v25, %v1319_v27  ;;  %v1328_v36 = vcombine.high %v1303_v25, %v1319_v27  ;;  %v1343_v37 = vcombine.low %v1310_v29, %v1326_v39  ;;  %v1344_v38 = vcombine.high %v1310_v29, %v1326_v39 }
 0x4b9   : > { %v1395_v40 = vcombine.low %v9613_v19, %v9616_v20  ;;  %v1411_v42 = vcombine.low %v9619_v22, %v9622_v23  ;;  %v1767_v43 = vrot.slane %v1759_v31, %v9554_v48  ;;  %v1783_v44 = vrot.slane %v1775_v32, %v9554_v48 }
 0x4ba   : > { %v1335_v45 = vrot.slane %v1327_v33, %v9554_v48  ;;  %v1342_v46 = vrot.slane %v1328_v36, %v9554_v48  ;;  %v1351_v47 = vrot.slane %v1343_v37, %v9554_v48  ;;  %v1358_v49 = vrot.slane %v1344_v38, %v9554_v48 }
 0x4bb   : > { %v1723_v51 = vcombine.low %v1699_v28, %v1715_v30  ;;  %v1791_v52 = vcombine.low %v1767_v43, %v1783_v44  ;;  %v1724_v53 = vcombine.high %v1699_v28, %v1715_v30  ;;  %v1792_v54 = vcombine.high %v1767_v43, %v1783_v44 }
 0x4bc   : > { %v1431_v55 = vcombine.low %v1335_v45, %v1342_v46  ;;  %v7077_v56 = vcombine.high %v1335_v45, %v1342_v46  ;;  %v1447_v57 = vcombine.low %v1351_v47, %v1358_v49  ;;  %v7078_v58 = vcombine.high %v1351_v47, %v1358_v49 }
 0x4bd   : > { %v1795_v59 = vpack.c.bf16 %v1791_v52, %v1723_v51  ;;  %v1796_v60 = vpack.c.bf16 %v1792_v54, %v1724_v53  ;;  %v1708_v61 = vcombine.high %v9581_v34, %v9584_v35  ;;  %v1403_v2 = vrot.slane %v1395_v40, %v9554_v48 }
 0x4be   : > { %v1438_v62 = vrot.slane %v1431_v55, %v9551_v41  ;;  %v1446_v63 = vrot.slane %v7077_v56, %v9551_v41  ;;  %v1454_v0 = vrot.slane %v1447_v57, %v9551_v41  ;;  %v1462_v1 = vrot.slane %v7078_v58, %v9551_v41 }
 0x4bf   : > { %v2100_v3 = vsel %vm2095_vm1, %v1795_v59, 0  ;;  %v2147_v9 = vsel %vm2095_vm1, %v1796_v60, 0  ;;  %v1760_v14 = vcombine.high %v1734_v5, %v1742_v6  ;;  %v1419_v16 = vrot.slane %v1411_v42, %v9554_v48 }
 0x4c0   : > { %v1463_v17 = vcombine.low %v1438_v62, %v1446_v63  ;;  %v1479_v25 = vcombine.low %v1454_v0, %v1462_v1  ;;  %7508 = vmatpush3.bf16.xpose.msra.mxu0 %v2100_v3  ;;  %v1706_v34 = vrot.slane %v1692_v4, %v9554_v48  ;;  %7514 = vmatpush3.bf16.xpose.msra.mxu1 %v2147_v9 }
 0x4c1   : > { %7519 = vmatprep.subr.bf16.mxu0 %v8883_v24  ;;  %v1722_v35 = vrot.slane %v1708_v61, %v9554_v48  ;;  %v1774_v29 = vrot.slane %v1760_v14, %v9554_v48  ;;  %v1776_v27 = vcombine.high %v9603_v7, %v9606_v8  ;;  %v1396_v5 = vcombine.high %v9613_v19, %v9616_v20 }
 0x4c2   : > { %v1471_v6 = vrot.slane %v1463_v17, %v9554_v48  ;;  %v1487_v39 = vrot.slane %v1479_v25, %v9554_v48  ;;  %7525 = vmatprep.subr.bf16.mxu1 %v8883_v24  ;;  %v1412_v4 = vcombine.high %v9619_v22, %v9622_v23  ;;  %v1464_v28 = vcombine.high %v1438_v62, %v1446_v63 }
 0x4c3   : > { %v1480_v30 = vcombine.high %v1454_v0, %v1462_v1  ;;  %v1790_v31 = vrot.slane %v1776_v27, %v9554_v48  ;;  %v1427_v32 = vcombine.low %v1403_v2, %v1419_v16  ;;  %v1428_v36 = vcombine.high %v1403_v2, %v1419_v16 }
 0x4c4   : > { %v1495_v33 = vcombine.low %v1471_v6, %v1487_v39  ;;  %v1496_v7 = vcombine.high %v1471_v6, %v1487_v39  ;;  %v1725_v8 = vcombine.low %v1706_v34, %v1722_v35  ;;  %v1726_v19 = vcombine.high %v1706_v34, %v1722_v35 }
 0x4c5   : > { %v1793_v37 = vcombine.low %v1774_v29, %v1790_v31  ;;  %v1794_v20 = vcombine.high %v1774_v29, %v1790_v31  ;;  %v1478_v42 = vrot.slane %v1464_v28, %v9554_v48  ;;  %v1494_v43 = vrot.slane %v1480_v30, %v9554_v48 }
 0x4c6   : > { %v1499_v38 = vpack.c.bf16 %v1495_v33, %v1427_v32  ;;  %v1500_v40 = vpack.c.bf16 %v1496_v7, %v1428_v36  ;;  %v1410_v23 = vrot.slane %v1396_v5, %v9554_v48  ;;  %v1426_v45 = vrot.slane %v1412_v4, %v9554_v48 }
 0x4c7   : > { %v1797_v44 = vpack.c.bf16 %v1793_v37, %v1725_v8  ;;  %v1798_v22 = vpack.c.bf16 %v1794_v20, %v1726_v19  ;;  %v1497_v49 = vcombine.low %v1478_v42, %v1494_v43  ;;  %v1498_v51 = vcombine.high %v1478_v42, %v1494_v43 }
 0x4c8   : > { %7510 = vmatmul.mubr.msk.bf16.vlgmr.msra.gmra.mrb[4].mxu0 %vm2095_vm1, %v1499_v38  ;;  %7516 = vmatmul.mubr.msk.bf16.vlgmr.msra.gmra.mrb[4].mxu1 %vm2095_vm1, %v1500_v40  ;;  %v1429_v52 = vcombine.low %v1410_v23, %v1426_v45  ;;  %v1430_v53 = vcombine.high %v1410_v23, %v1426_v45  ;;  %v9691_v28 = vsub.s32 2, %v9505_v10 }
 0x4c9   : > { %v2194_v46 = vsel %vm2095_vm1, %v1797_v44, 0  ;;  %v2241_v47 = vsel %vm2095_vm1, %v1798_v22, 0  ;;  %7521 = vmatprep.mubr.msk.bf16.mxu0 %vm8885_vm0, %v8883_v24  ;;  %7527 = vmatprep.mubr.msk.bf16.mxu1 %vm8885_vm0, %v8883_v24 }
 0x4ca   : > { %7520 = vmatpush3.bf16.xpose.msra.mxu0 %v2194_v46  ;;  %7526 = vmatpush3.bf16.xpose.msra.mxu1 %v2241_v47  ;;  %v1501_v54 = vpack.c.bf16 %v1497_v49, %v1429_v52  ;;  %v1502_v55 = vpack.c.bf16 %v1498_v51, %v1430_v53  ;;  %v991_v32 = vrot.slane %v9513_v12, %v9691_v28 }
 0x4cb   : > { %7531 = vmatprep.subr.bf16.mxu0 %v8883_v24  ;;  %7537 = vmatprep.subr.bf16.mxu1 %v8883_v24 }
 0x4cc   : > { %v9698_v36 = vadd.f32 %v9526_v26, %v991_v32  ;;  %v9703_v7 = vadd.f32 %v9522_v18, %v991_v32 }
 0x4d1   : > { %7522 = vmatmul.mubr.msk.bf16.vlgmr.msra.gmra.mrb[8].mxu0 %vm2095_vm1, %v1501_v54  ;;  %7528 = vmatmul.mubr.msk.bf16.vlgmr.msra.gmra.mrb[8].mxu1 %vm2095_vm1, %v1502_v55 }
 0x4d2   : > { %7533 = vmatprep.mubr.msk.bf16.mxu0 %vm8885_vm0, %v8883_v24  ;;  %7539 = vmatprep.mubr.msk.bf16.mxu1 %vm8885_vm0, %v8883_v24 }
 0x59b   : > { %v2136_v56 = vpop.f32.mrb[4].mxu0  ;;  %v2183_v57 = vpop.f32.mrb[4].mxu1 }
 0x59c   : > { %v2284_v58 = vmul.f32 0.17677669, %v2136_v56  ;;  %v7511_v59 = vpop.f32.mrb[5].mxu0  ;;  %v7517_v60 = vpop.f32.mrb[5].mxu1  ;;  %v2286_v2 = vmul.f32 0.17677669, %v2183_v57 }
 0x59d   : > { %v2139_v61 = vpop.f32.mrb[6].mxu0  ;;  %v2186_v62 = vpop.f32.mrb[6].mxu1 }
 0x59e   : > { %v2285_v63 = vmul.f32 0.17677669, %v2139_v61  ;;  %v7512_v0 = vpop.f32.mrb[7].mxu0  ;;  %v7518_v1 = vpop.f32.mrb[7].mxu1  ;;  %v2293_v3 = vsel %vm2292_vm2, %v2284_v58, -inf  ;;  %v2299_v16 = vsel %vm2292_vm2, %v2286_v2, -inf }
 0x59f   : > { %2294 = vmax.xlane.f32.xlu0 %v2293_v3  ;;  %v2287_v14 = vmul.f32 0.17677669, %v2186_v62 }
 0x5a0   : > { %v2296_v9 = vsel %vm2292_vm2, %v2285_v63, -inf }
 0x5a1   : > { %2297 = vmax.xlane.f32.xlu1 %v2296_v9  ;;  %v2302_v4 = vsel %vm2292_vm2, %v2287_v14, -inf }
 0x5a3   : > { %2300 = vmax.xlane.f32.xlu0 %v2299_v16 }
 0x5a4   : > { %v2277_v17 = vpop.f32.mrb[8].mxu1  ;;  %v2230_v25 = vpop.f32.mrb[8].mxu0 }
 0x5a5   : > { %v7523_v34 = vpop.f32.mrb[9].mxu0  ;;  %v7529_v35 = vpop.f32.mrb[9].mxu1  ;;  %v2288_v5 = vmul.f32 0.17677669, %v2230_v25  ;;  %v2290_v30 = vmul.f32 0.17677669, %v2277_v17 }
 0x5a6   : > { %v2233_v29 = vpop.f32.mrb[10].mxu0  ;;  %v2280_v27 = vpop.f32.mrb[10].mxu1 }
 0x5a7   : > { %v7524_v6 = vpop.f32.mrb[11].mxu0  ;;  %v7530_v39 = vpop.f32.mrb[11].mxu1  ;;  %2303 = vmax.xlane.f32.xlu0 %v2302_v4  ;;  %v2305_v31 = vsel %vm2292_vm2, %v2288_v5, -inf  ;;  %v2311_v33 = vsel %vm2292_vm2, %v2290_v30, -inf  ;;  %v2289_v12 = vmul.f32 0.17677669, %v2233_v29 }
 0x5a8   : > { %v2291_v8 = vmul.f32 0.17677669, %v2280_v27 }
 0x5a9   : > { %v2308_v26 = vsel %vm2292_vm2, %v2289_v12, -inf }
 0x5aa   : > { %v2314_v37 = vsel %vm2292_vm2, %v2291_v8, -inf }
 0x5ab   : > { %2306 = vmax.xlane.f32.xlu0 %v2305_v31 }
 0x5af   : > { %2312 = vmax.xlane.f32.xlu0 %v2311_v33 }
 0x5b2   : > { %1803 = vrot.lane.b32.xlu1 %v9698_v36, %s8886_s9 }
 0x5b6   : > { %1807 = vrot.lane.b32.xlu1 %v9703_v7, %s8887_s22 }
 0x5c5   : > { %1801 = vrot.lane.b32.xlu0 %v9703_v7, %s8886_s9 }
 0x5c9   : > { %1813 = vrot.lane.b32.xlu0 %v9703_v7, %s8888_s23 }
 0x5da   : > { %2309 = vmax.xlane.f32.xlu1 %v2308_v26 }
 0x5de   : > { %2315 = vmax.xlane.f32.xlu1 %v2314_v37 }
 0x5ef   : > { %1809 = vrot.lane.b32.xlu1 %v9698_v36, %s8887_s22 }
 0x62c   : > { %v2295_v18 = vpop.xlane.xlu0 %2294 }
 0x62d   : > { %v2317_v19 = vsub.f32 %v2284_v58, %v2295_v18 }
 0x62e   : > { %v2298_v20 = vpop.xlane.xlu1 %2297 }
 0x62f   : > { %v2318_v38 = vsub.f32 %v2285_v63, %v2298_v20  ;;  %v2325_v40 = vmul.f32 1.442695, %v2317_v19 }
 0x630   : > { %v2301_v43 = vpop.xlane.xlu0 %2300 }
 0x631   : > { %v2327_v42 = vmul.f32 1.442695, %v2318_v38  ;;  %8185 = vpow2.f32 %v2325_v40  ;;  %v2319_v44 = vsub.f32 %v2286_v2, %v2301_v43 }
 0x632   : > { %v1804_v3 = vpop.permute.xlu1 %1803 }
 0x633   : > { %8187 = vpow2.f32 %v2327_v42  ;;  %v2329_v22 = vmul.f32 1.442695, %v2319_v44 }
 0x634   : > { %v2304_v23 = vpop.xlane.xlu0 %2303 }
 0x635   : > { %8189 = vpow2.f32 %v2329_v22  ;;  %v2320_v45 = vsub.f32 %v2287_v14, %v2304_v23 }
 0x636   : > { %v1808_v9 = vpop.permute.xlu1 %1807 }
 0x637   : > { %v2331_v46 = vmul.f32 1.442695, %v2320_v45  ;;  %v1819_v31 = vcombine.low %v9703_v7, %v1808_v9  ;;  %v1820_v33 = vcombine.high %v9703_v7, %v1808_v9 }
 0x638   : > { %v2307_v47 = vpop.xlane.xlu0 %2306 }
 0x639   : > { %8191 = vpow2.f32 %v2331_v46  ;;  %v2321_v49 = vsub.f32 %v2288_v5, %v2307_v47  ;;  %v1834_v18 = vrot.slane %v1820_v33, %v9551_v41 }
 0x63b   : > { %v9715_v51 = vpop.eup %8185  ;;  %v2333_v52 = vmul.f32 1.442695, %v2321_v49 }
 0x63c   : > { %v2313_v54 = vpop.xlane.xlu0 %2312  ;;  %v2341_v55 = vsel %vm2292_vm2, %v9715_v51, 0.0 }
 0x63d   : > { %v9717_v53 = vpop.eup %8187  ;;  %8193 = vpow2.f32 %v2333_v52  ;;  %v2323_v56 = vsub.f32 %v2290_v30, %v2313_v54  ;;  %2342 = vadd.xlane.f32.xlu0 %v2341_v55 }
 0x63e   : > { %v2344_v57 = vsel %vm2292_vm2, %v9717_v53, 0.0 }
 0x63f   : > { %2345 = vadd.xlane.f32.xlu1 %v2344_v57  ;;  %v9723_v58 = vpop.eup %8189  ;;  %v2337_v59 = vmul.f32 1.442695, %v2323_v56 }
 0x640   : > { %v2347_v60 = vsel %vm2292_vm2, %v9723_v58, 0.0  ;;  %v1802_v39 = vpop.permute.xlu0 %1801 }
 0x641   : > { %8195 = vpow2.f32 %v2337_v59  ;;  %2348 = vadd.xlane.f32.xlu0 %v2347_v60 }
 0x643   : > { %v9727_v61 = vpop.eup %8191 }
 0x644   : > { %v2350_v62 = vsel %vm2292_vm2, %v9727_v61, 0.0  ;;  %v1814_v4 = vpop.permute.xlu0 %1813 }
 0x645   : > { %2351 = vadd.xlane.f32.xlu1 %v2350_v62  ;;  %v1835_v30 = vcombine.low %v1802_v39, %v1814_v4  ;;  %v1836_v32 = vcombine.high %v1802_v39, %v1814_v4 }
 0x647   : > { %v9731_v63 = vpop.eup %8193  ;;  %v1850_v26 = vrot.slane %v1836_v32, %v9551_v41 }
 0x648   : > { %v2353_v0 = vsel %vm2292_vm2, %v9731_v63, 0.0 }
 0x649   : > { %2354 = vadd.xlane.f32.xlu0 %v2353_v0  ;;  %v1867_v38 = vcombine.low %v1834_v18, %v1850_v26  ;;  %v1868_v40 = vcombine.high %v1834_v18, %v1850_v26 }
 0x64b   : > { %v9735_v1 = vpop.eup %8195  ;;  %v1875_v7 = vrot.slane %v1867_v38, %v9554_v48  ;;  %v1882_v22 = vrot.slane %v1868_v40, %v9554_v48 }
 0x64c   : > { %v2359_v2 = vsel %vm2292_vm2, %v9735_v1, 0.0 }
 0x64d   : > { %2360 = vadd.xlane.f32.xlu0 %v2359_v2  ;;  %v1971_v54 = vcombine.low %v1875_v7, %v1882_v22  ;;  %v7084_v55 = vcombine.high %v1875_v7, %v1882_v22 }
 0x656   : > { %1815 = vrot.lane.b32.xlu1 %v9698_v36, %s8888_s23 }
 0x667   : > { %v2310_v14 = vpop.xlane.xlu1 %2309 }
 0x668   : > { %v2322_v16 = vsub.f32 %v2289_v12, %v2310_v14  ;;  %v1843_v12 = vrot.slane %v1835_v30, %v9551_v41 }
 0x66a   : > { %v2335_v17 = vmul.f32 1.442695, %v2322_v16  ;;  %v1978_v16 = vrot.slane %v1971_v54, %v9551_v41 }
 0x66b   : > { %v2316_v25 = vpop.xlane.xlu1 %2315 }
 0x66c   : > { %v2324_v34 = vsub.f32 %v2291_v8, %v2316_v25  ;;  %8197 = vpow2.f32 %v2335_v17  ;;  %v1827_v8 = vrot.slane %v1819_v31, %v9551_v41  ;;  %v1986_v17 = vrot.slane %v7084_v55, %v9551_v41 }
 0x66e   : > { %v2339_v35 = vmul.f32 1.442695, %v2324_v34  ;;  %v1851_v19 = vcombine.low %v1827_v8, %v1843_v12  ;;  %v1852_v20 = vcombine.high %v1827_v8, %v1843_v12  ;;  %v2003_v31 = vcombine.low %v1978_v16, %v1986_v17 }
 0x66f   : > { %v1810_v37 = vpop.permute.xlu1 %1809 }
 0x670   : > { %8199 = vpow2.f32 %v2339_v35  ;;  %v1859_v43 = vrot.slane %v1851_v19, %v9554_v48  ;;  %v1866_v44 = vrot.slane %v1852_v20, %v9554_v48  ;;  %v1887_v47 = vcombine.low %v9698_v36, %v1810_v37 }
 0x671   : > { %v1888_v49 = vcombine.high %v9698_v36, %v1810_v37  ;;  %v2011_v40 = vrot.slane %v2003_v31, %v9554_v48 }
 0x672   : > { %v1955_v46 = vcombine.low %v1859_v43, %v1866_v44  ;;  %v7083_v52 = vcombine.high %v1859_v43, %v1866_v44  ;;  %v1895_v62 = vrot.slane %v1887_v47, %v9551_v41  ;;  %v2004_v43 = vcombine.high %v1978_v16, %v1986_v17 }
 0x673   : > { %v1902_v0 = vrot.slane %v1888_v49, %v9551_v41 }
 0x674   : > { %v1962_v60 = vrot.slane %v1955_v46, %v9551_v41  ;;  %v1970_v36 = vrot.slane %v7083_v52, %v9551_v41 }
 0x676   : > { %v9741_v29 = vpop.eup %8197  ;;  %v1987_v30 = vcombine.low %v1962_v60, %v1970_v36 }
 0x677   : > { %v2356_v5 = vsel %vm2292_vm2, %v9741_v29, 0.0 }
 0x678   : > { %v1995_v38 = vrot.slane %v1987_v30, %v9554_v48 }
 0x67a   : > { %v9743_v27 = vpop.eup %8199  ;;  %2357 = vadd.xlane.f32.xlu1 %v2356_v5 }
 0x67b   : > { %v2362_v6 = vsel %vm2292_vm2, %v9743_v27, 0.0 }
 0x67c   : > { %2363 = vadd.xlane.f32.xlu0 %v2362_v6 }
 0x6ca   : > { %v2343_v45 = vpop.xlane.xlu0 %2342 }
 0x6cb   : > { %8201 = vrcp.f32 %v2343_v45 }
 0x6cc   : > { %v2346_v42 = vpop.xlane.xlu1 %2345 }
 0x6cd   : > { %8203 = vrcp.f32 %v2346_v42  ;;  %v1988_v42 = vcombine.high %v1962_v60, %v1970_v36 }
 0x6ce   : > { %v2349_v2 = vpop.xlane.xlu0 %2348 }
 0x6d2   : > { %v2352_v23 = vpop.xlane.xlu1 %2351 }
 0x6d3   : > { %8205 = vrcp.f32 %v2352_v23 }
 0x6d4   : > { %8207 = vrcp.f32 %v2349_v2 }
 0x6d5   : > { %v8202_v20 = vpop.eup %8201 }
 0x6d6   : > { %v1816_v56 = vpop.permute.xlu1 %1815 }
 0x6d7   : > { %v1903_v57 = vcombine.low %v1804_v3, %v1816_v56  ;;  %v1904_v59 = vcombine.high %v1804_v3, %v1816_v56  ;;  %v8204_v44 = vpop.eup %8203  ;;  %v2002_v56 = vrot.slane %v1988_v42, %v9554_v48 }
 0x6d8   : > { %v2374_v2 = vmul.f32 %v8204_v44, %v9717_v53 }
 0x6d9   : > { %v1911_v9 = vrot.slane %v1903_v57, %v9551_v41  ;;  %v1918_v14 = vrot.slane %v1904_v59, %v9551_v41  ;;  %v2018_v57 = vrot.slane %v2004_v43, %v9554_v48  ;;  %v2019_v59 = vcombine.low %v1995_v38, %v2011_v40 }
 0x6db   : > { %v1919_v3 = vcombine.low %v1895_v62, %v1911_v9  ;;  %v1920_v25 = vcombine.high %v1895_v62, %v1911_v9  ;;  %v1935_v34 = vcombine.low %v1902_v0, %v1918_v14  ;;  %v1936_v35 = vcombine.high %v1902_v0, %v1918_v14 }
 0x6dc   : > { %v2020_v62 = vcombine.high %v1995_v38, %v2011_v40  ;;  %v7970_v38 = vld [vmem:[#allocation14 + $0x28] sm:$0xff]  }
 0x6dd   : > { %v1927_v5 = vrot.slane %v1919_v3, %v9554_v48  ;;  %v1934_v6 = vrot.slane %v1920_v25, %v9554_v48  ;;  %v1943_v39 = vrot.slane %v1935_v34, %v9554_v48  ;;  %v1950_v4 = vrot.slane %v1936_v35, %v9554_v48  ;;  %v8206_v46 = vpop.eup %8205 }
 0x6de   : > { %v8208_v55 = vpop.eup %8207  ;;  %v2376_v9 = vmul.f32 %v8206_v46, %v9727_v61  ;;  %v2373_v3 = vmul.f32 %v8202_v20, %v9715_v51  ;;  %v2021_v34 = vcombine.low %v2002_v56, %v2018_v57  ;;  %v2022_v35 = vcombine.high %v2002_v56, %v2018_v57  ;;  %v2355_v51 = vpop.xlane.xlu0 %2354  ;;  %v7965_v20 = vld [vmem:[#allocation14] sm:$0xff]  }
 0x6df   : > { %v2023_v32 = vcombine.low %v1927_v5, %v1934_v6  ;;  %v7085_v33 = vcombine.high %v1927_v5, %v1934_v6  ;;  %v2039_v12 = vcombine.low %v1943_v39, %v1950_v4  ;;  %v7086_v8 = vcombine.high %v1943_v39, %v1950_v4 }
 0x6e0   : > { %v2375_v25 = vmul.f32 %v8208_v55, %v9723_v58  ;;  %v2381_v5 = vpack.c.bf16 %v2374_v2, %v2373_v3  ;;  %8209 = vrcp.f32 %v2355_v51 }
 0x6e1   : > { %v2030_v26 = vrot.slane %v2023_v32, %v9551_v41  ;;  %v2038_v37 = vrot.slane %v7085_v33, %v9551_v41  ;;  %v2046_v18 = vrot.slane %v2039_v12, %v9551_v41  ;;  %v2054_v19 = vrot.slane %v7086_v8, %v9551_v41 }
 0x6e2   : > { %v2382_v6 = vpack.c.bf16 %v2376_v9, %v2375_v25  ;;  %v2361_v58 = vpop.xlane.xlu0 %2360 }
 0x6e3   : > { %v2055_v7 = vcombine.low %v2030_v26, %v2038_v37  ;;  %v2071_v22 = vcombine.low %v2046_v18, %v2054_v19  ;;  %v2056_v23 = vcombine.high %v2030_v26, %v2038_v37  ;;  %v2072_v45 = vcombine.high %v2046_v18, %v2054_v19 }
 0x6e4   : > { %8211 = vrcp.f32 %v2361_v58 }
 0x6e5   : > { %v2063_v47 = vrot.slane %v2055_v7, %v9554_v48  ;;  %v2079_v49 = vrot.slane %v2071_v22, %v9554_v48  ;;  %v2070_v52 = vrot.slane %v2056_v23, %v9554_v48  ;;  %v2086_v54 = vrot.slane %v2072_v45, %v9554_v48 }
 0x6e7   : > { %v2087_v60 = vcombine.low %v2063_v47, %v2079_v49  ;;  %v2088_v0 = vcombine.high %v2063_v47, %v2079_v49  ;;  %v2089_v16 = vcombine.low %v2070_v52, %v2086_v54  ;;  %v2090_v17 = vcombine.high %v2070_v52, %v2086_v54 }
 0x6e9   : > { %v2091_v14 = vpack.c.bf16 %v2087_v60, %v2019_v59  ;;  %v2092_v36 = vpack.c.bf16 %v2088_v0, %v2020_v62  ;;  %v2093_v53 = vpack.c.bf16 %v2089_v16, %v2021_v34  ;;  %v2094_v61 = vpack.c.bf16 %v2090_v17, %v2022_v35 }
 0x6ea   : > { %v8210_v30 = vpop.eup %8209 }
 0x6eb   : > { %7532 = vmatpush3.bf16.msra.mxu0 %v2091_v14  ;;  %7538 = vmatpush3.bf16.msra.mxu1 %v2092_v36  ;;  %v2377_v12 = vmul.f32 %v8210_v30, %v9731_v63  ;;  %v7966_v63 = vld [vmem:[#allocation14 + $0x8] sm:$0xff]  }
 0x6ec   : > { %7543 = vmatprep.subr.bf16.mxu0 %v8883_v24  ;;  %7549 = vmatprep.subr.bf16.mxu1 %v8883_v24 }
 0x6ee   : > { %7534 = vmatmul.mubr.msk.bf16.vlgmr.msra.gmra.mrb[12].mxu0 %vm2292_vm2, %v2381_v5  ;;  %7540 = vmatmul.mubr.msk.bf16.vlgmr.msra.gmra.mrb[12].mxu1 %vm2292_vm2, %v2382_v6  ;;  %v8212_v31 = vpop.eup %8211 }
 0x6ef   : > { %7544 = vmatpush3.bf16.msra.mxu0 %v2093_v53  ;;  %7550 = vmatpush3.bf16.msra.mxu1 %v2094_v61  ;;  %v2379_v26 = vmul.f32 %v8212_v31, %v9735_v1  ;;  %v7967_v1 = vld [vmem:[#allocation14 + $0x10] sm:$0xff]  }
 0x6f0   : > { %7545 = vmatprep.mubr.msk.bf16.mxu0 %vm8885_vm0, %v8883_v24  ;;  %7551 = vmatprep.mubr.msk.bf16.mxu1 %vm8885_vm0, %v8883_v24 }
 0x6f1   : > { %7555 = vmatprep.subr.bf16.mxu0 %v8883_v24 }
 0x707   : > { %v2358_v39 = vpop.xlane.xlu1 %2357 }
 0x708   : > { %8213 = vrcp.f32 %v2358_v39 }
 0x709   : > { %v2364_v4 = vpop.xlane.xlu0 %2363 }
 0x70a   : > { %8215 = vrcp.f32 %v2364_v4 }
 0x712   : > { %v8214_v32 = vpop.eup %8213 }
 0x713   : > { %v2378_v8 = vmul.f32 %v8214_v32, %v9741_v29  ;;  %v7968_v29 = vld [vmem:[#allocation14 + $0x18] sm:$0xff]  }
 0x714   : > { %v8216_v33 = vpop.eup %8215 }
 0x715   : > { %v2380_v37 = vmul.f32 %v8216_v33, %v9743_v27  ;;  %v2383_v18 = vpack.c.bf16 %v2378_v8, %v2377_v12  ;;  %v7969_v27 = vld [vmem:[#allocation14 + $0x20] sm:$0xff]  }
 0x717   : > { %v2384_v19 = vpack.c.bf16 %v2380_v37, %v2379_v26  ;;  %7546 = vmatmul.mubr.msk.bf16.vlgmr.msra.gmra.mrb[16].mxu0 %vm2292_vm2, %v2383_v18 }
 0x718   : > { %7571 = vmatprep.mubr.msk.bf16.mxu0 %vm8885_vm0, %v8883_v24  ;;  %7556 = vmatpush3.bf16.msra.mxu0 %v7965_v20 }
 0x719   : > { %7552 = vmatmul.mubr.msk.bf16.vlgmr.msra.gmra.mrb[16].mxu1 %vm2292_vm2, %v2384_v19  ;;  %7557 = vmatprep.subr.bf16.mxu0 %v8883_v24 }
 0x71a   : > { %3276 = vmatprep.mubr.bf16.mxu1 %v8884_v50 }
 0x71c   : > { %7558 = vmatpush3.bf16.msra.mxu0 %v7966_v63 }
 0x71d   : > { %7559 = vmatprep.subr.bf16.mxu0 %v8883_v24 }
 0x720   : > { %7560 = vmatpush3.bf16.msra.mxu0 %v7967_v1 }
 0x721   : > { %7561 = vmatprep.subr.bf16.mxu0 %v8883_v24 }
 0x724   : > { %7562 = vmatpush3.bf16.msra.mxu0 %v7968_v29 }
 0x725   : > { %7563 = vmatprep.subr.bf16.mxu0 %v8883_v24 }
 0x728   : > { %7564 = vmatpush3.bf16.msra.mxu0 %v7969_v27 }
 0x729   : > { %7565 = vmatprep.subr.bf16.mxu0 %v8883_v24 }
 0x72c   : > { %7566 = vmatpush3.bf16.msra.mxu0 %v7970_v38 }
 0x72d   : > { %7567 = vmatprep.subr.bf16.mxu0 %v8883_v24 }
 0x7c1   : > { %v2422_v40 = vpop.f32.mrb[12].mxu0  ;;  %v2466_v42 = vpop.f32.mrb[12].mxu1 }
 0x7c2   : > { %v7535_v43 = vpop.f32.mrb[13].mxu0  ;;  %v7541_v44 = vpop.f32.mrb[13].mxu1 }
 0x7c3   : > { %v2425_v7 = vpop.f32.mrb[14].mxu0  ;;  %v2469_v22 = vpop.f32.mrb[14].mxu1 }
 0x7c4   : > { %v7536_v23 = vpop.f32.mrb[15].mxu0  ;;  %v7542_v45 = vpop.f32.mrb[15].mxu1 }
 0x7ea   : > { %v2510_v46 = vpop.f32.mrb[16].mxu0 }
 0x7eb   : > { %v2561_v47 = vcombine.low %v2422_v40, %v2510_v46  ;;  %v2562_v49 = vcombine.high %v2422_v40, %v2510_v46  ;;  %v7547_v52 = vpop.f32.mrb[17].mxu0 }
 0x7ec   : > { %v2554_v54 = vpop.f32.mrb[16].mxu1  ;;  %v2513_v55 = vpop.f32.mrb[18].mxu0 }
 0x7ed   : > { %v2577_v56 = vcombine.low %v2466_v42, %v2554_v54  ;;  %v2578_v57 = vcombine.high %v2466_v42, %v2554_v54  ;;  %v7553_v59 = vpop.f32.mrb[17].mxu1  ;;  %v2569_v60 = vrot.slane %v2561_v47, %v9551_v41  ;;  %v2576_v62 = vrot.slane %v2562_v49, %v9551_v41  ;;  %v7548_v9 = vpop.f32.mrb[19].mxu0  ;;  %v7971_v49 = vld [vmem:[#allocation14 + $0x30] sm:$0xff]  }
 0x7ee   : > { %v2629_v0 = vcombine.low %v2425_v7, %v2513_v55  ;;  %v2630_v2 = vcombine.high %v2425_v7, %v2513_v55  ;;  %v2557_v14 = vpop.f32.mrb[18].mxu1  ;;  %7568 = vmatpush3.bf16.msra.mxu0 %v7971_v49 }
 0x7ef   : > { %v2585_v36 = vrot.slane %v2577_v56, %v9551_v41  ;;  %v2592_v16 = vrot.slane %v2578_v57, %v9551_v41  ;;  %v2645_v17 = vcombine.low %v2469_v22, %v2557_v14  ;;  %v2646_v3 = vcombine.high %v2469_v22, %v2557_v14  ;;  %v7554_v25 = vpop.f32.mrb[19].mxu1  ;;  %7569 = vmatprep.subr.bf16.mxu0 %v8883_v24 }
 0x7f0   : > { %v2637_v53 = vrot.slane %v2629_v0, %v9551_v41  ;;  %v2644_v61 = vrot.slane %v2630_v2, %v9551_v41 }
 0x7f1   : > { %v2593_v34 = vcombine.low %v2569_v60, %v2585_v36  ;;  %v2594_v35 = vcombine.high %v2569_v60, %v2585_v36  ;;  %v2609_v5 = vcombine.low %v2576_v62, %v2592_v16  ;;  %v2610_v6 = vcombine.high %v2576_v62, %v2592_v16 }
 0x7f2   : > { %v2653_v51 = vrot.slane %v2645_v17, %v9551_v41  ;;  %v2660_v58 = vrot.slane %v2646_v3, %v9551_v41 }
 0x7f3   : > { %v2601_v39 = vrot.slane %v2593_v34, %v9554_v48  ;;  %v2608_v4 = vrot.slane %v2594_v35, %v9554_v48  ;;  %v2617_v30 = vrot.slane %v2609_v5, %v9554_v48  ;;  %v2624_v31 = vrot.slane %v2610_v6, %v9554_v48  ;;  %v7972_v6 = vld [vmem:[#allocation14 + $0x38] sm:$0xff]  }
 0x7f4   : > { %v2661_v32 = vcombine.low %v2637_v53, %v2653_v51  ;;  %v2662_v33 = vcombine.high %v2637_v53, %v2653_v51  ;;  %v2677_v12 = vcombine.low %v2644_v61, %v2660_v58  ;;  %v2678_v8 = vcombine.high %v2644_v61, %v2660_v58  ;;  %7570 = vmatpush3.bf16.msra.mxu0 %v7972_v6  ;;  %v7993_v6 = vld [vmem:[#allocation22 + $0x64] ss:$16 sps:$4 sm:$0xff]  }
 0x7f5   : > { %v2697_v26 = vcombine.low %v2601_v39, %v2608_v4  ;;  %v7095_v37 = vcombine.high %v2601_v39, %v2608_v4  ;;  %v2713_v18 = vcombine.low %v2617_v30, %v2624_v31  ;;  %v7096_v19 = vcombine.high %v2617_v30, %v2624_v31 }
 0x7f6   : > { %v2669_v20 = vrot.slane %v2661_v32, %v9554_v48  ;;  %v2676_v63 = vrot.slane %v2662_v33, %v9554_v48  ;;  %v2685_v1 = vrot.slane %v2677_v12, %v9554_v48  ;;  %v2692_v29 = vrot.slane %v2678_v8, %v9554_v48 }
 0x7f7   : > { %v2704_v27 = vrot.slane %v2697_v26, %v9551_v41  ;;  %v2712_v38 = vrot.slane %v7095_v37, %v9551_v41  ;;  %v2720_v40 = vrot.slane %v2713_v18, %v9551_v41  ;;  %v2728_v42 = vrot.slane %v7096_v19, %v9551_v41 }
 0x7f8   : > { %v2765_v43 = vcombine.low %v2669_v20, %v2676_v63  ;;  %v7097_v44 = vcombine.high %v2669_v20, %v2676_v63  ;;  %v2781_v7 = vcombine.low %v2685_v1, %v2692_v29  ;;  %v7098_v22 = vcombine.high %v2685_v1, %v2692_v29 }
 0x7f9   : > { %v2730_v23 = vcombine.high %v2704_v27, %v2712_v38  ;;  %v2746_v45 = vcombine.high %v2720_v40, %v2728_v42  ;;  %v2729_v46 = vcombine.low %v2704_v27, %v2712_v38  ;;  %v2745_v47 = vcombine.low %v2720_v40, %v2728_v42  ;;  %v7099_v42 = vld [vmem:[#allocation16] ss:$0 sm:$0xff] }
 0x7fa   : > { %v2772_v52 = vrot.slane %v2765_v43, %v9551_v41  ;;  %v2780_v54 = vrot.slane %v7097_v44, %v9551_v41  ;;  %v2788_v55 = vrot.slane %v2781_v7, %v9551_v41  ;;  %v2796_v56 = vrot.slane %v7098_v22, %v9551_v41  ;;  %v7108_v44 = vld [vmem:[#allocation17] ss:$0 sm:$0xff] }
 0x7fb   : > { %v2744_v57 = vrot.slane %v2730_v23, %v9554_v48  ;;  %v2760_v59 = vrot.slane %v2746_v45, %v9554_v48  ;;  %v2737_v60 = vrot.slane %v2729_v46, %v9554_v48  ;;  %v2753_v62 = vrot.slane %v2745_v47, %v9554_v48 }
 0x7fc   : > { %v2798_v0 = vcombine.high %v2772_v52, %v2780_v54  ;;  %v2814_v2 = vcombine.high %v2788_v55, %v2796_v56  ;;  %v2797_v9 = vcombine.low %v2772_v52, %v2780_v54  ;;  %v2813_v14 = vcombine.low %v2788_v55, %v2796_v56  ;;  %v7973_v55 = vld [vmem:[#allocation22] ss:$16 sps:$4 sm:$0xff]   ;;  %v7975_v56 = vld [vmem:[#allocation22 + $0x4] ss:$16 sps:$4 sm:$0xff]  }
 0x7fd   : > { %v2763_v36 = vcombine.low %v2744_v57, %v2760_v59  ;;  %v2761_v16 = vcombine.low %v2737_v60, %v2753_v62  ;;  %v2762_v17 = vcombine.high %v2737_v60, %v2753_v62  ;;  %v2764_v3 = vcombine.high %v2744_v57, %v2760_v59  ;;  %v7976_v57 = vld [vmem:[#allocation22 + $0x8] ss:$16 sps:$4 sm:$0xff]   ;;  %v7978_v59 = vld [vmem:[#allocation22 + $0xc] ss:$16 sps:$4 sm:$0xff]   ;;  %v7981_v60 = vld [vmem:[#allocation22 + $0x24] ss:$16 sps:$4 sm:$0xff]   ;;  %3244 = vmatprep.subr.bf16.mxu1 %v7975_v56 }
 0x7fe   : > { %v2812_v25 = vrot.slane %v2798_v0, %v9554_v48  ;;  %v2828_v34 = vrot.slane %v2814_v2, %v9554_v48  ;;  %v2805_v35 = vrot.slane %v2797_v9, %v9554_v48  ;;  %v2821_v5 = vrot.slane %v2813_v14, %v9554_v48  ;;  %v7984_v62 = vld [vmem:[#allocation22 + $0x2c] ss:$16 sps:$4 sm:$0xff]   ;;  %3287 = vmatprep.subr.bf16.mxu0 %v7978_v59  ;;  %v7979_v0 = vld [vmem:[#allocation22 + $0x20] ss:$16 sps:$4 sm:$0xff]  }
 0x7ff   : > { %3245 = vmatpush1.bf16.msra.mxu1 %v7973_v55  ;;  %v8021_v59 = vld [vmem:[#allocation25 + $0x40] sm:$0xff]  }
 0x800   : > { %v2831_v53 = vcombine.low %v2812_v25, %v2828_v34  ;;  %v2830_v61 = vcombine.high %v2805_v35, %v2821_v5  ;;  %v2829_v51 = vcombine.low %v2805_v35, %v2821_v5  ;;  %v2832_v58 = vcombine.high %v2812_v25, %v2828_v34  ;;  %3246 = vmatprep.subr.bf16.mxu1 %v7981_v60  ;;  %v7987_v25 = vld [vmem:[#allocation22 + $0x44] ss:$16 sps:$4 sm:$0xff]   ;;  %v7990_v34 = vld [vmem:[#allocation22 + $0x4c] ss:$16 sps:$4 sm:$0xff]   ;;  %v7985_v35 = vld [vmem:[#allocation22 + $0x40] ss:$16 sps:$4 sm:$0xff]  }
 0x801   : > { %v7988_v5 = vld [vmem:[#allocation22 + $0x48] ss:$16 sps:$4 sm:$0xff]  }
 0x802   : > { %v7908_v39 = vpack.i.bf16 %v2831_v53, %v2763_v36  ;;  %v7903_v4 = vpack.i.bf16 %v2830_v61, %v2762_v17  ;;  %v7913_v30 = vpack.i.bf16 %v2832_v58, %v2764_v3  ;;  %v7996_v53 = vld [vmem:[#allocation22 + $0x6c] ss:$16 sps:$4 sm:$0xff]   ;;  %v7991_v61 = vld [vmem:[#allocation22 + $0x60] ss:$16 sps:$4 sm:$0xff]   ;;  %v7999_v58 = vld [vmem:[#allocation22 + $0x84] ss:$16 sps:$4 sm:$0xff]  }
 0x803   : > { %3247 = vmatpush1.bf16.msra.mxu1 %v7979_v0  ;;  %v8022_v60 = vld [vmem:[#allocation25 + $0xc0] sm:$0xff]  }
 0x804   : > { %7909 = vrot.lane.b32.xlu1 %v7908_v39, %s8887_s22  ;;  %7904 = vrot.lane.b32.xlu0 %v7903_v4, %s8888_s23  ;;  %v8002_v39 = vld [vmem:[#allocation22 + $0x8c] ss:$16 sps:$4 sm:$0xff]   ;;  %v7997_v4 = vld [vmem:[#allocation22 + $0x80] ss:$16 sps:$4 sm:$0xff]  }
 0x805   : > { %3248 = vmatprep.subr.bf16.mxu1 %v7987_v25  ;;  %v8024_v0 = vld [vmem:[#allocation25 + $0x80] sm:$0xff]   ;;  %v8034_v25 = vld [vmem:[#allocation25 + $0xd8] sm:$0xff]  }
 0x807   : > { %3249 = vmatpush1.bf16.msra.mxu1 %v7985_v35  ;;  %v8036_v35 = vld [vmem:[#allocation25 + $0x98] sm:$0xff]  }
 0x808   : > { %7914 = vrot.lane.b32.xlu1 %v7913_v30, %s8886_s9  ;;  %3250 = vmatprep.subr.bf16.mxu1 %v7993_v6  ;;  %v8000_v30 = vld [vmem:[#allocation22 + $0x88] ss:$16 sps:$4 sm:$0xff]  }
 0x809   : > { %v8038_v6 = vld [vmem:[#allocation25 + $0xe0] sm:$0xff]  }
 0x80b   : > { %3251 = vmatpush1.bf16.msra.mxu1 %v7991_v61  ;;  %v8040_v61 = vld [vmem:[#allocation25 + $0xa0] sm:$0xff]  }
 0x80c   : > { %3252 = vmatprep.subr.bf16.mxu1 %v7999_v58  ;;  %v8042_v58 = vld [vmem:[#allocation25 + $0xe8] sm:$0xff]  }
 0x80f   : > { %3253 = vmatpush1.bf16.msra.mxu1 %v7997_v4  ;;  %v8044_v4 = vld [vmem:[#allocation25 + $0xa8] sm:$0xff]  }
 0x876   : > { %v7910_v31 = vpop.permute.xlu1 %7909  ;;  %v7905_v32 = vpop.permute.xlu0 %7904 }
 0x877   : > { %v7907_v33 = vunpack.i.h.bf16 %v7905_v32  ;;  %v7906_v12 = vunpack.i.l.bf16 %v7905_v32  ;;  %v7912_v8 = vunpack.i.h.bf16 %v7910_v31  ;;  %v7911_v26 = vunpack.i.l.bf16 %v7910_v31  ;;  %v8005_v31 = vld [vmem:[#allocation22 + $0xa4] ss:$16 sps:$4 sm:$0xff]   ;;  %v8008_v32 = vld [vmem:[#allocation22 + $0xac] ss:$16 sps:$4 sm:$0xff]  }
 0x878   : > { %3254 = vmatprep.subr.bf16.mxu1 %v8005_v31  ;;  %v8046_v31 = vld [vmem:[#allocation25 + $0xf0] sm:$0xff]  }
 0x879   : > { %v2857_v37 = vsel %vm2095_vm1, %v2761_v16, %v7906_v12  ;;  %v2858_v18 = vsel %vm2095_vm1, %v2829_v51, %v7907_v33  ;;  %v7994_v51 = vld [vmem:[#allocation22 + $0x68] ss:$16 sps:$4 sm:$0xff]   ;;  %v8003_v33 = vld [vmem:[#allocation22 + $0xa0] ss:$16 sps:$4 sm:$0xff]  }
 0x87a   : > { %v7915_v19 = vpop.permute.xlu1 %7914  ;;  %v2860_v1 = vsel %vm2859_vm3, %v2857_v37, %v7911_v26  ;;  %v2861_v29 = vsel %vm2859_vm3, %v2858_v18, %v7912_v8  ;;  %v8006_v12 = vld [vmem:[#allocation22 + $0xa8] ss:$16 sps:$4 sm:$0xff]   ;;  %v8011_v8 = vld [vmem:[#allocation22 + $0xc4] ss:$16 sps:$4 sm:$0xff]   ;;  %v8014_v26 = vld [vmem:[#allocation22 + $0xcc] ss:$16 sps:$4 sm:$0xff]   ;;  %3255 = vmatpush1.bf16.msra.mxu1 %v8003_v33 }
 0x87b   : > { %v7917_v20 = vunpack.i.h.bf16 %v7915_v19  ;;  %v7916_v63 = vunpack.i.l.bf16 %v7915_v19  ;;  %v8009_v37 = vld [vmem:[#allocation22 + $0xc0] ss:$16 sps:$4 sm:$0xff]   ;;  %v8012_v18 = vld [vmem:[#allocation22 + $0xc8] ss:$16 sps:$4 sm:$0xff]   ;;  %3256 = vmatprep.subr.bf16.mxu1 %v8011_v8  ;;  %v8017_v19 = vld [vmem:[#allocation22 + $0xe4] ss:$16 sps:$4 sm:$0xff]  }
 0x87c   : > { %v8048_v33 = vld [vmem:[#allocation25 + $0xb0] sm:$0xff]   ;;  %v8050_v8 = vld [vmem:[#allocation25 + $0xf8] sm:$0xff]  }
 0x87d   : > { %v2863_v27 = vsel %vm2862_vm4, %v2860_v1, %v7916_v63  ;;  %v2864_v38 = vsel %vm2862_vm4, %v2861_v29, %v7917_v20  ;;  %v8020_v20 = vld [vmem:[#allocation22 + $0xec] ss:$16 sps:$4 sm:$0xff]   ;;  %v8015_v63 = vld [vmem:[#allocation22 + $0xe0] ss:$16 sps:$4 sm:$0xff]   ;;  %v8018_v1 = vld [vmem:[#allocation22 + $0xe8] ss:$16 sps:$4 sm:$0xff]  }
 0x87e   : > { %v2865_v40 = vpack.c.bf16 %v2864_v38, %v2863_v27  ;;  %3257 = vmatpush1.bf16.msra.mxu1 %v8009_v37  ;;  %v8052_v37 = vld [vmem:[#allocation25 + $0xb8] sm:$0xff]  }
 0x87f   : > { %3258 = vmatprep.subr.bf16.mxu1 %v8017_v19  ;;  %v3078_v19 = vsub.s32 3, %v9505_v10 }
 0x880   : > { %7572 = vmatmul.mubr.bf16.vlgmr.msra.gmra.mrb[20].mxu0 %v2865_v40 }
 0x881   : > { %3319 = vmatprep.mubr.bf16.mxu0 %v8884_v50  ;;  %3288 = vmatpush1.bf16.msra.mxu0 %v7976_v57 }
 0x882   : > { %3289 = vmatprep.subr.bf16.mxu0 %v7984_v62  ;;  %3259 = vmatpush1.bf16.msra.mxu1 %v8015_v63  ;;  %v8023_v62 = vld [vmem:[#allocation25] sm:$0xff]  }
 0x883   : > { %7356 = vmatprep.subr.bf16.mxu1 %v8021_v59 }
 0x953   : > { %v2971_v43 = vpop.f32.mrb[20].mxu0 }
 0x954   : > { %v2972_v7 = vadd.f32 %v7099_v42, %v2971_v43  ;;  %v7573_v22 = vpop.f32.mrb[21].mxu0 }
 0x955   : > { %v2974_v23 = vpop.f32.mrb[22].mxu0  ;;  %v7109_v22 = vld [vmem:[#allocation19] ss:$0 sm:$0xff] }
 0x956   : > { %v2985_v45 = vmul.f32 %v7108_v44, %v2972_v7  ;;  %v2975_v46 = vadd.f32 %v7099_v42, %v2974_v23  ;;  %v7574_v47 = vpop.f32.mrb[23].mxu0 }
 0x957   : > { %v7110_v47 = vld [vmem:[#allocation20] ss:$0 sm:$0xff] }
 0x958   : > { %v2986_v49 = vmul.f32 %v7108_v44, %v2975_v46  ;;  %v9857_v52 = vadd.f32 %v2985_v45, %v9470_v15  ;;  %v7982_v15 = vld [vmem:[#allocation22 + $0x28] ss:$16 sps:$4 sm:$0xff]  }
 0x959   : > { %3290 = vmatpush1.bf16.msra.mxu0 %v7982_v15  ;;  %v8025_v15 = vld [vmem:[#allocation25 + $0x48] sm:$0xff]  }
 0x95a   : > { %2991 = vadd.xlane.f32.xlu1 %v9857_v52  ;;  %v9861_v54 = vadd.f32 %v2986_v49, %v9473_v21  ;;  %3291 = vmatprep.subr.bf16.mxu0 %v7990_v34  ;;  %v8035_v34 = vld [vmem:[#allocation25 + $0x18] sm:$0xff]  }
 0x95c   : > { %2993 = vadd.xlane.f32.xlu0 %v9861_v54 }
 0x95d   : > { %3292 = vmatpush1.bf16.msra.mxu0 %v7988_v5  ;;  %v8037_v5 = vld [vmem:[#allocation25 + $0x60] sm:$0xff]  }
 0x95e   : > { %3293 = vmatprep.subr.bf16.mxu0 %v7996_v53  ;;  %v8039_v53 = vld [vmem:[#allocation25 + $0x20] sm:$0xff]  }
 0x961   : > { %3294 = vmatpush1.bf16.msra.mxu0 %v7994_v51  ;;  %v8041_v51 = vld [vmem:[#allocation25 + $0x68] sm:$0xff]  }
 0x962   : > { %3295 = vmatprep.subr.bf16.mxu0 %v8002_v39  ;;  %v8043_v39 = vld [vmem:[#allocation25 + $0x28] sm:$0xff]  }
 0x965   : > { %3296 = vmatpush1.bf16.msra.mxu0 %v8000_v30  ;;  %v8045_v30 = vld [vmem:[#allocation25 + $0x70] sm:$0xff]  }
 0x966   : > { %3297 = vmatprep.subr.bf16.mxu0 %v8008_v32  ;;  %v8047_v32 = vld [vmem:[#allocation25 + $0x30] sm:$0xff]  }
 0x969   : > { %3298 = vmatpush1.bf16.msra.mxu0 %v8006_v12  ;;  %v8049_v12 = vld [vmem:[#allocation25 + $0x78] sm:$0xff]  }
 0x96a   : > { %3299 = vmatprep.subr.bf16.mxu0 %v8014_v26  ;;  %v8051_v26 = vld [vmem:[#allocation25 + $0x38] sm:$0xff]  }
 0x96d   : > { %3300 = vmatpush1.bf16.msra.mxu0 %v8012_v18  ;;  %v3062_v18 = vld [vmem:[#allocation23] sm:$0xf] }
 0x96e   : > { %3301 = vmatprep.subr.bf16.mxu0 %v8020_v20  ;;  %v3067_v20 = vrot.slane %v3062_v18, %v9508_v11  ;;  %v3075_v63 = vrot.slane %v3062_v18, %v9691_v28 }
 0x971   : > { %3302 = vmatpush1.bf16.msra.mxu0 %v8018_v1  ;;  %v3071_v1 = vrot.slane %v3062_v18, %v9516_v13 }
 0x972   : > { %7378 = vmatprep.subr.bf16.mxu0 %v8022_v60 }
 0x9e7   : > { %v2992_v21 = vpop.xlane.xlu1 %2991 }
 0x9e8   : > { %v2995_v2 = vmul.f32 0.0078125, %v2992_v21  ;;  %v8026_v21 = vld [vmem:[#allocation25 + $0xc8] sm:$0xff]  }
 0x9e9   : > { %v2994_v9 = vpop.xlane.xlu0 %2993 }
 0x9ea   : > { %v9865_v14 = vsub.f32 %v9857_v52, %v2995_v2  ;;  %v2996_v36 = vmul.f32 0.0078125, %v2994_v9  ;;  %v8027_v2 = vld [vmem:[#allocation25 + $0x8] sm:$0xff]  }
 0x9eb   : > { %v8028_v9 = vld [vmem:[#allocation25 + $0x88] sm:$0xff]  }
 0x9ec   : > { %v9868_v16 = vsub.f32 %v9861_v54, %v2996_v36  ;;  %v2999_v17 = vmul.f32 %v9865_v14, %v9865_v14  ;;  %v8030_v36 = vld [vmem:[#allocation25 + $0xd0] sm:$0xff]  }
 0x9ee   : > { %3001 = vadd.xlane.f32.xlu0 %v2999_v17  ;;  %v3000_v3 = vmul.f32 %v9868_v16, %v9868_v16  ;;  %v8032_v17 = vld [vmem:[#allocation25 + $0x90] sm:$0xff]  }
 0x9f2   : > { %3003 = vadd.xlane.f32.xlu0 %v3000_v3  ;;  %v8033_v3 = vld [vmem:[#allocation25 + $0x58] sm:$0xff]  }
 0xa7b   : > { %v3002_v29 = vpop.xlane.xlu0 %3001 }
 0xa7c   : > { %v3005_v27 = vmul.f32 0.0078125, %v3002_v29  ;;  %v3079_v29 = vrot.slane %v3062_v18, %v3078_v19 }
 0xa7e   : > { %v3007_v38 = vadd.f32 1e-05, %v3005_v27 }
 0xa7f   : > { %v3004_v40 = vpop.xlane.xlu0 %3003 }
 0xa80   : > { %8217 = vrsqrt.f32 %v3007_v38  ;;  %v3006_v42 = vmul.f32 0.0078125, %v3004_v40 }
 0xa82   : > { %v3008_v43 = vadd.f32 1e-05, %v3006_v42 }
 0xa84   : > { %8219 = vrsqrt.f32 %v3008_v43 }
 0xa8a   : > { %v8218_v44 = vpop.eup %8217 }
 0xa8b   : > { %v3011_v7 = vmul.f32 %v8218_v44, %v9865_v14  ;;  %v8029_v14 = vld [vmem:[#allocation25 + $0x50] sm:$0xff]  }
 0xa8d   : > { %v3019_v46 = vmul.f32 %v7109_v22, %v3011_v7 }
 0xa8e   : > { %v8220_v23 = vpop.eup %8219 }
 0xa8f   : > { %v3012_v45 = vmul.f32 %v8220_v23, %v9868_v16  ;;  %v3027_v55 = vadd.f32 %v7110_v47, %v3019_v46  ;;  %v8031_v16 = vld [vmem:[#allocation25 + $0x10] sm:$0xff]  }
 0xa91   : > { %v3020_v49 = vmul.f32 %v7109_v22, %v3012_v45 }
 0xa93   : > { %v3028_v56 = vadd.f32 %v7110_v47, %v3020_v49 }
 0xa95   : > { %v3029_v57 = vpack.c.bf16 %v3028_v56, %v3027_v55 }
 0xa97   : > { %3277 = vmatmul.mubr.bf16.vlgmr.msra.gmra.mrb[20].mxu1 %v3029_v57  ;;  %3320 = vmatmul.mubr.bf16.vlgmr.msra.gmra.mrb[24].mxu0 %v3029_v57 }
 0xa98   : > { %7357 = vmatpush3.bf16.msra.mxu1 %v8023_v62  ;;  %7379 = vmatpush3.bf16.msra.mxu0 %v8024_v0 }
 0xa99   : > { %7358 = vmatprep.subr.bf16.mxu1 %v8025_v15  ;;  %7380 = vmatprep.subr.bf16.mxu0 %v8026_v21 }
 0xa9c   : > { %7359 = vmatpush3.bf16.msra.mxu1 %v8027_v2  ;;  %7381 = vmatpush3.bf16.msra.mxu0 %v8028_v9 }
 0xa9d   : > { %7360 = vmatprep.subr.bf16.mxu1 %v8029_v14  ;;  %7382 = vmatprep.subr.bf16.mxu0 %v8030_v36 }
 0xaa0   : > { %7361 = vmatpush3.bf16.msra.mxu1 %v8031_v16  ;;  %7383 = vmatpush3.bf16.msra.mxu0 %v8032_v17 }
 0xaa1   : > { %7362 = vmatprep.subr.bf16.mxu1 %v8033_v3  ;;  %7384 = vmatprep.subr.bf16.mxu0 %v8034_v25 }
 0xaa4   : > { %7363 = vmatpush3.bf16.msra.mxu1 %v8035_v34  ;;  %7385 = vmatpush3.bf16.msra.mxu0 %v8036_v35 }
 0xaa5   : > { %7364 = vmatprep.subr.bf16.mxu1 %v8037_v5  ;;  %7386 = vmatprep.subr.bf16.mxu0 %v8038_v6 }
 0xaa8   : > { %7365 = vmatpush3.bf16.msra.mxu1 %v8039_v53  ;;  %7387 = vmatpush3.bf16.msra.mxu0 %v8040_v61 }
 0xaa9   : > { %7366 = vmatprep.subr.bf16.mxu1 %v8041_v51  ;;  %7388 = vmatprep.subr.bf16.mxu0 %v8042_v58 }
 0xaac   : > { %7367 = vmatpush3.bf16.msra.mxu1 %v8043_v39  ;;  %7389 = vmatpush3.bf16.msra.mxu0 %v8044_v4 }
 0xaad   : > { %7368 = vmatprep.subr.bf16.mxu1 %v8045_v30  ;;  %7390 = vmatprep.subr.bf16.mxu0 %v8046_v31 }
 0xab0   : > { %7369 = vmatpush3.bf16.msra.mxu1 %v8047_v32  ;;  %7391 = vmatpush3.bf16.msra.mxu0 %v8048_v33 }
 0xab1   : > { %7370 = vmatprep.subr.bf16.mxu1 %v8049_v12  ;;  %7392 = vmatprep.subr.bf16.mxu0 %v8050_v8 }
 0xab4   : > { %7371 = vmatpush3.bf16.msra.mxu1 %v8051_v26  ;;  %7393 = vmatpush3.bf16.msra.mxu0 %v8052_v37 }
 0xab5   : > { %7575 = vmatprep.subr.bf16.mxu0 %v8883_v24 }
 0xb6a   : > { %v3278_v27 = vpop.f32.mrb[20].mxu1  ;;  %v3321_v38 = vpop.f32.mrb[24].mxu0 }
 0xb6b   : > { %v9883_v40 = vadd.f32 %v3278_v27, %v3067_v20  ;;  %v9885_v42 = vadd.f32 %v3321_v38, %v3075_v63  ;;  %v3280_v43 = vpop.f32.mrb[21].mxu1  ;;  %v3323_v44 = vpop.f32.mrb[25].mxu0 }
 0xb6c   : > { %v9887_v7 = vadd.f32 %v3280_v43, %v3071_v1  ;;  %v9889_v22 = vadd.f32 %v3323_v44, %v3079_v29  ;;  %v3282_v23 = vpop.f32.mrb[22].mxu1  ;;  %v3325_v45 = vpop.f32.mrb[26].mxu0 }
 0xb6d   : > { %v3338_v46 = vmul.f32 0.044715, %v9883_v40  ;;  %v3340_v47 = vmul.f32 0.044715, %v9885_v42  ;;  %v3283_v49 = vadd.f32 %v3282_v23, %v3067_v20  ;;  %v3326_v55 = vadd.f32 %v3325_v45, %v3075_v63  ;;  %v3284_v56 = vpop.f32.mrb[23].mxu1  ;;  %v3327_v57 = vpop.f32.mrb[27].mxu0 }
 0xb6e   : > { %v3339_v59 = vmul.f32 0.044715, %v9887_v7  ;;  %v3341_v60 = vmul.f32 0.044715, %v9889_v22  ;;  %v9895_v62 = vadd.f32 %v3284_v56, %v3071_v1  ;;  %v9897_v0 = vadd.f32 %v3327_v57, %v3079_v29 }
 0xb6f   : > { %v3346_v15 = vmul.f32 %v3338_v46, %v9883_v40  ;;  %v3348_v21 = vmul.f32 %v3340_v47, %v9885_v42  ;;  %v3342_v2 = vmul.f32 0.044715, %v3283_v49  ;;  %v3344_v9 = vmul.f32 0.044715, %v3326_v55 }
 0xb70   : > { %v3347_v14 = vmul.f32 %v3339_v59, %v9887_v7  ;;  %v3349_v36 = vmul.f32 %v3341_v60, %v9889_v22  ;;  %v3343_v16 = vmul.f32 0.044715, %v9895_v62  ;;  %v3345_v17 = vmul.f32 0.044715, %v9897_v0 }
 0xb71   : > { %v3354_v3 = vmul.f32 %v3346_v15, %v9883_v40  ;;  %v3356_v25 = vmul.f32 %v3348_v21, %v9885_v42  ;;  %v3350_v34 = vmul.f32 %v3342_v2, %v3283_v49  ;;  %v3352_v35 = vmul.f32 %v3344_v9, %v3326_v55 }
 0xb72   : > { %v3355_v5 = vmul.f32 %v3347_v14, %v9887_v7  ;;  %v3357_v6 = vmul.f32 %v3349_v36, %v9889_v22  ;;  %v3351_v53 = vmul.f32 %v3343_v16, %v9895_v62  ;;  %v3353_v61 = vmul.f32 %v3345_v17, %v9897_v0 }
 0xb73   : > { %v3362_v51 = vadd.f32 %v3354_v3, %v9883_v40  ;;  %v3364_v58 = vadd.f32 %v3356_v25, %v9885_v42  ;;  %v3358_v39 = vmul.f32 %v3350_v34, %v3283_v49  ;;  %v3360_v4 = vmul.f32 %v3352_v35, %v3326_v55 }
 0xb74   : > { %v3359_v30 = vmul.f32 %v3351_v53, %v9895_v62  ;;  %v3361_v31 = vmul.f32 %v3353_v61, %v9897_v0  ;;  %v3363_v26 = vadd.f32 %v3355_v5, %v9887_v7  ;;  %v3365_v63 = vadd.f32 %v3357_v6, %v9889_v22 }
 0xb75   : > { %v3370_v32 = vmul.f32 0.7978846, %v3362_v51  ;;  %v3372_v33 = vmul.f32 0.7978846, %v3364_v58  ;;  %v3366_v12 = vadd.f32 %v3358_v39, %v3283_v49  ;;  %v3368_v8 = vadd.f32 %v3360_v4, %v3326_v55 }
 0xb76   : > { %v3367_v37 = vadd.f32 %v3359_v30, %v9895_v62  ;;  %v3371_v1 = vmul.f32 0.7978846, %v3363_v26  ;;  %v3369_v27 = vadd.f32 %v3361_v31, %v9897_v0  ;;  %v3373_v38 = vmul.f32 0.7978846, %v3365_v63 }
 0xb77   : > { %8221 = vtanh.f32 %v3370_v32  ;;  %v3374_v18 = vmul.f32 0.7978846, %v3366_v12  ;;  %v3376_v20 = vmul.f32 0.7978846, %v3368_v8  ;;  %v3330_v57 = vmul.f32 0.5, %v9883_v40 }
 0xb78   : > { %8223 = vtanh.f32 %v3372_v33  ;;  %v3375_v29 = vmul.f32 0.7978846, %v3367_v37  ;;  %v3377_v43 = vmul.f32 0.7978846, %v3369_v27  ;;  %v3334_v59 = vmul.f32 0.5, %v3283_v49 }
 0xb79   : > { %8225 = vtanh.f32 %v3374_v18  ;;  %v3332_v21 = vmul.f32 0.5, %v9885_v42  ;;  %v3336_v2 = vmul.f32 0.5, %v3326_v55  ;;  %v3331_v36 = vmul.f32 0.5, %v9887_v7 }
 0xb7a   : > { %8227 = vtanh.f32 %v3376_v20  ;;  %v3335_v34 = vmul.f32 0.5, %v9895_v62  ;;  %v3333_v49 = vmul.f32 0.5, %v9889_v22  ;;  %v3337_v53 = vmul.f32 0.5, %v9897_v0  ;;  %v7143_v62 = vld [vmem:[#allocation26] ss:$0 sm:$0xff] }
 0xb7b   : > { %8229 = vtanh.f32 %v3371_v1  ;;  %v7176_v1 = vld [vmem:[#allocation28] ss:$0 sm:$0xff] }
 0xb7c   : > { %8231 = vtanh.f32 %v3375_v29 }
 0xb7d   : > { %8233 = vtanh.f32 %v3373_v38 }
 0xb7e   : > { %8235 = vtanh.f32 %v3377_v43 }
 0xb81   : > { %v8222_v44 = vpop.eup %8221 }
 0xb82   : > { %v8224_v23 = vpop.eup %8223  ;;  %v3386_v45 = vadd.f32 1.0, %v8222_v44 }
 0xb83   : > { %v8226_v46 = vpop.eup %8225  ;;  %v3388_v47 = vadd.f32 1.0, %v8224_v23 }
 0xb84   : > { %v8228_v56 = vpop.eup %8227  ;;  %v3390_v60 = vadd.f32 1.0, %v8226_v46  ;;  %v3394_v17 = vmul.f32 %v3386_v45, %v3330_v57  ;;  %v8055_v57 = vld [vmem:[#allocation13 + $0xc4] ss:$12 sps:$4 sm:$0xff]  }
 0xb85   : > { %v8230_v15 = vpop.eup %8229  ;;  %v3392_v9 = vadd.f32 1.0, %v8228_v56  ;;  %v3396_v5 = vmul.f32 %v3388_v47, %v3332_v21  ;;  %v8053_v56 = vld [vmem:[#allocation13 + $0xc0] ss:$12 sps:$4 sm:$0xff]   ;;  %3984 = vmatprep.subr.bf16.mxu1 %v8055_v57  ;;  %v8057_v21 = vld [vmem:[#allocation13 + $0xd8] ss:$12 sps:$4 sm:$0xff]  }
 0xb86   : > { %v8232_v14 = vpop.eup %8231  ;;  %v3387_v16 = vadd.f32 1.0, %v8230_v15  ;;  %v3398_v3 = vmul.f32 %v3390_v60, %v3334_v59  ;;  %v8056_v59 = vld [vmem:[#allocation13 + $0xc8] ss:$12 sps:$4 sm:$0xff]   ;;  %v8060_v15 = vld [vmem:[#allocation13 + $0xe0] ss:$12 sps:$4 sm:$0xff]  }
 0xb87   : > { %v8234_v25 = vpop.eup %8233  ;;  %v3391_v35 = vadd.f32 1.0, %v8232_v14  ;;  %v3400_v6 = vmul.f32 %v3392_v9, %v3336_v2  ;;  %v8059_v60 = vld [vmem:[#allocation13 + $0xdc] ss:$12 sps:$4 sm:$0xff]  }
 0xb88   : > { %v8236_v40 = vpop.eup %8235  ;;  %v3389_v42 = vadd.f32 1.0, %v8234_v25  ;;  %v3402_v55 = vpack.c.bf16 %v3398_v3, %v3394_v17  ;;  %v3395_v61 = vmul.f32 %v3387_v16, %v3331_v36  ;;  %v8063_v3 = vld [vmem:[#allocation13 + $0xf4] ss:$12 sps:$4 sm:$0xff]   ;;  %v8061_v25 = vld [vmem:[#allocation13 + $0xf0] ss:$12 sps:$4 sm:$0xff]  }
 0xb89   : > { %v3399_v51 = vmul.f32 %v3391_v35, %v3335_v34  ;;  %v3393_v58 = vadd.f32 1.0, %v8236_v40  ;;  %v3404_v7 = vpack.c.bf16 %v3400_v6, %v3396_v5  ;;  %v8064_v34 = vld [vmem:[#allocation13 + $0xf8] ss:$12 sps:$4 sm:$0xff]   ;;  %v8065_v5 = vld [vmem:[#allocation13 + $0x108] ss:$12 sps:$4 sm:$0xff]  }
 0xb8a   : > { %v3397_v4 = vmul.f32 %v3389_v42, %v3333_v49  ;;  %v8067_v35 = vld [vmem:[#allocation13 + $0x10c] ss:$12 sps:$4 sm:$0xff]   ;;  %v8068_v6 = vld [vmem:[#allocation13 + $0x110] ss:$12 sps:$4 sm:$0xff]  }
 0xb8b   : > { %v3403_v39 = vpack.c.bf16 %v3399_v51, %v3395_v61  ;;  %v3401_v30 = vmul.f32 %v3393_v58, %v3337_v53  ;;  %v8069_v40 = vld [vmem:[#allocation13 + $0x120] ss:$12 sps:$4 sm:$0xff]   ;;  %v8071_v49 = vld [vmem:[#allocation13 + $0x124] ss:$12 sps:$4 sm:$0xff]   ;;  %v8072_v53 = vld [vmem:[#allocation13 + $0x128] ss:$12 sps:$4 sm:$0xff]  }
 0xb8c   : > { %v8075_v42 = vld [vmem:[#allocation13 + $0x13c] ss:$12 sps:$4 sm:$0xff]   ;;  %v8076_v61 = vld [vmem:[#allocation13 + $0x140] ss:$12 sps:$4 sm:$0xff]  }
 0xb8d   : > { %3701 = vmatprep.mubr.bf16.mxu1 %v3403_v39  ;;  %v3405_v31 = vpack.c.bf16 %v3401_v30, %v3397_v4  ;;  %v8079_v51 = vld [vmem:[#allocation13 + $0x154] ss:$12 sps:$4 sm:$0xff]   ;;  %v8077_v58 = vld [vmem:[#allocation13 + $0x150] ss:$12 sps:$4 sm:$0xff]   ;;  %v8083_v39 = vld [vmem:[#allocation13 + $0x16c] ss:$12 sps:$4 sm:$0xff]  }
 0xb8e   : > { %3702 = vmatmul.mubr.bf16.vlgmr.msra.gmra.mrb[24].mxu1 %v3402_v55  ;;  %v8073_v55 = vld [vmem:[#allocation13 + $0x138] ss:$12 sps:$4 sm:$0xff]   ;;  %v8081_v4 = vld [vmem:[#allocation13 + $0x168] ss:$12 sps:$4 sm:$0xff]   ;;  %v8084_v30 = vld [vmem:[#allocation13 + $0x170] ss:$12 sps:$4 sm:$0xff]  }
 0xb8f   : > { %3742 = vmatprep.mubr.bf16.mxu0 %v3405_v31  ;;  %4016 = vmatprep.mubr.bf16.mxu1 %v8884_v50 }
 0xb90   : > { %3743 = vmatmul.mubr.bf16.vlgmr.msra.gmra.mrb[28].mxu0 %v3404_v7  ;;  %3985 = vmatpush1.bf16.msra.mxu1 %v8053_v56  ;;  %v8080_v7 = vld [vmem:[#allocation13 + $0x158] ss:$12 sps:$4 sm:$0xff]  }
 0xb91   : > { %7591 = vmatprep.mubr.msk.bf16.mxu0 %vm8885_vm0, %v8883_v24  ;;  %7576 = vmatpush3.bf16.msra.mxu0 %v8056_v59 }
 0xb92   : > { %7577 = vmatprep.subr.bf16.mxu0 %v8883_v24  ;;  %3986 = vmatprep.subr.bf16.mxu1 %v8059_v60 }
 0xb94   : > { %3987 = vmatpush1.bf16.msra.mxu1 %v8057_v21 }
 0xb95   : > { %7578 = vmatpush3.bf16.msra.mxu0 %v8060_v15  ;;  %3988 = vmatprep.subr.bf16.mxu1 %v8063_v3 }
 0xb96   : > { %7579 = vmatprep.subr.bf16.mxu0 %v8883_v24 }
 0xb98   : > { %3989 = vmatpush1.bf16.msra.mxu1 %v8061_v25 }
 0xb99   : > { %7580 = vmatpush3.bf16.msra.mxu0 %v8064_v34  ;;  %3990 = vmatprep.subr.bf16.mxu1 %v8067_v35 }
 0xb9a   : > { %7581 = vmatprep.subr.bf16.mxu0 %v8883_v24 }
 0xb9c   : > { %3991 = vmatpush1.bf16.msra.mxu1 %v8065_v5 }
 0xb9d   : > { %7582 = vmatpush3.bf16.msra.mxu0 %v8068_v6  ;;  %3992 = vmatprep.subr.bf16.mxu1 %v8071_v49 }
 0xb9e   : > { %7583 = vmatprep.subr.bf16.mxu0 %v8883_v24 }
 0xba0   : > { %3993 = vmatpush1.bf16.msra.mxu1 %v8069_v40 }
 0xba1   : > { %7584 = vmatpush3.bf16.msra.mxu0 %v8072_v53  ;;  %3994 = vmatprep.subr.bf16.mxu1 %v8075_v42 }
 0xba2   : > { %7585 = vmatprep.subr.bf16.mxu0 %v8883_v24 }
 0xba4   : > { %3995 = vmatpush1.bf16.msra.mxu1 %v8073_v55 }
 0xba5   : > { %7586 = vmatpush3.bf16.msra.mxu0 %v8076_v61  ;;  %3996 = vmatprep.subr.bf16.mxu1 %v8079_v51 }
 0xba6   : > { %7587 = vmatprep.subr.bf16.mxu0 %v8883_v24 }
 0xba8   : > { %3997 = vmatpush1.bf16.msra.mxu1 %v8077_v58 }
 0xba9   : > { %7588 = vmatpush3.bf16.msra.mxu0 %v8080_v7  ;;  %3998 = vmatprep.subr.bf16.mxu1 %v8083_v39 }
 0xbaa   : > { %7589 = vmatprep.subr.bf16.mxu0 %v8883_v24 }
 0xbac   : > { %3999 = vmatpush1.bf16.msra.mxu1 %v8081_v4 }
 0xbad   : > { %7590 = vmatpush3.bf16.msra.mxu0 %v8084_v30  ;;  %7595 = vmatprep.subr.bf16.mxu1 %v8883_v24 }
 0xbae   : > { %7619 = vmatprep.subr.bf16.mxu0 %v8883_v24 }
 0xc61   : > { %v7372_v22 = vpop.f32.mrb[24].mxu1 }
 0xc62   : > { %v7373_v0 = vpop.f32.mrb[25].mxu1 }
 0xc63   : > { %v7394_v32 = vpop.f32.mrb[28].mxu0  ;;  %v7374_v33 = vadd.f32 %v7373_v0, %v7372_v22  ;;  %v7375_v12 = vpop.f32.mrb[26].mxu1 }
 0xc64   : > { %v7395_v8 = vpop.f32.mrb[29].mxu0  ;;  %v7376_v26 = vpop.f32.mrb[27].mxu1 }
 0xc65   : > { %v3704_v37 = vadd.f32 %v7374_v33, %v7143_v62  ;;  %v7396_v18 = vadd.f32 %v7395_v8, %v7394_v32  ;;  %v7397_v20 = vpop.f32.mrb[30].mxu0  ;;  %v7377_v63 = vadd.f32 %v7376_v26, %v7375_v12  ;;  %v7177_v8 = vld [vmem:[#allocation10 + $0x1] ss:$0 sm:$0xff] }
 0xc66   : > { %v7398_v29 = vpop.f32.mrb[31].mxu0 }
 0xc67   : > { %v3745_v27 = vadd.f32 %v7396_v18, %v3704_v37  ;;  %v3707_v38 = vadd.f32 %v7377_v63, %v7143_v62  ;;  %v7399_v43 = vadd.f32 %v7398_v29, %v7397_v20  ;;  %v7178_v63 = vld [vmem:[#allocation11 + $0x1] ss:$0 sm:$0xff] }
 0xc69   : > { %v3758_v44 = vmul.f32 %v7176_v1, %v3745_v27  ;;  %v3748_v23 = vadd.f32 %v7399_v43, %v3707_v38  ;;  %v7179_v43 = vld [vmem:[%s10554_s0 + $0x3] sm:$0x7] }
 0xc6a   : > { %v3852_v57 = vrot.slane %v7179_v43, %v9691_v28  ;;  %v3848_v59 = vrot.slane %v7179_v43, %v9516_v13 }
 0xc6b   : > { %v3759_v45 = vmul.f32 %v7176_v1, %v3748_v23  ;;  %v9929_v46 = vadd.f32 %v3758_v44, %v9857_v52  ;;  %v3844_v44 = vrot.slane %v7179_v43, %v9508_v11 }
 0xc6d   : > { %3766 = vadd.xlane.f32.xlu1 %v9929_v46  ;;  %v9933_v47 = vadd.f32 %v3759_v45, %v9861_v54 }
 0xc6f   : > { %3768 = vadd.xlane.f32.xlu0 %v9933_v47 }
 0xcfa   : > { %v3767_v52 = vpop.xlane.xlu1 %3766 }
 0xcfb   : > { %v3770_v54 = vmul.f32 0.0078125, %v3767_v52 }
 0xcfc   : > { %v3769_v2 = vpop.xlane.xlu0 %3768 }
 0xcfd   : > { %v3772_v9 = vsub.f32 %v9929_v46, %v3770_v54  ;;  %v3771_v14 = vmul.f32 0.0078125, %v3769_v2 }
 0xcff   : > { %v3773_v36 = vsub.f32 %v9933_v47, %v3771_v14  ;;  %v3774_v16 = vmul.f32 %v3772_v9, %v3772_v9 }
 0xd01   : > { %3776 = vadd.xlane.f32.xlu1 %v3774_v16  ;;  %v3775_v17 = vmul.f32 %v3773_v36, %v3773_v36 }
 0xd03   : > { %3778 = vadd.xlane.f32.xlu0 %v3775_v17 }
 0xd8e   : > { %v3777_v31 = vpop.xlane.xlu1 %3776 }
 0xd8f   : > { %v3780_v22 = vmul.f32 0.0078125, %v3777_v31 }
 0xd90   : > { %v3779_v62 = vpop.xlane.xlu0 %3778 }
 0xd91   : > { %v3782_v0 = vadd.f32 1e-05, %v3780_v22  ;;  %v3781_v32 = vmul.f32 0.0078125, %v3779_v62 }
 0xd93   : > { %8237 = vrsqrt.f32 %v3782_v0  ;;  %v3783_v33 = vadd.f32 1e-05, %v3781_v32 }
 0xd95   : > { %8239 = vrsqrt.f32 %v3783_v33 }
 0xd9d   : > { %v8238_v12 = vpop.eup %8237 }
 0xd9e   : > { %v3786_v26 = vmul.f32 %v8238_v12, %v3772_v9 }
 0xd9f   : > { %v8240_v37 = vpop.eup %8239 }
 0xda0   : > { %v3787_v18 = vmul.f32 %v8240_v37, %v3773_v36  ;;  %v3794_v20 = vmul.f32 %v7177_v8, %v3786_v26 }
 0xda2   : > { %v3795_v1 = vmul.f32 %v7177_v8, %v3787_v18  ;;  %v3802_v29 = vadd.f32 %v7178_v63, %v3794_v20 }
 0xda4   : > { %v3803_v27 = vadd.f32 %v7178_v63, %v3795_v1 }
 0xda6   : > { %v3804_v38 = vpack.c.bf16 %v3803_v27, %v3802_v29 }
 0xda8   : > { %4017 = vmatmul.mubr.bf16.vlgmr.msra.gmra.mrb[28].mxu1 %v3804_v38  ;;  %7592 = vmatmul.mubr.bf16.vlgmr.msra.gmra.mrb[32].mxu0 %v3804_v38 }
 0xda9   : > { %7597 = vmatprep.mubr.msk.bf16.mxu1 %vm8885_vm0, %v8883_v24  ;;  %7621 = vmatprep.mubr.msk.bf16.mxu0 %vm8885_vm0, %v8883_v24 }
 0xe7b   : > { %v4018_v23 = vpop.f32.mrb[28].mxu1  ;;  %v4061_v45 = vpop.f32.mrb[32].mxu0 }
 0xe7c   : > { %v9955_v56 = vadd.f32 %v4018_v23, %v3844_v44  ;;  %v4020_v60 = vpop.f32.mrb[29].mxu1  ;;  %v7593_v15 = vpop.f32.mrb[33].mxu0  ;;  %v9981_v17 = vadd.f32 %v4061_v45, %v3852_v57 }
 0xe7d   : > { %v4022_v21 = vpop.f32.mrb[30].mxu1  ;;  %v4064_v52 = vpop.f32.mrb[34].mxu0  ;;  %v4021_v36 = vadd.f32 %v4020_v60, %v3848_v59 }
 0xe7e   : > { %v9959_v54 = vadd.f32 %v4022_v21, %v3844_v44  ;;  %v9961_v2 = vadd.f32 %v4064_v52, %v3852_v57  ;;  %v4024_v9 = vpop.f32.mrb[31].mxu1  ;;  %v7594_v14 = vpop.f32.mrb[35].mxu0  ;;  %4070 = vrot.lane.b32.xlu1 %v9955_v56, %s8886_s9 }
 0xe7f   : > { %v4025_v16 = vadd.f32 %v4024_v9, %v3848_v59 }
 0xe80   : > { %4072 = vrot.lane.b32.xlu0 %v9959_v54, %s8886_s9 }
 0xe82   : > { %4366 = vrot.lane.b32.xlu1 %v4021_v36, %s8886_s9 }
 0xe84   : > { %4368 = vrot.lane.b32.xlu0 %v4025_v16, %s8886_s9 }
 0xe86   : > { %4372 = vrot.lane.b32.xlu1 %v4021_v36, %s8887_s22 }
 0xe88   : > { %4380 = vrot.lane.b32.xlu0 %v4025_v16, %s8888_s23 }
 0xe8a   : > { %4378 = vrot.lane.b32.xlu1 %v4021_v36, %s8888_s23 }
 0xe8c   : > { %4078 = vrot.lane.b32.xlu0 %v9959_v54, %s8887_s22 }
 0xe8e   : > { %4374 = vrot.lane.b32.xlu1 %v4025_v16, %s8887_s22 }
 0xe90   : > { %4084 = vrot.lane.b32.xlu0 %v9959_v54, %s8888_s23 }
 0xe92   : > { %4076 = vrot.lane.b32.xlu1 %v9955_v56, %s8887_s22 }
 0xe96   : > { %4082 = vrot.lane.b32.xlu1 %v9955_v56, %s8888_s23 }
 0xe9a   : > { %4662 = vrot.lane.b32.xlu1 %v9981_v17, %s8886_s9 }
 0xef0   : > { %v9985_v3 = vpop.permute.xlu1 %4070 }
 0xef2   : > { %v4073_v25 = vpop.permute.xlu0 %4072 }
 0xef4   : > { %v4367_v34 = vpop.permute.xlu1 %4366 }
 0xef6   : > { %v4369_v35 = vpop.permute.xlu0 %4368 }
 0xef8   : > { %v4373_v5 = vpop.permute.xlu1 %4372 }
 0xef9   : > { %v4384_v6 = vcombine.low %v4021_v36, %v4373_v5  ;;  %v4385_v40 = vcombine.high %v4021_v36, %v4373_v5 }
 0xefa   : > { %v4381_v49 = vpop.permute.xlu0 %4380 }
 0xefb   : > { %v4392_v61 = vrot.slane %v4384_v6, %v9551_v41  ;;  %v4399_v51 = vrot.slane %v4385_v40, %v9551_v41  ;;  %v4468_v7 = vcombine.low %v4369_v35, %v4381_v49  ;;  %v4469_v39 = vcombine.high %v4369_v35, %v4381_v49 }
 0xefc   : > { %v4379_v53 = vpop.permute.xlu1 %4378 }
 0xefd   : > { %v4400_v42 = vcombine.low %v4367_v34, %v4379_v53  ;;  %v4401_v55 = vcombine.high %v4367_v34, %v4379_v53  ;;  %v4476_v26 = vrot.slane %v4468_v7, %v9551_v41  ;;  %v4483_v37 = vrot.slane %v4469_v39, %v9551_v41 }
 0xefe   : > { %v4079_v58 = vpop.permute.xlu0 %4078 }
 0xeff   : > { %v4408_v4 = vrot.slane %v4400_v42, %v9551_v41  ;;  %v4415_v30 = vrot.slane %v4401_v55, %v9551_v41  ;;  %v4156_v18 = vcombine.low %v9959_v54, %v4079_v58  ;;  %v4157_v20 = vcombine.high %v9959_v54, %v4079_v58 }
 0xf00   : > { %v4375_v31 = vpop.permute.xlu1 %4374 }
 0xf01   : > { %v4416_v22 = vcombine.low %v4392_v61, %v4408_v4  ;;  %v4417_v62 = vcombine.high %v4392_v61, %v4408_v4  ;;  %v4432_v0 = vcombine.low %v4399_v51, %v4415_v30  ;;  %v4433_v32 = vcombine.high %v4399_v51, %v4415_v30 }
 0xf02   : > { %v4452_v33 = vcombine.low %v4025_v16, %v4375_v31  ;;  %v4453_v12 = vcombine.high %v4025_v16, %v4375_v31  ;;  %v4085_v8 = vpop.permute.xlu0 %4084  ;;  %v4164_v21 = vrot.slane %v4156_v18, %v9551_v41  ;;  %v4171_v52 = vrot.slane %v4157_v20, %v9551_v41 }
 0xf03   : > { %v4424_v63 = vrot.slane %v4416_v22, %v9554_v48  ;;  %v4431_v1 = vrot.slane %v4417_v62, %v9554_v48  ;;  %v4440_v38 = vrot.slane %v4432_v0, %v9554_v48  ;;  %v4447_v43 = vrot.slane %v4433_v32, %v9554_v48 }
 0xf04   : > { %v4460_v29 = vrot.slane %v4452_v33, %v9551_v41  ;;  %v4467_v27 = vrot.slane %v4453_v12, %v9551_v41  ;;  %v4172_v44 = vcombine.low %v4073_v25, %v4085_v8  ;;  %v4173_v23 = vcombine.high %v4073_v25, %v4085_v8  ;;  %v4077_v45 = vpop.permute.xlu1 %4076 }
 0xf05   : > { %v4520_v54 = vcombine.low %v4424_v63, %v4431_v1  ;;  %v7208_v9 = vcombine.high %v4424_v63, %v4431_v1  ;;  %v4536_v16 = vcombine.low %v4440_v38, %v4447_v43  ;;  %v7209_v34 = vcombine.high %v4440_v38, %v4447_v43 }
 0xf06   : > { %v4484_v57 = vcombine.low %v4460_v29, %v4476_v26  ;;  %v4485_v59 = vcombine.high %v4460_v29, %v4476_v26  ;;  %v4500_v60 = vcombine.low %v4467_v27, %v4483_v37  ;;  %v4501_v15 = vcombine.high %v4467_v27, %v4483_v37 }
 0xf07   : > { %v4180_v35 = vrot.slane %v4172_v44, %v9551_v41  ;;  %v4187_v25 = vrot.slane %v4173_v23, %v9551_v41  ;;  %v10010_v58 = vrot.slane %v4520_v54, %v9551_v41  ;;  %v10013_v7 = vrot.slane %v7208_v9, %v9551_v41 }
 0xf08   : > { %v4492_v14 = vrot.slane %v4484_v57, %v9554_v48  ;;  %v4499_v36 = vrot.slane %v4485_v59, %v9554_v48  ;;  %v4508_v5 = vrot.slane %v4500_v60, %v9554_v48  ;;  %v4515_v6 = vrot.slane %v4501_v15, %v9554_v48  ;;  %v4083_v51 = vpop.permute.xlu1 %4082 }
 0xf09   : > { %v4188_v53 = vcombine.low %v4164_v21, %v4180_v35  ;;  %v4189_v42 = vcombine.high %v4164_v21, %v4180_v35  ;;  %v4204_v55 = vcombine.low %v4171_v52, %v4187_v25  ;;  %v4205_v61 = vcombine.high %v4171_v52, %v4187_v25 }
 0xf0a   : > { %v4588_v40 = vcombine.low %v4492_v14, %v4499_v36  ;;  %v7210_v49 = vcombine.high %v4492_v14, %v4499_v36  ;;  %v4088_v39 = vcombine.low %v9955_v56, %v4077_v45  ;;  %v4089_v4 = vcombine.high %v9955_v56, %v4077_v45 }
 0xf0b   : > { %v4196_v30 = vrot.slane %v4188_v53, %v9554_v48  ;;  %v4203_v31 = vrot.slane %v4189_v42, %v9554_v48  ;;  %v4212_v22 = vrot.slane %v4204_v55, %v9554_v48  ;;  %v4219_v62 = vrot.slane %v4205_v61, %v9554_v48 }
 0xf0c   : > { %v10022_v0 = vrot.slane %v4536_v16, %v9551_v41  ;;  %v10025_v32 = vrot.slane %v7209_v34, %v9551_v41  ;;  %v4104_v33 = vcombine.low %v9985_v3, %v4083_v51  ;;  %v4105_v12 = vcombine.high %v9985_v3, %v4083_v51 }
 0xf0d   : > { %v10030_v56 = vrot.slane %v4588_v40, %v9551_v41  ;;  %v10033_v8 = vrot.slane %v7210_v49, %v9551_v41  ;;  %v4604_v26 = vcombine.low %v4508_v5, %v4515_v6  ;;  %v7211_v37 = vcombine.high %v4508_v5, %v4515_v6 }
 0xf0e   : > { %v4096_v18 = vrot.slane %v4088_v39, %v9551_v41  ;;  %v4103_v20 = vrot.slane %v4089_v4, %v9551_v41  ;;  %v4112_v63 = vrot.slane %v4104_v33, %v9551_v41  ;;  %v4119_v1 = vrot.slane %v4105_v12, %v9551_v41 }
 0xf0f   : > { %v4292_v29 = vcombine.low %v4196_v30, %v4203_v31  ;;  %v7206_v27 = vcombine.high %v4196_v30, %v4203_v31  ;;  %v4308_v38 = vcombine.low %v4212_v22, %v4219_v62  ;;  %v7207_v3 = vcombine.high %v4212_v22, %v4219_v62 }
 0xf10   : > { %v4120_v43 = vcombine.low %v4096_v18, %v4112_v63  ;;  %v4121_v44 = vcombine.high %v4096_v18, %v4112_v63  ;;  %v4136_v23 = vcombine.low %v4103_v20, %v4119_v1  ;;  %v4137_v45 = vcombine.high %v4103_v20, %v4119_v1 }
 0xf11   : > { %v4611_v57 = vrot.slane %v4604_v26, %v9551_v41  ;;  %v4619_v59 = vrot.slane %v7211_v37, %v9551_v41  ;;  %v4552_v60 = vcombine.low %v10010_v58, %v10013_v7  ;;  %v4568_v15 = vcombine.low %v10022_v0, %v10025_v32 }
 0xf12   : > { %v4128_v21 = vrot.slane %v4120_v43, %v9554_v48  ;;  %v4135_v52 = vrot.slane %v4121_v44, %v9554_v48  ;;  %v4144_v54 = vrot.slane %v4136_v23, %v9554_v48  ;;  %v4151_v9 = vrot.slane %v4137_v45, %v9554_v48 }
 0xf13   : > { %v10050_v14 = vrot.slane %v4292_v29, %v9551_v41  ;;  %v10053_v36 = vrot.slane %v7206_v27, %v9551_v41  ;;  %v10056_v16 = vrot.slane %v4308_v38, %v9551_v41  ;;  %v4323_v34 = vrot.slane %v7207_v3, %v9551_v41 }
 0xf14   : > { %v4224_v35 = vcombine.low %v4128_v21, %v4135_v52  ;;  %v7204_v25 = vcombine.high %v4128_v21, %v4135_v52  ;;  %v4240_v5 = vcombine.low %v4144_v54, %v4151_v9  ;;  %v7205_v6 = vcombine.high %v4144_v54, %v4151_v9 }
 0xf15   : > { %v4560_v40 = vrot.slane %v4552_v60, %v9554_v48  ;;  %v4576_v49 = vrot.slane %v4568_v15, %v9554_v48  ;;  %v4620_v53 = vcombine.low %v10030_v56, %v10033_v8  ;;  %v4636_v42 = vcombine.low %v4611_v57, %v4619_v59 }
 0xf16   : > { %v4231_v55 = vrot.slane %v4224_v35, %v9551_v41  ;;  %v4239_v61 = vrot.slane %v7204_v25, %v9551_v41  ;;  %v4247_v51 = vrot.slane %v4240_v5, %v9551_v41  ;;  %v4255_v39 = vrot.slane %v7205_v6, %v9551_v41 }
 0xf17   : > { %v4324_v4 = vcombine.low %v10050_v14, %v10053_v36  ;;  %v4340_v30 = vcombine.low %v10056_v16, %v4323_v34  ;;  %v4628_v31 = vrot.slane %v4620_v53, %v9554_v48  ;;  %v4644_v22 = vrot.slane %v4636_v42, %v9554_v48 }
 0xf18   : > { %v4256_v62 = vcombine.low %v4231_v55, %v4239_v61  ;;  %v4272_v33 = vcombine.low %v4247_v51, %v4255_v39  ;;  %v4584_v12 = vcombine.low %v4560_v40, %v4576_v49  ;;  %v4621_v3 = vcombine.high %v10030_v56, %v10033_v8 }
 0xf19   : > { %v4652_v26 = vcombine.low %v4628_v31, %v4644_v22  ;;  %v4332_v20 = vrot.slane %v4324_v4, %v9554_v48  ;;  %v4348_v63 = vrot.slane %v4340_v30, %v9554_v48  ;;  %v4653_v29 = vcombine.high %v4628_v31, %v4644_v22 }
 0xf1a   : > { %v4264_v37 = vrot.slane %v4256_v62, %v9554_v48  ;;  %v4280_v18 = vrot.slane %v4272_v33, %v9554_v48  ;;  %v4637_v43 = vcombine.high %v4611_v57, %v4619_v59  ;;  %v4585_v23 = vcombine.high %v4560_v40, %v4576_v49 }
 0xf1b   : > { %v4656_v1 = vpack.c.bf16 %v4652_v26, %v4584_v12  ;;  %v4356_v44 = vcombine.low %v4332_v20, %v4348_v63  ;;  %v4553_v45 = vcombine.high %v10010_v58, %v10013_v7  ;;  %v4569_v60 = vcombine.high %v10022_v0, %v10025_v32 }
 0xf1c   : > { %v4288_v38 = vcombine.low %v4264_v37, %v4280_v18  ;;  %v4657_v21 = vpack.c.bf16 %v4653_v29, %v4585_v23  ;;  %v4635_v52 = vrot.slane %v4621_v3, %v9554_v48  ;;  %v4651_v54 = vrot.slane %v4637_v43, %v9554_v48 }
 0xf1d   : > { %v4960_v27 = vsel %vm2095_vm1, %v4656_v1, 0  ;;  %v4567_v56 = vrot.slane %v4553_v45, %v9554_v48  ;;  %v4583_v8 = vrot.slane %v4569_v60, %v9554_v48  ;;  %v4257_v58 = vcombine.high %v4231_v55, %v4239_v61 }
 0xf1e   : > { %7596 = vmatpush3.bf16.xpose.msra.mxu1 %v4960_v27  ;;  %v4360_v15 = vpack.c.bf16 %v4356_v44, %v4288_v38  ;;  %v5007_v57 = vsel %vm2095_vm1, %v4657_v21, 0  ;;  %v4654_v59 = vcombine.low %v4635_v52, %v4651_v54  ;;  %v4273_v7 = vcombine.high %v4247_v51, %v4255_v39 }
 0xf1f   : > { %7601 = vmatprep.subr.bf16.mxu1 %v8883_v24  ;;  %v4289_v0 = vcombine.high %v4264_v37, %v4280_v18  ;;  %v4586_v32 = vcombine.low %v4567_v56, %v4583_v8  ;;  %v4325_v9 = vcombine.high %v10050_v14, %v10053_v36  ;;  %v4341_v35 = vcombine.high %v10056_v16, %v4323_v34 }
 0xf20   : > { %v4357_v25 = vcombine.high %v4332_v20, %v4348_v63  ;;  %v4271_v6 = vrot.slane %v4257_v58, %v9554_v48  ;;  %v4287_v40 = vrot.slane %v4273_v7, %v9554_v48  ;;  %v4655_v61 = vcombine.high %v4635_v52, %v4651_v54 }
 0xf21   : > { %v4658_v5 = vpack.c.bf16 %v4654_v59, %v4586_v32  ;;  %v4339_v53 = vrot.slane %v4325_v9, %v9554_v48  ;;  %v4355_v42 = vrot.slane %v4341_v35, %v9554_v48  ;;  %v4587_v36 = vcombine.high %v4567_v56, %v4583_v8  ;;  %v10127_v35 = vpop.permute.xlu1 %4662 }
 0xf22   : > { %v4361_v49 = vpack.c.bf16 %v4357_v25, %v4289_v0  ;;  %v4290_v14 = vcombine.low %v4271_v6, %v4287_v40  ;;  %v4291_v4 = vcombine.high %v4271_v6, %v4287_v40 }
 0xf23   : > { %v5054_v55 = vsel %vm2095_vm1, %v4658_v5, 0  ;;  %v4358_v16 = vcombine.low %v4339_v53, %v4355_v42  ;;  %v4659_v34 = vpack.c.bf16 %v4655_v61, %v4587_v36  ;;  %v4359_v30 = vcombine.high %v4339_v53, %v4355_v42 }
 0xf25   : > { %7598 = vmatmul.mubr.msk.bf16.vlgmr.msra.gmra.mrb[32].mxu1 %vm2095_vm1, %v4360_v15  ;;  %v4362_v51 = vpack.c.bf16 %v4358_v16, %v4290_v14  ;;  %v5101_v39 = vsel %vm2095_vm1, %v4659_v34, 0  ;;  %v4363_v31 = vpack.c.bf16 %v4359_v30, %v4291_v4 }
 0xf26   : > { %7602 = vmatpush3.bf16.xpose.msra.mxu1 %v5007_v57  ;;  %7603 = vmatprep.mubr.msk.bf16.mxu1 %vm8885_vm0, %v8883_v24 }
 0xf27   : > { %7607 = vmatprep.subr.bf16.mxu1 %v8883_v24 }
 0xf2d   : > { %7604 = vmatmul.mubr.msk.bf16.vlgmr.msra.gmra.mrb[36].mxu1 %vm2095_vm1, %v4361_v49 }
 0xf2e   : > { %7608 = vmatpush3.bf16.xpose.msra.mxu1 %v5054_v55  ;;  %7609 = vmatprep.mubr.msk.bf16.mxu1 %vm8885_vm0, %v8883_v24 }
 0xf2f   : > { %7613 = vmatprep.subr.bf16.mxu1 %v8883_v24 }
 0xf35   : > { %7610 = vmatmul.mubr.msk.bf16.vlgmr.msra.gmra.mrb[40].mxu1 %vm2095_vm1, %v4362_v51 }
 0xf36   : > { %7614 = vmatpush3.bf16.xpose.msra.mxu1 %v5101_v39  ;;  %7615 = vmatprep.mubr.msk.bf16.mxu1 %vm8885_vm0, %v8883_v24 }
 0xf37   : > { %7625 = vmatprep.subr.bf16.mxu1 %v8883_v24 }
 0xf3d   : > { %7616 = vmatmul.mubr.msk.bf16.vlgmr.msra.gmra.mrb[44].mxu1 %vm2095_vm1, %v4363_v31 }
 0xf3e   : > { %7627 = vmatprep.mubr.msk.bf16.mxu1 %vm8885_vm0, %v8883_v24 }
 0xff8   : > { %v4996_v22 = vpop.f32.mrb[32].mxu1 }
 0xff9   : > { %v5144_v62 = vmul.f32 0.17677669, %v4996_v22  ;;  %v7599_v33 = vpop.f32.mrb[33].mxu1 }
 0xffa   : > { %v4999_v12 = vpop.f32.mrb[34].mxu1 }
 0xffb   : > { %v5145_v26 = vmul.f32 0.17677669, %v4999_v12  ;;  %v7600_v37 = vpop.f32.mrb[35].mxu1  ;;  %v5152_v18 = vsel %vm2292_vm2, %v5144_v62, -inf }
 0xffc   : > { %5153 = vmax.xlane.f32.xlu1 %v5152_v18 }
 0xffd   : > { %v5155_v20 = vsel %vm2292_vm2, %v5145_v26, -inf }
 0xffe   : > { %5156 = vmax.xlane.f32.xlu0 %v5155_v20 }
0x1000   : > { %v5043_v63 = vpop.f32.mrb[36].mxu1 }
0x1001   : > { %v5146_v1 = vmul.f32 0.17677669, %v5043_v63  ;;  %v7605_v29 = vpop.f32.mrb[37].mxu1 }
0x1002   : > { %v5046_v27 = vpop.f32.mrb[38].mxu1 }
0x1003   : > { %v5147_v38 = vmul.f32 0.17677669, %v5046_v27  ;;  %v7606_v3 = vpop.f32.mrb[39].mxu1  ;;  %v5158_v43 = vsel %vm2292_vm2, %v5146_v1, -inf }
0x1004   : > { %5159 = vmax.xlane.f32.xlu0 %v5158_v43 }
0x1005   : > { %v5161_v44 = vsel %vm2292_vm2, %v5147_v38, -inf }
0x1008   : > { %5162 = vmax.xlane.f32.xlu0 %v5161_v44  ;;  %v5090_v23 = vpop.f32.mrb[40].mxu1 }
0x1009   : > { %v5148_v45 = vmul.f32 0.17677669, %v5090_v23  ;;  %v7611_v60 = vpop.f32.mrb[41].mxu1 }
0x100a   : > { %v5093_v15 = vpop.f32.mrb[42].mxu1 }
0x100b   : > { %v5149_v21 = vmul.f32 0.17677669, %v5093_v15  ;;  %v7612_v52 = vpop.f32.mrb[43].mxu1  ;;  %v5164_v54 = vsel %vm2292_vm2, %v5148_v45, -inf }
0x100c   : > { %5165 = vmax.xlane.f32.xlu1 %v5164_v54 }
0x100d   : > { %v5167_v56 = vsel %vm2292_vm2, %v5149_v21, -inf }
0x100e   : > { %5168 = vmax.xlane.f32.xlu0 %v5167_v56 }
0x1010   : > { %v5137_v8 = vpop.f32.mrb[44].mxu1 }
0x1011   : > { %v5150_v57 = vmul.f32 0.17677669, %v5137_v8  ;;  %v7617_v59 = vpop.f32.mrb[45].mxu1 }
0x1012   : > { %v5140_v58 = vpop.f32.mrb[46].mxu1 }
0x1013   : > { %v5151_v7 = vmul.f32 0.17677669, %v5140_v58  ;;  %v7618_v0 = vpop.f32.mrb[47].mxu1  ;;  %v5170_v32 = vsel %vm2292_vm2, %v5150_v57, -inf }
0x1014   : > { %5171 = vmax.xlane.f32.xlu1 %v5170_v32 }
0x1015   : > { %v5173_v9 = vsel %vm2292_vm2, %v5151_v7, -inf }
0x1016   : > { %5174 = vmax.xlane.f32.xlu0 %v5173_v9 }
0x1025   : > { %4668 = vrot.lane.b32.xlu1 %v9981_v17, %s8887_s22 }
0x1029   : > { %4670 = vrot.lane.b32.xlu1 %v9961_v2, %s8887_s22 }
0x102c   : > { %4664 = vrot.lane.b32.xlu0 %v9961_v2, %s8886_s9 }
0x1089   : > { %v5154_v25 = vpop.xlane.xlu1 %5153 }
0x108a   : > { %v5176_v5 = vsub.f32 %v5144_v62, %v5154_v25 }
0x108b   : > { %v5157_v6 = vpop.xlane.xlu0 %5156 }
0x108c   : > { %v5184_v40 = vmul.f32 1.442695, %v5176_v5  ;;  %v5177_v49 = vsub.f32 %v5145_v26, %v5157_v6 }
0x108e   : > { %8241 = vpow2.f32 %v5184_v40  ;;  %v5186_v53 = vmul.f32 1.442695, %v5177_v49 }
0x1090   : > { %8243 = vpow2.f32 %v5186_v53 }
0x1091   : > { %v5160_v42 = vpop.xlane.xlu0 %5159 }
0x1092   : > { %v5178_v55 = vsub.f32 %v5146_v1, %v5160_v42 }
0x1094   : > { %v5188_v61 = vmul.f32 1.442695, %v5178_v55 }
0x1095   : > { %v5163_v4 = vpop.xlane.xlu0 %5162 }
0x1096   : > { %8245 = vpow2.f32 %v5188_v61  ;;  %v5179_v30 = vsub.f32 %v5147_v38, %v5163_v4 }
0x1098   : > { %v10129_v14 = vpop.eup %8241  ;;  %v5190_v62 = vmul.f32 1.442695, %v5179_v30 }
0x1099   : > { %v5200_v36 = vsel %vm2292_vm2, %v10129_v14, 0.0  ;;  %v5166_v31 = vpop.xlane.xlu1 %5165 }
0x109a   : > { %v10133_v16 = vpop.eup %8243  ;;  %5201 = vadd.xlane.f32.xlu1 %v5200_v36  ;;  %v5180_v26 = vsub.f32 %v5148_v45, %v5166_v31  ;;  %8247 = vpow2.f32 %v5190_v62 }
0x109b   : > { %v5203_v34 = vsel %vm2292_vm2, %v10133_v16, 0.0  ;;  %v5169_v22 = vpop.xlane.xlu0 %5168 }
0x109c   : > { %5204 = vadd.xlane.f32.xlu0 %v5203_v34  ;;  %v5181_v33 = vsub.f32 %v5149_v21, %v5169_v22  ;;  %v5192_v63 = vmul.f32 1.442695, %v5180_v26 }
0x109e   : > { %v5194_v37 = vmul.f32 1.442695, %v5181_v33 }
0x10a0   : > { %v10137_v51 = vpop.eup %8245  ;;  %8249 = vpow2.f32 %v5194_v37 }
0x10a1   : > { %v5206_v39 = vsel %vm2292_vm2, %v10137_v51, 0.0  ;;  %v5172_v12 = vpop.xlane.xlu1 %5171  ;;  %8251 = vpow2.f32 %v5192_v63 }
0x10a2   : > { %5207 = vadd.xlane.f32.xlu1 %v5206_v39  ;;  %v5182_v18 = vsub.f32 %v5150_v57, %v5172_v12 }
0x10a3   : > { %v5175_v20 = vpop.xlane.xlu0 %5174 }
0x10a4   : > { %v5196_v1 = vmul.f32 1.442695, %v5182_v18  ;;  %v5183_v29 = vsub.f32 %v5151_v7, %v5175_v20  ;;  %v10145_v3 = vpop.eup %8247 }
0x10a5   : > { %v5209_v38 = vsel %vm2292_vm2, %v10145_v3, 0.0  ;;  %v4669_v54 = vpop.permute.xlu1 %4668 }
0x10a6   : > { %8253 = vpow2.f32 %v5196_v1  ;;  %v5198_v27 = vmul.f32 1.442695, %v5183_v29  ;;  %v4680_v36 = vcombine.low %v9981_v17, %v4669_v54 }
0x10a7   : > { %v4665_v56 = vpop.permute.xlu0 %4664 }
0x10a8   : > { %8255 = vpow2.f32 %v5198_v27  ;;  %v4688_v18 = vrot.slane %v4680_v36, %v9551_v41 }
0x10a9   : > { %v4671_v8 = vpop.permute.xlu1 %4670 }
0x10aa   : > { %v10149_v43 = vpop.eup %8249  ;;  %v4748_v58 = vcombine.low %v9961_v2, %v4671_v8  ;;  %v4749_v7 = vcombine.high %v9961_v2, %v4671_v8 }
0x10ab   : > { %v10151_v44 = vpop.eup %8251  ;;  %v5215_v23 = vsel %vm2292_vm2, %v10149_v43, 0.0 }
0x10ac   : > { %v5212_v60 = vsel %vm2292_vm2, %v10151_v44, 0.0  ;;  %v4756_v5 = vrot.slane %v4748_v58, %v9551_v41  ;;  %v4763_v6 = vrot.slane %v4749_v7, %v9551_v41 }
0x10b0   : > { %v10155_v45 = vpop.eup %8253 }
0x10b1   : > { %v5218_v15 = vsel %vm2292_vm2, %v10155_v45, 0.0 }
0x10b2   : > { %4676 = vrot.lane.b32.xlu0 %v9961_v2, %s8888_s23  ;;  %v10161_v21 = vpop.eup %8255  ;;  %v4681_v2 = vcombine.high %v9981_v17, %v4669_v54 }
0x10b3   : > { %4674 = vrot.lane.b32.xlu1 %v9981_v17, %s8888_s23  ;;  %v5221_v52 = vsel %vm2292_vm2, %v10161_v21, 0.0 }
0x10b4   : > { %v4695_v17 = vrot.slane %v4681_v2, %v9551_v41 }
0x10d1   : > { %5210 = vadd.xlane.f32.xlu0 %v5209_v38 }
0x10d5   : > { %5216 = vadd.xlane.f32.xlu0 %v5215_v23 }
0x10d7   : > { %5213 = vadd.xlane.f32.xlu1 %v5212_v60 }
0x10d9   : > { %5219 = vadd.xlane.f32.xlu0 %v5218_v15 }
0x10dd   : > { %5222 = vadd.xlane.f32.xlu0 %v5221_v52 }
0x1127   : > { %v5202_v59 = vpop.xlane.xlu1 %5201 }
0x1129   : > { %v5205_v57 = vpop.xlane.xlu0 %5204 }
0x112a   : > { %8257 = vrcp.f32 %v5205_v57 }
0x112b   : > { %8259 = vrcp.f32 %v5202_v59 }
0x112d   : > { %v4677_v0 = vpop.permute.xlu0 %4676 }
0x112e   : > { %v4764_v32 = vcombine.low %v4665_v56, %v4677_v0  ;;  %v4765_v9 = vcombine.high %v4665_v56, %v4677_v0 }
0x112f   : > { %v10167_v25 = vpop.xlane.xlu1 %5207 }
0x1130   : > { %v4772_v40 = vrot.slane %v4764_v32, %v9551_v41  ;;  %v4779_v49 = vrot.slane %v4765_v9, %v9551_v41  ;;  %8261 = vrcp.f32 %v10167_v25 }
0x1132   : > { %v4780_v53 = vcombine.low %v4756_v5, %v4772_v40  ;;  %v4781_v42 = vcombine.high %v4756_v5, %v4772_v40  ;;  %v4796_v55 = vcombine.low %v4763_v6, %v4779_v49  ;;  %v4797_v61 = vcombine.high %v4763_v6, %v4779_v49 }
0x1133   : > { %v4675_v34 = vpop.permute.xlu1 %4674 }
0x1134   : > { %v4788_v39 = vrot.slane %v4780_v53, %v9554_v48  ;;  %v4795_v4 = vrot.slane %v4781_v42, %v9554_v48  ;;  %v4804_v30 = vrot.slane %v4796_v55, %v9554_v48  ;;  %v4811_v31 = vrot.slane %v4797_v61, %v9554_v48  ;;  %v8258_v61 = vpop.eup %8257 }
0x1135   : > { %v4696_v22 = vcombine.low %v10127_v35, %v4675_v34  ;;  %v4697_v62 = vcombine.high %v10127_v35, %v4675_v34 }
0x1136   : > { %v4884_v33 = vcombine.low %v4788_v39, %v4795_v4  ;;  %v7214_v12 = vcombine.high %v4788_v39, %v4795_v4  ;;  %v4900_v26 = vcombine.low %v4804_v30, %v4811_v31  ;;  %v7215_v37 = vcombine.high %v4804_v30, %v4811_v31 }
0x1137   : > { %v4704_v20 = vrot.slane %v4696_v22, %v9551_v41  ;;  %v4711_v63 = vrot.slane %v4697_v62, %v9551_v41 }
0x1138   : > { %v4891_v23 = vrot.slane %v4884_v33, %v9551_v41  ;;  %v4899_v35 = vrot.slane %v7214_v12, %v9551_v41  ;;  %v4907_v60 = vrot.slane %v4900_v26, %v9551_v41  ;;  %v4915_v15 = vrot.slane %v7215_v37, %v9551_v41  ;;  %v8260_v12 = vpop.eup %8259 }
0x1139   : > { %v4712_v1 = vcombine.low %v4688_v18, %v4704_v20  ;;  %v4713_v29 = vcombine.high %v4688_v18, %v4704_v20  ;;  %v4728_v27 = vcombine.low %v4695_v17, %v4711_v63  ;;  %v4729_v38 = vcombine.high %v4695_v17, %v4711_v63 }
0x113a   : > { %v4916_v32 = vcombine.low %v4891_v23, %v4899_v35  ;;  %v4932_v9 = vcombine.low %v4907_v60, %v4915_v15  ;;  %v4917_v55 = vcombine.high %v4891_v23, %v4899_v35  ;;  %v4933_v59 = vcombine.high %v4907_v60, %v4915_v15 }
0x113b   : > { %v4720_v52 = vrot.slane %v4712_v1, %v9554_v48  ;;  %v4727_v54 = vrot.slane %v4713_v29, %v9554_v48  ;;  %v4736_v56 = vrot.slane %v4728_v27, %v9554_v48  ;;  %v4743_v8 = vrot.slane %v4729_v38, %v9554_v48 }
0x113c   : > { %v4924_v2 = vrot.slane %v4916_v32, %v9554_v48  ;;  %v4940_v34 = vrot.slane %v4932_v9, %v9554_v48  ;;  %v4931_v62 = vrot.slane %v4917_v55, %v9554_v48  ;;  %v4947_v33 = vrot.slane %v4933_v59, %v9554_v48  ;;  %v8087_v55 = vld [vmem:[#allocation14 + $0x50] sm:$0xff]   ;;  %v8088_v59 = vld [vmem:[#allocation14 + $0x58] sm:$0xff]  }
0x113d   : > { %v4816_v57 = vcombine.low %v4720_v52, %v4727_v54  ;;  %v7212_v58 = vcombine.high %v4720_v52, %v4727_v54  ;;  %v4832_v7 = vcombine.low %v4736_v56, %v4743_v8  ;;  %v7213_v0 = vcombine.high %v4736_v56, %v4743_v8  ;;  %v8262_v52 = vpop.eup %8261 }
0x113e   : > { %v4948_v37 = vcombine.low %v4924_v2, %v4940_v34  ;;  %v4949_v17 = vcombine.high %v4924_v2, %v4940_v34  ;;  %v5233_v20 = vmul.f32 %v8258_v61, %v10133_v16  ;;  %v5232_v27 = vmul.f32 %v8260_v12, %v10129_v14 }
0x113f   : > { %v4823_v5 = vrot.slane %v4816_v57, %v9551_v41  ;;  %v4831_v6 = vrot.slane %v7212_v58, %v9551_v41  ;;  %v4839_v40 = vrot.slane %v4832_v7, %v9551_v41  ;;  %v4847_v49 = vrot.slane %v7213_v0, %v9551_v41 }
0x1140   : > { %v4950_v38 = vcombine.low %v4931_v62, %v4947_v33  ;;  %v5240_v23 = vpack.c.bf16 %v5233_v20, %v5232_v27  ;;  %v5234_v8 = vmul.f32 %v8262_v52, %v10137_v51  ;;  %v4951_v7 = vcombine.high %v4931_v62, %v4947_v33 }
0x1141   : > { %v4848_v53 = vcombine.low %v4823_v5, %v4831_v6  ;;  %v4849_v42 = vcombine.high %v4823_v5, %v4831_v6  ;;  %v4864_v36 = vcombine.low %v4839_v40, %v4847_v49  ;;  %v4865_v39 = vcombine.high %v4839_v40, %v4847_v49 }
0x1143   : > { %v4856_v4 = vrot.slane %v4848_v53, %v9554_v48  ;;  %v4872_v30 = vrot.slane %v4864_v36, %v9554_v48  ;;  %v4863_v31 = vrot.slane %v4849_v42, %v9554_v48  ;;  %v4879_v22 = vrot.slane %v4865_v39, %v9554_v48 }
0x1145   : > { %v4880_v26 = vcombine.low %v4856_v4, %v4872_v30  ;;  %v4881_v18 = vcombine.high %v4856_v4, %v4872_v30  ;;  %v4882_v29 = vcombine.low %v4863_v31, %v4879_v22  ;;  %v4883_v56 = vcombine.high %v4863_v31, %v4879_v22 }
0x1147   : > { %v4952_v63 = vpack.c.bf16 %v4948_v37, %v4880_v26  ;;  %v4953_v1 = vpack.c.bf16 %v4949_v17, %v4881_v18  ;;  %v4954_v35 = vpack.c.bf16 %v4950_v38, %v4882_v29  ;;  %v4955_v32 = vpack.c.bf16 %v4951_v7, %v4883_v56 }
0x1149   : > { %7620 = vmatpush3.bf16.msra.mxu0 %v4952_v63  ;;  %7626 = vmatpush3.bf16.msra.mxu1 %v4953_v1 }
0x114a   : > { %7631 = vmatprep.subr.bf16.mxu0 %v8883_v24  ;;  %7637 = vmatprep.subr.bf16.mxu1 %v8883_v24 }
0x114c   : > { %7622 = vmatmul.mubr.msk.bf16.vlgmr.msra.gmra.mrb[36].mxu0 %vm2292_vm2, %v5240_v23 }
0x114d   : > { %7632 = vmatpush3.bf16.msra.mxu0 %v4954_v35  ;;  %7633 = vmatprep.mubr.msk.bf16.mxu0 %vm8885_vm0, %v8883_v24 }
0x114e   : > { %7643 = vmatprep.subr.bf16.mxu0 %v8883_v24 }
0x115e   : > { %v5211_v14 = vpop.xlane.xlu0 %5210 }
0x115f   : > { %8263 = vrcp.f32 %v5211_v14 }
0x1162   : > { %v5217_v16 = vpop.xlane.xlu0 %5216 }
0x1163   : > { %8265 = vrcp.f32 %v5217_v16 }
0x1164   : > { %v5214_v60 = vpop.xlane.xlu1 %5213 }
0x1165   : > { %8267 = vrcp.f32 %v5214_v60 }
0x1166   : > { %v5220_v15 = vpop.xlane.xlu0 %5219 }
0x1167   : > { %8269 = vrcp.f32 %v5220_v15 }
0x1169   : > { %v8264_v54 = vpop.eup %8263 }
0x116a   : > { %v5235_v57 = vmul.f32 %v8264_v54, %v10145_v3  ;;  %v5223_v58 = vpop.xlane.xlu0 %5222 }
0x116b   : > { %8271 = vrcp.f32 %v5223_v58 }
0x116c   : > { %v5241_v0 = vpack.c.bf16 %v5235_v57, %v5234_v8 }
0x116d   : > { %v8266_v25 = vpop.eup %8265 }
0x116e   : > { %7628 = vmatmul.mubr.msk.bf16.vlgmr.msra.gmra.mrb[48].mxu1 %vm2292_vm2, %v5241_v0  ;;  %v5237_v5 = vmul.f32 %v8266_v25, %v10149_v43  ;;  %v8085_v43 = vld [vmem:[#allocation14 + $0x40] sm:$0xff]  }
0x116f   : > { %v8268_v9 = vpop.eup %8267  ;;  %7638 = vmatpush3.bf16.msra.mxu1 %v4955_v32  ;;  %7639 = vmatprep.mubr.msk.bf16.mxu1 %vm8885_vm0, %v8883_v24 }
0x1170   : > { %v5236_v6 = vmul.f32 %v8268_v9, %v10151_v44  ;;  %v8086_v44 = vld [vmem:[#allocation14 + $0x48] sm:$0xff]  }
0x1171   : > { %v8270_v40 = vpop.eup %8269 }
0x1172   : > { %v5242_v51 = vpack.c.bf16 %v5237_v5, %v5236_v6  ;;  %v5238_v49 = vmul.f32 %v8270_v40, %v10155_v45  ;;  %v8089_v45 = vld [vmem:[#allocation14 + $0x60] sm:$0xff]  }
0x1174   : > { %7634 = vmatmul.mubr.msk.bf16.vlgmr.msra.gmra.mrb[40].mxu0 %vm2292_vm2, %v5242_v51 }
0x1175   : > { %v8272_v3 = vpop.eup %8271  ;;  %7659 = vmatprep.mubr.msk.bf16.mxu0 %vm8885_vm0, %v8883_v24  ;;  %7644 = vmatpush3.bf16.msra.mxu0 %v8085_v43 }
0x1176   : > { %v5239_v53 = vmul.f32 %v8272_v3, %v10161_v21  ;;  %7645 = vmatprep.subr.bf16.mxu0 %v8883_v24  ;;  %v8090_v21 = vld [vmem:[#allocation14 + $0x68] sm:$0xff]  }
0x1178   : > { %v5243_v42 = vpack.c.bf16 %v5239_v53, %v5238_v49 }
0x1179   : > { %7646 = vmatpush3.bf16.msra.mxu0 %v8086_v44 }
0x117a   : > { %7640 = vmatmul.mubr.msk.bf16.vlgmr.msra.gmra.mrb[52].mxu1 %vm2292_vm2, %v5243_v42  ;;  %7647 = vmatprep.subr.bf16.mxu0 %v8883_v24 }
0x117b   : > { %6140 = vmatprep.mubr.bf16.mxu1 %v8884_v50 }
0x117d   : > { %7648 = vmatpush3.bf16.msra.mxu0 %v8087_v55 }
0x117e   : > { %7649 = vmatprep.subr.bf16.mxu0 %v8883_v24 }
0x1181   : > { %7650 = vmatpush3.bf16.msra.mxu0 %v8088_v59 }
0x1182   : > { %7651 = vmatprep.subr.bf16.mxu0 %v8883_v24 }
0x1185   : > { %7652 = vmatpush3.bf16.msra.mxu0 %v8089_v45 }
0x1186   : > { %7653 = vmatprep.subr.bf16.mxu0 %v8883_v24 }
0x1189   : > { %7654 = vmatpush3.bf16.msra.mxu0 %v8090_v21 }
0x118a   : > { %7655 = vmatprep.subr.bf16.mxu0 %v8883_v24 }
0x121f   : > { %v5281_v61 = vpop.f32.mrb[36].mxu0 }
0x1220   : > { %v7623_v36 = vpop.f32.mrb[37].mxu0 }
0x1221   : > { %v5284_v2 = vpop.f32.mrb[38].mxu0 }
0x1222   : > { %v7624_v34 = vpop.f32.mrb[39].mxu0 }
0x1241   : > { %v5325_v39 = vpop.f32.mrb[48].mxu1 }
0x1242   : > { %v7629_v4 = vpop.f32.mrb[49].mxu1 }
0x1243   : > { %v5328_v30 = vpop.f32.mrb[50].mxu1 }
0x1244   : > { %v7630_v31 = vpop.f32.mrb[51].mxu1 }
0x1247   : > { %v5369_v22 = vpop.f32.mrb[40].mxu0 }
0x1248   : > { %v5420_v62 = vcombine.low %v5281_v61, %v5369_v22  ;;  %v5421_v33 = vcombine.high %v5281_v61, %v5369_v22  ;;  %v7635_v12 = vpop.f32.mrb[41].mxu0 }
0x1249   : > { %v5372_v26 = vpop.f32.mrb[42].mxu0  ;;  %v8091_v12 = vld [vmem:[#allocation14 + $0x70] sm:$0xff]  }
0x124a   : > { %v5488_v37 = vcombine.low %v5284_v2, %v5372_v26  ;;  %v5489_v18 = vcombine.high %v5284_v2, %v5372_v26  ;;  %v7636_v17 = vpop.f32.mrb[43].mxu0  ;;  %v5428_v27 = vrot.slane %v5420_v62, %v9551_v41  ;;  %v5435_v38 = vrot.slane %v5421_v33, %v9551_v41  ;;  %7656 = vmatpush3.bf16.msra.mxu0 %v8091_v12 }
0x124b   : > { %7657 = vmatprep.subr.bf16.mxu0 %v8883_v24 }
0x124c   : > { %v5496_v57 = vrot.slane %v5488_v37, %v9551_v41  ;;  %v5503_v58 = vrot.slane %v5489_v18, %v9551_v41 }
0x124d   : > { %v5413_v20 = vpop.f32.mrb[52].mxu1 }
0x124e   : > { %v5436_v63 = vcombine.low %v5325_v39, %v5413_v20  ;;  %v5437_v1 = vcombine.high %v5325_v39, %v5413_v20  ;;  %v7641_v29 = vpop.f32.mrb[53].mxu1 }
0x124f   : > { %v5416_v23 = vpop.f32.mrb[54].mxu1 }
0x1250   : > { %v5444_v35 = vrot.slane %v5436_v63, %v9551_v41  ;;  %v5451_v14 = vrot.slane %v5437_v1, %v9551_v41  ;;  %v5504_v16 = vcombine.low %v5328_v30, %v5416_v23  ;;  %v5505_v60 = vcombine.high %v5328_v30, %v5416_v23  ;;  %v7642_v15 = vpop.f32.mrb[55].mxu1 }
0x1252   : > { %v5452_v52 = vcombine.low %v5428_v27, %v5444_v35  ;;  %v5453_v54 = vcombine.high %v5428_v27, %v5444_v35  ;;  %v5468_v56 = vcombine.low %v5435_v38, %v5451_v14  ;;  %v5469_v8 = vcombine.high %v5435_v38, %v5451_v14 }
0x1253   : > { %v5512_v7 = vrot.slane %v5504_v16, %v9551_v41  ;;  %v5519_v0 = vrot.slane %v5505_v60, %v9551_v41 }
0x1254   : > { %v5460_v25 = vrot.slane %v5452_v52, %v9554_v48  ;;  %v5467_v32 = vrot.slane %v5453_v54, %v9554_v48  ;;  %v5476_v9 = vrot.slane %v5468_v56, %v9554_v48  ;;  %v5483_v5 = vrot.slane %v5469_v8, %v9554_v48  ;;  %v8092_v8 = vld [vmem:[#allocation14 + $0x78] sm:$0xff]  }
0x1255   : > { %v5520_v6 = vcombine.low %v5496_v57, %v5512_v7  ;;  %v5521_v51 = vcombine.high %v5496_v57, %v5512_v7  ;;  %v5536_v40 = vcombine.low %v5503_v58, %v5519_v0  ;;  %v5537_v3 = vcombine.high %v5503_v58, %v5519_v0  ;;  %7658 = vmatpush3.bf16.msra.mxu0 %v8092_v8  ;;  %v8111_v8 = vld [vmem:[#allocation22 + $0x160] ss:$16 sps:$4 sm:$0xff]  }
0x1256   : > { %v5556_v49 = vcombine.low %v5460_v25, %v5467_v32  ;;  %v7224_v53 = vcombine.high %v5460_v25, %v5467_v32  ;;  %v5572_v42 = vcombine.low %v5476_v9, %v5483_v5  ;;  %v7225_v43 = vcombine.high %v5476_v9, %v5483_v5 }
0x1257   : > { %v5528_v44 = vrot.slane %v5520_v6, %v9554_v48  ;;  %v5535_v55 = vrot.slane %v5521_v51, %v9554_v48  ;;  %v5544_v59 = vrot.slane %v5536_v40, %v9554_v48  ;;  %v5551_v45 = vrot.slane %v5537_v3, %v9554_v48 }
0x1258   : > { %v5563_v21 = vrot.slane %v5556_v49, %v9551_v41  ;;  %v5571_v61 = vrot.slane %v7224_v53, %v9551_v41  ;;  %v5579_v36 = vrot.slane %v5572_v42, %v9551_v41  ;;  %v5587_v2 = vrot.slane %v7225_v43, %v9551_v41 }
0x1259   : > { %v5624_v34 = vcombine.low %v5528_v44, %v5535_v55  ;;  %v7226_v39 = vcombine.high %v5528_v44, %v5535_v55  ;;  %v5640_v4 = vcombine.low %v5544_v59, %v5551_v45  ;;  %v7227_v30 = vcombine.high %v5544_v59, %v5551_v45 }
0x125a   : > { %v5589_v31 = vcombine.high %v5563_v21, %v5571_v61  ;;  %v5605_v22 = vcombine.high %v5579_v36, %v5587_v2  ;;  %v5588_v62 = vcombine.low %v5563_v21, %v5571_v61  ;;  %v5604_v33 = vcombine.low %v5579_v36, %v5587_v2  ;;  %v7228_v36 = vld [vmem:[#allocation16 + $0x1] ss:$0 sm:$0xff] }
0x125b   : > { %v5631_v26 = vrot.slane %v5624_v34, %v9551_v41  ;;  %v5639_v37 = vrot.slane %v7226_v39, %v9551_v41  ;;  %v5647_v18 = vrot.slane %v5640_v4, %v9551_v41  ;;  %v5655_v17 = vrot.slane %v7227_v30, %v9551_v41  ;;  %v7237_v34 = vld [vmem:[#allocation17 + $0x1] ss:$0 sm:$0xff] }
0x125c   : > { %v5603_v20 = vrot.slane %v5589_v31, %v9554_v48  ;;  %v5619_v63 = vrot.slane %v5605_v22, %v9554_v48  ;;  %v5596_v1 = vrot.slane %v5588_v62, %v9554_v48  ;;  %v5612_v29 = vrot.slane %v5604_v33, %v9554_v48 }
0x125d   : > { %v5657_v27 = vcombine.high %v5631_v26, %v5639_v37  ;;  %v5673_v38 = vcombine.high %v5647_v18, %v5655_v17  ;;  %v5656_v23 = vcombine.low %v5631_v26, %v5639_v37  ;;  %v5672_v35 = vcombine.low %v5647_v18, %v5655_v17  ;;  %v8095_v37 = vld [vmem:[#allocation22 + $0x104] ss:$16 sps:$4 sm:$0xff]   ;;  %v8096_v18 = vld [vmem:[#allocation22 + $0x108] ss:$16 sps:$4 sm:$0xff]   ;;  %v8098_v17 = vld [vmem:[#allocation22 + $0x10c] ss:$16 sps:$4 sm:$0xff]  }
0x125e   : > { %v5622_v14 = vcombine.low %v5603_v20, %v5619_v63  ;;  %v5620_v16 = vcombine.low %v5596_v1, %v5612_v29  ;;  %v5621_v60 = vcombine.high %v5596_v1, %v5612_v29  ;;  %v5623_v15 = vcombine.high %v5603_v20, %v5619_v63  ;;  %v8101_v20 = vld [vmem:[#allocation22 + $0x124] ss:$16 sps:$4 sm:$0xff]   ;;  %6108 = vmatprep.subr.bf16.mxu1 %v8095_v37  ;;  %v8104_v63 = vld [vmem:[#allocation22 + $0x12c] ss:$16 sps:$4 sm:$0xff]   ;;  %v8099_v1 = vld [vmem:[#allocation22 + $0x120] ss:$16 sps:$4 sm:$0xff]  }
0x125f   : > { %v5671_v41 = vrot.slane %v5657_v27, %v9554_v48  ;;  %v5687_v52 = vrot.slane %v5673_v38, %v9554_v48  ;;  %v5664_v54 = vrot.slane %v5656_v23, %v9554_v48  ;;  %v5680_v56 = vrot.slane %v5672_v35, %v9554_v48  ;;  %6151 = vmatprep.subr.bf16.mxu0 %v8098_v17  ;;  %v8141_v37 = vld [vmem:[#allocation25 + $0x140] sm:$0xff]  }
0x1260   : > { %v8143_v17 = vld [vmem:[#allocation25 + $0x100] sm:$0xff]  }
0x1261   : > { %v5690_v57 = vcombine.low %v5671_v41, %v5687_v52  ;;  %v5689_v58 = vcombine.high %v5664_v54, %v5680_v56  ;;  %v5688_v7 = vcombine.low %v5664_v54, %v5680_v56  ;;  %v5691_v0 = vcombine.high %v5671_v41, %v5687_v52  ;;  %v8105_v41 = vld [vmem:[#allocation22 + $0x140] ss:$16 sps:$4 sm:$0xff]   ;;  %v8108_v52 = vld [vmem:[#allocation22 + $0x148] ss:$16 sps:$4 sm:$0xff]   ;;  %v8113_v54 = vld [vmem:[#allocation22 + $0x164] ss:$16 sps:$4 sm:$0xff]  }
0x1262   : > { %v8116_v56 = vld [vmem:[#allocation22 + $0x16c] ss:$16 sps:$4 sm:$0xff]  }
0x1263   : > { %v7923_v25 = vpack.i.bf16 %v5690_v57, %v5622_v14  ;;  %v7918_v32 = vpack.i.bf16 %v5689_v58, %v5621_v60  ;;  %v7928_v9 = vpack.i.bf16 %v5691_v0, %v5623_v15  ;;  %v8107_v60 = vld [vmem:[#allocation22 + $0x144] ss:$16 sps:$4 sm:$0xff]   ;;  %v8110_v15 = vld [vmem:[#allocation22 + $0x14c] ss:$16 sps:$4 sm:$0xff]   ;;  %v8114_v57 = vld [vmem:[#allocation22 + $0x168] ss:$16 sps:$4 sm:$0xff]  }
0x1264   : > { %v8119_v58 = vld [vmem:[#allocation22 + $0x184] ss:$16 sps:$4 sm:$0xff]   ;;  %v8117_v0 = vld [vmem:[#allocation22 + $0x180] ss:$16 sps:$4 sm:$0xff]  }
0x1265   : > { %7924 = vrot.lane.b32.xlu0 %v7923_v25, %s8887_s22  ;;  %7919 = vrot.lane.b32.xlu1 %v7918_v32, %s8888_s23  ;;  %v8120_v25 = vld [vmem:[#allocation22 + $0x188] ss:$16 sps:$4 sm:$0xff]   ;;  %v8125_v32 = vld [vmem:[#allocation22 + $0x1a4] ss:$16 sps:$4 sm:$0xff]   ;;  %s10559_s22 = sld [smem:[#allocation65_spill]] }
0x1269   : > { %7929 = vrot.lane.b32.xlu1 %v7928_v9, %s8886_s9  ;;  %v8128_v9 = vld [vmem:[#allocation22 + $0x1ac] ss:$16 sps:$4 sm:$0xff]  }
0x126b   : > { %s10390_s23 = scalar_lea.hbm %s10559_s22, %s7321_s29 }
0x12d7   : > { %v7925_v5 = vpop.permute.xlu0 %7924  ;;  %v7920_v6 = vpop.permute.xlu1 %7919 }
0x12d8   : > { %v7922_v51 = vunpack.i.h.bf16 %v7920_v6  ;;  %v7921_v40 = vunpack.i.l.bf16 %v7920_v6  ;;  %v7927_v48 = vunpack.i.h.bf16 %v7925_v5  ;;  %v7926_v3 = vunpack.i.l.bf16 %v7925_v5  ;;  %v8123_v5 = vld [vmem:[#allocation22 + $0x1a0] ss:$16 sps:$4 sm:$0xff]   ;;  %v8126_v6 = vld [vmem:[#allocation22 + $0x1a8] ss:$16 sps:$4 sm:$0xff]  }
0x12da   : > { %v5716_v49 = vsel %vm2095_vm1, %v5620_v16, %v7921_v40  ;;  %v5717_v53 = vsel %vm2095_vm1, %v5688_v7, %v7922_v51  ;;  %v8122_v7 = vld [vmem:[#allocation22 + $0x18c] ss:$16 sps:$4 sm:$0xff]   ;;  %v8131_v51 = vld [vmem:[#allocation22 + $0x1c4] ss:$16 sps:$4 sm:$0xff]  }
0x12db   : > { %v7930_v42 = vpop.permute.xlu1 %7929  ;;  %v5718_v55 = vsel %vm2859_vm3, %v5716_v49, %v7926_v3  ;;  %v5719_v59 = vsel %vm2859_vm3, %v5717_v53, %v7927_v48  ;;  %v8134_v40 = vld [vmem:[#allocation22 + $0x1cc] ss:$16 sps:$4 sm:$0xff]   ;;  %v8129_v48 = vld [vmem:[#allocation22 + $0x1c0] ss:$16 sps:$4 sm:$0xff]   ;;  %v8132_v3 = vld [vmem:[#allocation22 + $0x1c8] ss:$16 sps:$4 sm:$0xff]  }
0x12dc   : > { %v7932_v43 = vunpack.i.h.bf16 %v7930_v42  ;;  %v7931_v44 = vunpack.i.l.bf16 %v7930_v42  ;;  %v8137_v49 = vld [vmem:[#allocation22 + $0x1e4] ss:$16 sps:$4 sm:$0xff]   ;;  %v8140_v53 = vld [vmem:[#allocation22 + $0x1ec] ss:$16 sps:$4 sm:$0xff]   ;;  %v8135_v42 = vld [vmem:[#allocation22 + $0x1e0] ss:$16 sps:$4 sm:$0xff]  }
0x12de   : > { %v5720_v45 = vsel %vm2862_vm4, %v5718_v55, %v7931_v44  ;;  %v5721_v21 = vsel %vm2862_vm4, %v5719_v59, %v7932_v43  ;;  %v8138_v43 = vld [vmem:[#allocation22 + $0x1e8] ss:$16 sps:$4 sm:$0xff]  }
0x12df   : > { %v5722_v61 = vpack.c.bf16 %v5721_v21, %v5720_v45 }
0x12e1   : > { %7660 = vmatmul.mubr.bf16.vlgmr.msra.gmra.mrb[44].mxu0 %v5722_v61 }
0x12e2   : > { %6183 = vmatprep.mubr.bf16.mxu0 %v8884_v50  ;;  %v8093_v50 = vld [vmem:[#allocation22 + $0x100] ss:$16 sps:$4 sm:$0xff]   ;;  %6152 = vmatpush1.bf16.msra.mxu0 %v8096_v18  ;;  %v8142_v18 = vld [vmem:[#allocation25 + $0x1c0] sm:$0xff]  }
0x12e3   : > { %6109 = vmatpush1.bf16.msra.mxu1 %v8093_v50  ;;  %6153 = vmatprep.subr.bf16.mxu0 %v8104_v63  ;;  %v8145_v63 = vld [vmem:[#allocation25 + $0x148] sm:$0xff]  }
0x12e4   : > { %6110 = vmatprep.subr.bf16.mxu1 %v8101_v20  ;;  %v8144_v20 = vld [vmem:[#allocation25 + $0x180] sm:$0xff]  }
0x12e7   : > { %6111 = vmatpush1.bf16.msra.mxu1 %v8099_v1  ;;  %v8146_v1 = vld [vmem:[#allocation25 + $0x1c8] sm:$0xff]  }
0x12e8   : > { %6112 = vmatprep.subr.bf16.mxu1 %v8107_v60  ;;  %v8156_v60 = vld [vmem:[#allocation25 + $0x198] sm:$0xff]  }
0x12eb   : > { %6113 = vmatpush1.bf16.msra.mxu1 %v8105_v41  ;;  %v8158_v41 = vld [vmem:[#allocation25 + $0x1e0] sm:$0xff]  }
0x12ec   : > { %6114 = vmatprep.subr.bf16.mxu1 %v8113_v54  ;;  %v8160_v54 = vld [vmem:[#allocation25 + $0x1a0] sm:$0xff]  }
0x12ef   : > { %6115 = vmatpush1.bf16.msra.mxu1 %v8111_v8  ;;  %v8162_v8 = vld [vmem:[#allocation25 + $0x1e8] sm:$0xff]  }
0x12f0   : > { %6116 = vmatprep.subr.bf16.mxu1 %v8119_v58  ;;  %v8164_v58 = vld [vmem:[#allocation25 + $0x1a8] sm:$0xff]  }
0x12f3   : > { %6117 = vmatpush1.bf16.msra.mxu1 %v8117_v0  ;;  %v8166_v0 = vld [vmem:[#allocation25 + $0x1f0] sm:$0xff]  }
0x12f4   : > { %6118 = vmatprep.subr.bf16.mxu1 %v8125_v32  ;;  %v8168_v32 = vld [vmem:[#allocation25 + $0x1b0] sm:$0xff]  }
0x12f7   : > { %6119 = vmatpush1.bf16.msra.mxu1 %v8123_v5  ;;  %v8170_v5 = vld [vmem:[#allocation25 + $0x1f8] sm:$0xff]  }
0x12f8   : > { %6120 = vmatprep.subr.bf16.mxu1 %v8131_v51  ;;  %v8172_v51 = vld [vmem:[#allocation25 + $0x1b8] sm:$0xff]  }
0x12fb   : > { %6121 = vmatpush1.bf16.msra.mxu1 %v8129_v48 }
0x12fc   : > { %6122 = vmatprep.subr.bf16.mxu1 %v8137_v49 }
0x12ff   : > { %6123 = vmatpush1.bf16.msra.mxu1 %v8135_v42 }
0x1300   : > { %7434 = vmatprep.subr.bf16.mxu1 %v8141_v37 }
0x13b4   : > { %v5830_v2 = vpop.f32.mrb[44].mxu0 }
0x13b5   : > { %v5831_v39 = vadd.f32 %v7228_v36, %v5830_v2  ;;  %v7661_v4 = vpop.f32.mrb[45].mxu0  ;;  %v7238_v2 = vld [vmem:[#allocation19 + $0x1] ss:$0 sm:$0xff] }
0x13b6   : > { %v5833_v30 = vpop.f32.mrb[46].mxu0 }
0x13b7   : > { %v5845_v31 = vmul.f32 %v7237_v34, %v5831_v39  ;;  %v5834_v22 = vadd.f32 %v7228_v36, %v5833_v30  ;;  %v7662_v62 = vpop.f32.mrb[47].mxu0 }
0x13b9   : > { %v5846_v33 = vmul.f32 %v7237_v34, %v5834_v22  ;;  %v10278_v12 = vadd.f32 %v5845_v31, %v9929_v46  ;;  %v8102_v46 = vld [vmem:[#allocation22 + $0x128] ss:$16 sps:$4 sm:$0xff]   ;;  %v7239_v31 = vld [vmem:[#allocation20 + $0x1] ss:$0 sm:$0xff] }
0x13ba   : > { %6154 = vmatpush1.bf16.msra.mxu0 %v8102_v46  ;;  %v8147_v46 = vld [vmem:[#allocation25 + $0x108] sm:$0xff]  }
0x13bb   : > { %5853 = vadd.xlane.f32.xlu1 %v10278_v12  ;;  %v10282_v26 = vadd.f32 %v5846_v33, %v9933_v47  ;;  %6155 = vmatprep.subr.bf16.mxu0 %v8110_v15  ;;  %v8157_v15 = vld [vmem:[#allocation25 + $0x160] sm:$0xff]  }
0x13bd   : > { %5855 = vadd.xlane.f32.xlu0 %v10282_v26 }
0x13be   : > { %6156 = vmatpush1.bf16.msra.mxu0 %v8108_v52  ;;  %v8159_v52 = vld [vmem:[#allocation25 + $0x120] sm:$0xff]  }
0x13bf   : > { %6157 = vmatprep.subr.bf16.mxu0 %v8116_v56  ;;  %v8161_v56 = vld [vmem:[#allocation25 + $0x168] sm:$0xff]  }
0x13c2   : > { %6158 = vmatpush1.bf16.msra.mxu0 %v8114_v57  ;;  %v8163_v57 = vld [vmem:[#allocation25 + $0x128] sm:$0xff]  }
0x13c3   : > { %6159 = vmatprep.subr.bf16.mxu0 %v8122_v7  ;;  %v8165_v7 = vld [vmem:[#allocation25 + $0x170] sm:$0xff]  }
0x13c6   : > { %6160 = vmatpush1.bf16.msra.mxu0 %v8120_v25  ;;  %v8167_v25 = vld [vmem:[#allocation25 + $0x130] sm:$0xff]  }
0x13c7   : > { %6161 = vmatprep.subr.bf16.mxu0 %v8128_v9  ;;  %v8169_v9 = vld [vmem:[#allocation25 + $0x178] sm:$0xff]  }
0x13ca   : > { %6162 = vmatpush1.bf16.msra.mxu0 %v8126_v6  ;;  %v8171_v6 = vld [vmem:[#allocation25 + $0x138] sm:$0xff]  }
0x13cb   : > { %6163 = vmatprep.subr.bf16.mxu0 %v8134_v40  ;;  %v5926_v40 = vld [vmem:[#allocation23 + $0x4] sm:$0xf] }
0x13cc   : > { %v5931_v48 = vrot.slane %v5926_v40, %v9508_v11  ;;  %v5935_v49 = vrot.slane %v5926_v40, %v9516_v13 }
0x13ce   : > { %6164 = vmatpush1.bf16.msra.mxu0 %v8132_v3  ;;  %v5939_v3 = vrot.slane %v5926_v40, %v9691_v28 }
0x13cf   : > { %6165 = vmatprep.subr.bf16.mxu0 %v8140_v53  ;;  %v5943_v53 = vrot.slane %v5926_v40, %v3078_v19 }
0x13d2   : > { %6166 = vmatpush1.bf16.msra.mxu0 %v8138_v43 }
0x13d3   : > { %7456 = vmatprep.subr.bf16.mxu0 %v8142_v18 }
0x1448   : > { %v5854_v47 = vpop.xlane.xlu1 %5853 }
0x1449   : > { %v5857_v29 = vmul.f32 0.0078125, %v5854_v47  ;;  %v8148_v47 = vld [vmem:[#allocation25 + $0x188] sm:$0xff]  }
0x144a   : > { %v5856_v27 = vpop.xlane.xlu0 %5855 }
0x144b   : > { %v10286_v38 = vsub.f32 %v10278_v12, %v5857_v29  ;;  %v5858_v23 = vmul.f32 0.0078125, %v5856_v27  ;;  %v8149_v29 = vld [vmem:[#allocation25 + $0x150] sm:$0xff]  }
0x144c   : > { %v8150_v27 = vld [vmem:[#allocation25 + $0x1d0] sm:$0xff]  }
0x144d   : > { %v10289_v35 = vsub.f32 %v10282_v26, %v5858_v23  ;;  %v5861_v14 = vmul.f32 %v10286_v38, %v10286_v38  ;;  %v8152_v23 = vld [vmem:[#allocation25 + $0x190] sm:$0xff]  }
0x144f   : > { %5863 = vadd.xlane.f32.xlu0 %v5861_v14  ;;  %v5862_v16 = vmul.f32 %v10289_v35, %v10289_v35  ;;  %v8154_v14 = vld [vmem:[#allocation25 + $0x1d8] sm:$0xff]  }
0x1451   : > { %5865 = vadd.xlane.f32.xlu1 %v5862_v16  ;;  %v8155_v16 = vld [vmem:[#allocation25 + $0x118] sm:$0xff]  }
0x14dc   : > { %v5864_v44 = vpop.xlane.xlu0 %5863 }
0x14dd   : > { %v5867_v55 = vmul.f32 0.0078125, %v5864_v44 }
0x14de   : > { %v5866_v59 = vpop.xlane.xlu1 %5865 }
0x14df   : > { %v5869_v45 = vadd.f32 1e-05, %v5867_v55  ;;  %v5868_v21 = vmul.f32 0.0078125, %v5866_v59 }
0x14e1   : > { %8273 = vrsqrt.f32 %v5869_v45  ;;  %v5870_v61 = vadd.f32 1e-05, %v5868_v21 }
0x14e3   : > { %8275 = vrsqrt.f32 %v5870_v61 }
0x14eb   : > { %v8274_v36 = vpop.eup %8273 }
0x14ec   : > { %v5873_v34 = vmul.f32 %v8274_v36, %v10286_v38  ;;  %v8151_v38 = vld [vmem:[#allocation25 + $0x110] sm:$0xff]  }
0x14ed   : > { %v8276_v39 = vpop.eup %8275 }
0x14ee   : > { %v5874_v4 = vmul.f32 %v8276_v39, %v10289_v35  ;;  %v5881_v30 = vmul.f32 %v7238_v2, %v5873_v34  ;;  %v8153_v35 = vld [vmem:[#allocation25 + $0x158] sm:$0xff]  }
0x14f0   : > { %v5882_v22 = vmul.f32 %v7238_v2, %v5874_v4  ;;  %v5889_v62 = vadd.f32 %v7239_v31, %v5881_v30 }
0x14f2   : > { %v5890_v33 = vadd.f32 %v7239_v31, %v5882_v22 }
0x14f4   : > { %v5891_v50 = vpack.c.bf16 %v5890_v33, %v5889_v62 }
0x14f6   : > { %6141 = vmatmul.mubr.bf16.vlgmr.msra.gmra.mrb[56].mxu1 %v5891_v50  ;;  %6184 = vmatmul.mubr.bf16.vlgmr.msra.gmra.mrb[48].mxu0 %v5891_v50 }
0x14f7   : > { %7435 = vmatpush3.bf16.msra.mxu1 %v8143_v17  ;;  %7457 = vmatpush3.bf16.msra.mxu0 %v8144_v20 }
0x14f8   : > { %7436 = vmatprep.subr.bf16.mxu1 %v8145_v63  ;;  %7458 = vmatprep.subr.bf16.mxu0 %v8146_v1 }
0x14fb   : > { %7437 = vmatpush3.bf16.msra.mxu1 %v8147_v46  ;;  %7459 = vmatpush3.bf16.msra.mxu0 %v8148_v47 }
0x14fc   : > { %7438 = vmatprep.subr.bf16.mxu1 %v8149_v29  ;;  %7460 = vmatprep.subr.bf16.mxu0 %v8150_v27 }
0x14ff   : > { %7439 = vmatpush3.bf16.msra.mxu1 %v8151_v38  ;;  %7461 = vmatpush3.bf16.msra.mxu0 %v8152_v23 }
0x1500   : > { %7440 = vmatprep.subr.bf16.mxu1 %v8153_v35  ;;  %7462 = vmatprep.subr.bf16.mxu0 %v8154_v14 }
0x1503   : > { %7441 = vmatpush3.bf16.msra.mxu1 %v8155_v16  ;;  %7463 = vmatpush3.bf16.msra.mxu0 %v8156_v60 }
0x1504   : > { %7442 = vmatprep.subr.bf16.mxu1 %v8157_v15  ;;  %7464 = vmatprep.subr.bf16.mxu0 %v8158_v41 }
0x1507   : > { %7443 = vmatpush3.bf16.msra.mxu1 %v8159_v52  ;;  %7465 = vmatpush3.bf16.msra.mxu0 %v8160_v54 }
0x1508   : > { %7444 = vmatprep.subr.bf16.mxu1 %v8161_v56  ;;  %7466 = vmatprep.subr.bf16.mxu0 %v8162_v8 }
0x150b   : > { %7445 = vmatpush3.bf16.msra.mxu1 %v8163_v57  ;;  %7467 = vmatpush3.bf16.msra.mxu0 %v8164_v58 }
0x150c   : > { %7446 = vmatprep.subr.bf16.mxu1 %v8165_v7  ;;  %7468 = vmatprep.subr.bf16.mxu0 %v8166_v0 }
0x150f   : > { %7447 = vmatpush3.bf16.msra.mxu1 %v8167_v25  ;;  %7469 = vmatpush3.bf16.msra.mxu0 %v8168_v32 }
0x1510   : > { %7448 = vmatprep.subr.bf16.mxu1 %v8169_v9  ;;  %7470 = vmatprep.subr.bf16.mxu0 %v8170_v5 }
0x1513   : > { %7449 = vmatpush3.bf16.msra.mxu1 %v8171_v6  ;;  %7471 = vmatpush3.bf16.msra.mxu0 %v8172_v51 }
0x1514   : > { %7663 = vmatprep.subr.bf16.mxu1 %v8883_v24 }
0x15c9   : > { %v6142_v42 = vpop.f32.mrb[56].mxu1  ;;  %v6185_v43 = vpop.f32.mrb[48].mxu0 }
0x15ca   : > { %v10303_v44 = vadd.f32 %v6142_v42, %v5931_v48  ;;  %v10305_v55 = vadd.f32 %v6185_v43, %v5939_v3  ;;  %v6144_v59 = vpop.f32.mrb[57].mxu1  ;;  %v6187_v45 = vpop.f32.mrb[49].mxu0 }
0x15cb   : > { %v10307_v21 = vadd.f32 %v6144_v59, %v5935_v49  ;;  %v10309_v61 = vadd.f32 %v6187_v45, %v5943_v53  ;;  %v6146_v11 = vpop.f32.mrb[58].mxu1  ;;  %v6189_v36 = vpop.f32.mrb[50].mxu0 }
0x15cc   : > { %v6202_v28 = vmul.f32 0.044715, %v10303_v44  ;;  %v6204_v13 = vmul.f32 0.044715, %v10305_v55  ;;  %v6147_v10 = vadd.f32 %v6146_v11, %v5931_v48  ;;  %v6190_v19 = vadd.f32 %v6189_v36, %v5939_v3  ;;  %v6148_v2 = vpop.f32.mrb[59].mxu1  ;;  %v6191_v34 = vpop.f32.mrb[51].mxu0 }
0x15cd   : > { %v6203_v39 = vmul.f32 0.044715, %v10307_v21  ;;  %v6205_v4 = vmul.f32 0.044715, %v10309_v61  ;;  %v10315_v30 = vadd.f32 %v6148_v2, %v5935_v49  ;;  %v10317_v31 = vadd.f32 %v6191_v34, %v5943_v53 }
0x15ce   : > { %v6210_v22 = vmul.f32 %v6202_v28, %v10303_v44  ;;  %v6212_v62 = vmul.f32 %v6204_v13, %v10305_v55  ;;  %v6206_v33 = vmul.f32 0.044715, %v6147_v10  ;;  %v6208_v50 = vmul.f32 0.044715, %v6190_v19 }
0x15cf   : > { %v6211_v37 = vmul.f32 %v6203_v39, %v10307_v21  ;;  %v6213_v18 = vmul.f32 %v6205_v4, %v10309_v61  ;;  %v6207_v17 = vmul.f32 0.044715, %v10315_v30  ;;  %v6209_v20 = vmul.f32 0.044715, %v10317_v31 }
0x15d0   : > { %v6218_v63 = vmul.f32 %v6210_v22, %v10303_v44  ;;  %v6220_v1 = vmul.f32 %v6212_v62, %v10305_v55  ;;  %v6214_v46 = vmul.f32 %v6206_v33, %v6147_v10  ;;  %v6216_v47 = vmul.f32 %v6208_v50, %v6190_v19 }
0x15d1   : > { %v6219_v29 = vmul.f32 %v6211_v37, %v10307_v21  ;;  %v6221_v27 = vmul.f32 %v6213_v18, %v10309_v61  ;;  %v6215_v38 = vmul.f32 %v6207_v17, %v10315_v30  ;;  %v6217_v23 = vmul.f32 %v6209_v20, %v10317_v31 }
0x15d2   : > { %v6226_v35 = vadd.f32 %v6218_v63, %v10303_v44  ;;  %v6228_v14 = vadd.f32 %v6220_v1, %v10305_v55  ;;  %v6222_v16 = vmul.f32 %v6214_v46, %v6147_v10  ;;  %v6224_v60 = vmul.f32 %v6216_v47, %v6190_v19 }
0x15d3   : > { %v6223_v15 = vmul.f32 %v6215_v38, %v10315_v30  ;;  %v6225_v41 = vmul.f32 %v6217_v23, %v10317_v31  ;;  %v6227_v57 = vadd.f32 %v6219_v29, %v10307_v21  ;;  %v6229_v25 = vadd.f32 %v6221_v27, %v10309_v61 }
0x15d4   : > { %v6234_v52 = vmul.f32 0.7978846, %v6226_v35  ;;  %v6236_v54 = vmul.f32 0.7978846, %v6228_v14  ;;  %v6230_v56 = vadd.f32 %v6222_v16, %v6147_v10  ;;  %v6232_v8 = vadd.f32 %v6224_v60, %v6190_v19 }
0x15d5   : > { %v6231_v58 = vadd.f32 %v6223_v15, %v10315_v30  ;;  %v6235_v32 = vmul.f32 0.7978846, %v6227_v57  ;;  %v6233_v5 = vadd.f32 %v6225_v41, %v10317_v31  ;;  %v6237_v6 = vmul.f32 0.7978846, %v6229_v25 }
0x15d6   : > { %8277 = vtanh.f32 %v6234_v52  ;;  %v6238_v7 = vmul.f32 0.7978846, %v6230_v56  ;;  %v6240_v0 = vmul.f32 0.7978846, %v6232_v8  ;;  %v6194_v43 = vmul.f32 0.5, %v10303_v44 }
0x15d7   : > { %8279 = vtanh.f32 %v6236_v54  ;;  %v6239_v9 = vmul.f32 0.7978846, %v6231_v58  ;;  %v6241_v51 = vmul.f32 0.7978846, %v6233_v5  ;;  %v6198_v59 = vmul.f32 0.5, %v6147_v10  ;;  %v8173_v5 = vld [vmem:[%s10555_s3] sm:$0xff]  }
0x15d8   : > { %8281 = vtanh.f32 %v6238_v7  ;;  %v6196_v36 = vmul.f32 0.5, %v10305_v55  ;;  %v6200_v28 = vmul.f32 0.5, %v6190_v19  ;;  %v6195_v34 = vmul.f32 0.5, %v10307_v21  ;;  %v7305_v56 = vld [vmem:[#allocation28 + $0x1] ss:$0 sm:$0xff] }
0x15d9   : > { %8283 = vtanh.f32 %v6240_v0  ;;  %v6199_v33 = vmul.f32 0.5, %v10315_v30  ;;  %v6197_v10 = vmul.f32 0.5, %v10309_v61  ;;  %v6201_v17 = vmul.f32 0.5, %v10317_v31  ;;  %v7272_v30 = vld [vmem:[#allocation26 + $0x1] ss:$0 sm:$0xff] }
0x15da   : > { %8285 = vtanh.f32 %v6235_v32 }
0x15db   : > { %8287 = vtanh.f32 %v6239_v9 }
0x15dc   : > { %8289 = vtanh.f32 %v6237_v6  ;;  %v8174_v6 = vld [vmem:[%s10555_s3 + $0x8] sm:$0xff]  }
0x15dd   : > { %8291 = vtanh.f32 %v6241_v51 }
0x15e0   : > { %v8278_v40 = vpop.eup %8277 }
0x15e1   : > { %v8280_v48 = vpop.eup %8279  ;;  %v6250_v3 = vadd.f32 1.0, %v8278_v40 }
0x15e2   : > { %v8282_v49 = vpop.eup %8281  ;;  %v6252_v53 = vadd.f32 1.0, %v8280_v48 }
0x15e3   : > { %v8284_v42 = vpop.eup %8283  ;;  %v6254_v45 = vadd.f32 1.0, %v8282_v49  ;;  %v6258_v4 = vmul.f32 %v6250_v3, %v6194_v43  ;;  %v8176_v43 = vld [vmem:[%s10555_s3 + $0x18] sm:$0xff]  }
0x15e4   : > { %v8286_v11 = vpop.eup %8285  ;;  %v6256_v13 = vadd.f32 1.0, %v8284_v42  ;;  %v6260_v37 = vmul.f32 %v6252_v53, %v6196_v36  ;;  %v8175_v42 = vld [vmem:[%s10555_s3 + $0x10] sm:$0xff]   ;;  %v8180_v36 = vld [vmem:[%s10555_s3 + $0x38] sm:$0xff]  }
0x15e5   : > { %v8288_v2 = vpop.eup %8287  ;;  %v6251_v39 = vadd.f32 1.0, %v8286_v11  ;;  %v6262_v22 = vmul.f32 %v6254_v45, %v6198_v59  ;;  %v8177_v59 = vld [vmem:[%s10555_s3 + $0x20] sm:$0xff]   ;;  %v8178_v45 = vld [vmem:[%s10555_s3 + $0x28] sm:$0xff]   ;;  %v8179_v11 = vld [vmem:[%s10555_s3 + $0x30] sm:$0xff]  }
0x15e6   : > { %v8290_v62 = vpop.eup %8289  ;;  %v6255_v50 = vadd.f32 1.0, %v8288_v2  ;;  %v6264_v18 = vmul.f32 %v6256_v13, %v6200_v28 }
0x15e7   : > { %v8292_v44 = vpop.eup %8291  ;;  %v6253_v55 = vadd.f32 1.0, %v8290_v62  ;;  %v6266_v19 = vpack.c.bf16 %v6262_v22, %v6258_v4  ;;  %v6259_v20 = vmul.f32 %v6251_v39, %v6195_v34  ;;  %v7306_v62 = vld [vmem:[%s10557_s5] ss:$0 sm:$0xff] }
0x15e8   : > { %v6263_v63 = vmul.f32 %v6255_v50, %v6199_v33  ;;  %v6257_v1 = vadd.f32 1.0, %v8292_v44  ;;  %v6268_v21 = vpack.c.bf16 %v6264_v18, %v6260_v37  ;;  %v7307_v18 = vld [vmem:[#allocation29] ss:$0 sm:$0xff] }
0x15e9   : > { %v6261_v47 = vmul.f32 %v6253_v55, %v6197_v10 }
0x15ea   : > { %v6267_v46 = vpack.c.bf16 %v6263_v63, %v6259_v20  ;;  %v6265_v29 = vmul.f32 %v6257_v1, %v6201_v17 }
0x15ec   : > { %6567 = vmatprep.mubr.bf16.mxu1 %v6267_v46  ;;  %v6269_v27 = vpack.c.bf16 %v6265_v29, %v6261_v47 }
0x15ed   : > { %6568 = vmatmul.mubr.bf16.vlgmr.msra.gmra.mrb[60].mxu1 %v6266_v19 }
0x15ee   : > { %6608 = vmatprep.mubr.bf16.mxu0 %v6269_v27  ;;  %7679 = vmatprep.mubr.msk.bf16.mxu1 %vm8885_vm0, %v8883_v24 }
0x15ef   : > { %6609 = vmatmul.mubr.bf16.vlgmr.msra.gmra.mrb[52].mxu0 %v6268_v21  ;;  %7664 = vmatpush3.bf16.msra.mxu1 %v8173_v5 }
0x15f0   : > { %7665 = vmatprep.subr.bf16.mxu1 %v8883_v24 }
0x15f3   : > { %7666 = vmatpush3.bf16.msra.mxu1 %v8174_v6 }
0x15f4   : > { %7667 = vmatprep.subr.bf16.mxu1 %v8883_v24 }
0x15f7   : > { %7668 = vmatpush3.bf16.msra.mxu1 %v8175_v42 }
0x15f8   : > { %7669 = vmatprep.subr.bf16.mxu1 %v8883_v24 }
0x15fb   : > { %7670 = vmatpush3.bf16.msra.mxu1 %v8176_v43 }
0x15fc   : > { %7671 = vmatprep.subr.bf16.mxu1 %v8883_v24 }
0x15ff   : > { %7672 = vmatpush3.bf16.msra.mxu1 %v8177_v59 }
0x1600   : > { %7673 = vmatprep.subr.bf16.mxu1 %v8883_v24 }
0x1603   : > { %7674 = vmatpush3.bf16.msra.mxu1 %v8178_v45 }
0x1604   : > { %7675 = vmatprep.subr.bf16.mxu1 %v8883_v24 }
0x1607   : > { %7676 = vmatpush3.bf16.msra.mxu1 %v8179_v11 }
0x1608   : > { %7677 = vmatprep.subr.bf16.mxu1 %v8883_v24 }
0x160b   : > { %7678 = vmatpush3.bf16.msra.mxu1 %v8180_v36 }
0x16c0   : > { %v7450_v61 = vpop.f32.mrb[60].mxu1 }
0x16c1   : > { %v7451_v31 = vpop.f32.mrb[61].mxu1 }
0x16c2   : > { %v7472_v38 = vpop.f32.mrb[52].mxu0  ;;  %v7452_v23 = vadd.f32 %v7451_v31, %v7450_v61  ;;  %v7453_v35 = vpop.f32.mrb[62].mxu1 }
0x16c3   : > { %v7473_v14 = vpop.f32.mrb[53].mxu0  ;;  %v7454_v16 = vpop.f32.mrb[63].mxu1 }
0x16c4   : > { %v6570_v60 = vadd.f32 %v7452_v23, %v7272_v30  ;;  %v7474_v15 = vadd.f32 %v7473_v14, %v7472_v38  ;;  %v7475_v41 = vpop.f32.mrb[54].mxu0  ;;  %v7455_v52 = vadd.f32 %v7454_v16, %v7453_v35 }
0x16c5   : > { %v7476_v54 = vpop.f32.mrb[55].mxu0 }
0x16c6   : > { %v6611_v8 = vadd.f32 %v7474_v15, %v6570_v60  ;;  %v6573_v57 = vadd.f32 %v7455_v52, %v7272_v30  ;;  %v7477_v58 = vadd.f32 %v7476_v54, %v7475_v41 }
0x16c8   : > { %v6614_v7 = vadd.f32 %v7477_v58, %v6573_v57  ;;  %v6625_v0 = vmul.f32 %v7305_v56, %v6611_v8 }
0x16ca   : > { %v6627_v25 = vadd.f32 %v6625_v0, %v10278_v12  ;;  %v6626_v32 = vmul.f32 %v7305_v56, %v6614_v7 }
0x16cc   : > { %6631 = vadd.xlane.f32.xlu0 %v6627_v25  ;;  %v6628_v9 = vadd.f32 %v6626_v32, %v10282_v26 }
0x16ce   : > { %6633 = vadd.xlane.f32.xlu1 %v6628_v9 }
0x1759   : > { %v6632_v12 = vpop.xlane.xlu0 %6631 }
0x175a   : > { %v6635_v51 = vmul.f32 0.0078125, %v6632_v12 }
0x175b   : > { %v6634_v40 = vpop.xlane.xlu1 %6633 }
0x175c   : > { %v6637_v48 = vsub.f32 %v6627_v25, %v6635_v51  ;;  %v6636_v26 = vmul.f32 0.0078125, %v6634_v40 }
0x175e   : > { %v6638_v3 = vsub.f32 %v6628_v9, %v6636_v26  ;;  %v6639_v49 = vmul.f32 %v6637_v48, %v6637_v48 }
0x1760   : > { %6641 = vadd.xlane.f32.xlu0 %v6639_v49  ;;  %v6640_v53 = vmul.f32 %v6638_v3, %v6638_v3 }
0x1762   : > { %6643 = vadd.xlane.f32.xlu1 %v6640_v53 }
0x17ed   : > { %v6642_v28 = vpop.xlane.xlu0 %6641 }
0x17ee   : > { %v6645_v13 = vmul.f32 0.0078125, %v6642_v28 }
0x17ef   : > { %v6644_v2 = vpop.xlane.xlu1 %6643 }
0x17f0   : > { %v6647_v34 = vadd.f32 1e-05, %v6645_v13  ;;  %v6646_v39 = vmul.f32 0.0078125, %v6644_v2 }
0x17f2   : > { %8293 = vrsqrt.f32 %v6647_v34  ;;  %v6648_v4 = vadd.f32 1e-05, %v6646_v39 }
0x17f4   : > { %8295 = vrsqrt.f32 %v6648_v4 }
0x17fc   : > { %v8294_v22 = vpop.eup %8293 }
0x17fd   : > { %v6651_v33 = vmul.f32 %v8294_v22, %v6637_v48 }
0x17fe   : > { %v8296_v50 = vpop.eup %8295 }
0x17ff   : > { %v6652_v37 = vmul.f32 %v8296_v50, %v6638_v3  ;;  %v6659_v24 = vmul.f32 %v7306_v62, %v6651_v33 }
0x1801   : > { %v6660_v44 = vmul.f32 %v7306_v62, %v6652_v37  ;;  %v6667_v10 = vadd.f32 %v7307_v18, %v6659_v24 }
0x1803   : > { %v6668_v17 = vadd.f32 %v7307_v18, %v6660_v44 }
0x1805   : > { %v6669_v55 = vpack.c.bf16 %v6668_v17, %v6667_v10 }
0x1807   : > { %7680 = vmatmul.mubr.bf16.vlgmr.msra.gmra.mrb[64].mxu1 %v6669_v55 }
0x18da   : > { %v6768_v19 = vpop.f32.mrb[64].mxu1 }
0x18db   : > { %6775 = vst [vmem:[%s816_s28] sm:$0xff] %v6768_v19  ;;  %v7681_v20 = vpop.f32.mrb[65].mxu1 }
0x18dc   : > { %v6771_v63 = vpop.f32.mrb[66].mxu1 }
0x18dd   : > { %6776 = vst [vmem:[%s816_s28 + $0x8] sm:$0xff] %v6771_v63  ;;  %v7682_v1 = vpop.f32.mrb[67].mxu1 }
0x18de   : > { %8768 = shalt.err (!%p8765_p11)
}
0x18df   : > { %s8769_s30 = scalar_lea.hbm %s10390_s23, 256  ;;  %s8773_s24 = scalar_lea.hbm %s10559_s22, 512 }
0x18e0   : > { %p8770_p0 = scmp.ne.s32.totalorder %s10390_s23, %s8769_s30  ;;  %p8774_p3 = scmp.lt.u32.totalorder %s10390_s23, %s10559_s22 }
0x18e1   : > { %p8775_p12 = scmp.lt.u32.totalorder %s8773_s24, %s8769_s30  ;;  %p8777_p2 = scmp.lt.u32.totalorder %s8769_s30, %s10390_s23 }
0x18e2   : > { %p8771_p8 = pnand %p8770_p0, %p10560_p1 }
0x18e3   : > { %p8776_p13 = por %p8775_p12, %p8774_p3 }
0x18e4   : > { %p8772_p9 = pneg %p8771_p8 }
0x18e5   : > { %p8778_p4 = por %p8777_p2, %p8776_p13 }
0x18e7   : > { %p8779_p5 = pnand %p8778_p4, %p8772_p9 }
0x18e9   : > { %8782 = shalt.err (!%p8779_p5)
}
0x18ea   : > { %s8892_s4 = smov 128   ;;  %s8893_s9 = smov 8  }
0x18eb   : > { %7747 = dma.vmem_to_hbm [thread:$0]  (%p10560_p1), %s10385_s18, 256, %s10390_s23, %s10392_s20, %s8892_s4, %s8892_s4, %s8893_s9  }
0x18ec PF: > { %s10561_s26 = sld [smem:[#allocation46_spill]]  ;;  %s10562_s19 = sld [smem:[#allocation43_spill]] }
0x18ed   : > { %s10563_s6 = sld [smem:[#allocation51_spill]] }
0x18f2   : > { %p7834_p6 = scmp.ge.s32.totalorder %s10561_s26, 2  ;;  %s6806_s2 = sand.u32 1, %s10562_s19  }
0x18f3   : > { %p10564_p7 = scmp.ne.s32.totalorder %s10563_s6, 0  ;;  %s6807_s30 = scalar_lea.sflag [#allocation7], %s6806_s2 }
0x18f5   : > { %p7799_p10 = pnand %p7834_p6, %p10564_p7 }
0x18f7   : > { %8838 = dma.done.wait (!%p7799_p10), %s6807_s30, 256  }
0x18f8   : > { %8840 = vsyncadd (!%p7799_p10), %s6807_s30, 4294967040  ;;  %s10565_s30 = sld [smem:[#allocation48_spill]]  ;;  %s10566_s6 = sld [smem:[#allocation44_spill]] }
0x18f9   : > { %s10567_s4 = sld [smem:[#allocation45_spill]]  ;;  %s10568_s29 = sld [smem:[#allocation49_spill]] }
0x18fe   : > { %p43_p11 = scmp.ge.s32.totalorder %s10565_s30, 4  }
0x1900   :  { %45 = sbr.rel (!%p43_p11) target bundleno = 32 (0x20), region = 223 }
0x1907   :  { %6812 = vsyncpa [#allocation6], 1 }
0x1908   :  { %6814 = vsyncpa [#allocation6 + $0x1], 1 }
0x1909   :  { %6815 = vsyncpa [#allocation9], 1 }
0x190a   :  { %6816 = vsyncpa [#allocation12], 1 }
0x190b   :  { %6817 = vsyncpa [#allocation15], 1 }
0x190c   :  { %6818 = vsyncpa [#allocation18], 1 }
0x190d   :  { %6819 = vsyncpa [#allocation21], 1 }
0x190e   :  { %6820 = vsyncpa [#allocation24], 1 }
0x190f   :  { %6821 = vsyncpa [#allocation27], 1 }
0x1910   :  { %6822 = vsyncpa [#allocation30], 1 }
0x1911   :  { %6823 = vsyncpa [#allocation7], 1 }
0x1912   :  { %6825 = vsyncpa [#allocation7 + $0x1], 1 }

</bundles_post_ra>
